<compile_context>
chip_gen: v7x
topology: tpu7x:2x2x1
jax: 0.10.0
libtpu: 0.0.40
codegen_flags: <defaults>
</compile_context>

<pallas_src>
import functools
import math

import jax
import jax.numpy as jnp
from jax.experimental import pallas as pl
from jax.experimental.pallas import tpu as pltpu

# ---- module hyper-parameters (from RNN.py) ----------------------------------
HIDDEN_SIZE = 256
INPUT_SIZE = 64
NUM_LAYERS = 3
OUTPUT_SIZE = 2

_SUBLANE = 8       # f32 sublane tile height
_FC_PAD = 128      # lane-dense FC output width (padded, sliced back outside)


def _round_up(n, m):
    return ((n + m - 1) // m) * m


# ---- fused Pallas kernel -----------------------------------------------------
def _cursor_rnn_kernel(
    x_ref,                      # (T*Bp, INPUT_SIZE)  time-major, batch-padded, flattened
    wih0_ref, whh0_ref, b0_ref, # layer 0: (D,H), (H,H), (1,H)  (pre-transposed, b_ih+b_hh)
    wih1_ref, whh1_ref, b1_ref, # layer 1
    wih2_ref, whh2_ref, b2_ref, # layer 2
    fcw_ref, fcb_ref,           # final Linear padded to (H, 128) / (1, 128)
    out_ref,                    # (Bp, 128)
    buf_a, buf_b,               # (T*Bp, H) VMEM scratch: projection / output sequence
    *, seq_len, b_rows,
):
    """Fused 3-layer tanh RNN (h0 = 0) + final Linear, entirely VMEM-resident."""

    def recurrence(proj_ref, seq_out_ref, whh_ref):
        # proj_ref holds the hoisted projection (x @ W_ih + b) for every
        # timestep; the serial critical path is only tanh(proj[t] + h @ W_hh).
        whh = whh_ref[...]                         # one load, shared by all T dots
        h = jnp.zeros((b_rows, whh_ref.shape[0]), jnp.float32)
        # Fully unrolled time loop (seq_len is small & static): static aligned
        # slice offsets + cross-iteration scheduler visibility.
        for t in range(seq_len):
            row = t * b_rows                       # multiple of 8 (sublane-aligned)
            h = jnp.tanh(
                proj_ref[pl.ds(row, b_rows), :]
                + jnp.dot(h, whh, preferred_element_type=jnp.float32)
            )
            if seq_out_ref is not None:            # static flag
                seq_out_ref[pl.ds(row, b_rows), :] = h
        return h

    # ---- layer 0: hoisted projection (one big matmul), then recurrence ------
    buf_a[...] = (
        jnp.dot(x_ref[...], wih0_ref[...], preferred_element_type=jnp.float32)
        + b0_ref[...]
    )
    recurrence(buf_a, buf_b, whh0_ref)             # seq0 -> buf_b

    # ---- layer 1 -------------------------------------------------------------
    buf_a[...] = (                                 # proj1 (reads seq0, overwrites proj0)
        jnp.dot(buf_b[...], wih1_ref[...], preferred_element_type=jnp.float32)
        + b1_ref[...]
    )
    recurrence(buf_a, buf_b, whh1_ref)             # seq1 -> buf_b

    # ---- layer 2 (only the last hidden state is needed downstream) ----------
    buf_a[...] = (                                 # proj2 (reads seq1, overwrites proj1)
        jnp.dot(buf_b[...], wih2_ref[...], preferred_element_type=jnp.float32)
        + b2_ref[...]
    )
    h_last = recurrence(buf_a, None, whh2_ref)

    # ---- fused final Linear on the last timestep (lane-dense output) --------
    out_ref[...] = (
        jnp.dot(h_last, fcw_ref[...], preferred_element_type=jnp.float32)
        + fcb_ref[...]
    ).astype(out_ref.dtype)


# ---- wrapper -----------------------------------------------------------------
def cursor_rnn_forward(params, x):
    """x: (B, T, INPUT_SIZE) batch-first (PyTorch layout). Returns (B, OUTPUT_SIZE)."""
    B, T, D = x.shape
    b_pad = _round_up(max(B, _SUBLANE), _SUBLANE)

    # Layout plumbing (cheap XLA ops): time-major, batch padded to the f32
    # sublane width, flattened to 2-D so each layer's input projection is a
    # single dense matmul and per-timestep slices are aligned full tiles.
    xt = jnp.transpose(x.astype(jnp.float32), (1, 0, 2))     # (T, B, D)
    xt = jnp.pad(xt, ((0, 0), (0, b_pad - B), (0, 0)))        # (T, Bp, D)
    x_flat = xt.reshape(T * b_pad, D)                         # (T*Bp, D)

    # Pad FC to a lane-dense 128-wide output (avoids masked partial stores).
    fcw = jnp.pad(params["fc"]["w_t"], ((0, 0), (0, _FC_PAD - OUTPUT_SIZE)))
    fcb = jnp.pad(params["fc"]["b"], ((0, 0), (0, _FC_PAD - OUTPUT_SIZE)))

    l0, l1, l2 = params["rnn"]
    kernel = functools.partial(_cursor_rnn_kernel, seq_len=T, b_rows=b_pad)
    vmem = pl.BlockSpec(memory_space=pltpu.MemorySpace.VMEM)

    out_pad = pl.pallas_call(
        kernel,
        out_shape=jax.ShapeDtypeStruct((b_pad, _FC_PAD), jnp.float32),
        in_specs=[vmem] * 12,
        out_specs=vmem,
        scratch_shapes=[
            pltpu.VMEM((T * b_pad, HIDDEN_SIZE), jnp.float32),
            pltpu.VMEM((T * b_pad, HIDDEN_SIZE), jnp.float32),
        ],
    )(
        x_flat,
        l0["w_ih_t"], l0["w_hh_t"], l0["b"],
        l1["w_ih_t"], l1["w_hh_t"], l1["b"],
        l2["w_ih_t"], l2["w_hh_t"], l2["b"],
        fcw, fcb,
    )
    return out_pad[:B, :OUTPUT_SIZE]


def init_params(key):
    """PyTorch-style init (U[-1/sqrt(H), 1/sqrt(H)]); weights pre-transposed,
    the two RNN biases combined into one (1, H) vector."""
    params = {"rnn": [], "fc": {}}
    bound = 1.0 / math.sqrt(HIDDEN_SIZE)
    for layer in range(NUM_LAYERS):
        d_in = INPUT_SIZE if layer == 0 else HIDDEN_SIZE
        key, k1, k2, k3, k4 = jax.random.split(key, 5)
        w_ih_t = jax.random.uniform(k1, (d_in, HIDDEN_SIZE), jnp.float32, -bound, bound)
        w_hh_t = jax.random.uniform(k2, (HIDDEN_SIZE, HIDDEN_SIZE), jnp.float32, -bound, bound)
        b_ih = jax.random.uniform(k3, (1, HIDDEN_SIZE), jnp.float32, -bound, bound)
        b_hh = jax.random.uniform(k4, (1, HIDDEN_SIZE), jnp.float32, -bound, bound)
        params["rnn"].append({"w_ih_t": w_ih_t, "w_hh_t": w_hh_t, "b": b_ih + b_hh})
    key, k1, k2 = jax.random.split(key, 3)
    params["fc"]["w_t"] = jax.random.uniform(
        k1, (HIDDEN_SIZE, OUTPUT_SIZE), jnp.float32, -bound, bound)
    params["fc"]["b"] = jax.random.uniform(
        k2, (1, OUTPUT_SIZE), jnp.float32, -bound, bound)
    return params


def _reference_forward(params, x):
    """Pure-JAX reference of the same math (for a correctness check)."""
    B, T, _ = x.shape
    h_seq = jnp.transpose(x, (1, 0, 2))
    for lp in params["rnn"]:
        h = jnp.zeros((B, HIDDEN_SIZE), jnp.float32)
        outs = []
        for t in range(T):
            h = jnp.tanh(h_seq[t] @ lp["w_ih_t"] + h @ lp["w_hh_t"] + lp["b"])
            outs.append(h)
        h_seq = jnp.stack(outs, axis=0)
    return h_seq[-1] @ params["fc"]["w_t"] + params["fc"]["b"]


if __name__ == "__main__":
    key = jax.random.PRNGKey(0)
    kp, kx = jax.random.split(key)

    params = init_params(kp)

    batch, seq_len = 2, 8
    x = jax.random.normal(kx, (batch, seq_len, INPUT_SIZE), jnp.float32)

    fwd = jax.jit(cursor_rnn_forward)
    out = jax.block_until_ready(fwd(params, x))

    ref = _reference_forward(params, x)
    assert out.shape == (batch, OUTPUT_SIZE)
    assert jnp.allclose(out, ref, atol=1e-4, rtol=1e-4), "mismatch vs reference"

    print("KERNEL_OK")
</pallas_src>

<mosaic_0001>
module attributes {stable_mosaic.version = 11 : i64} {
  func.func @_cursor_rnn_kernel(%arg0: memref<64x64xf32, #tpu.memory_space<vmem>>, %arg1: memref<64x256xf32, #tpu.memory_space<vmem>>, %arg2: memref<256x256xf32, #tpu.memory_space<vmem>>, %arg3: memref<1x256xf32, #tpu.memory_space<vmem>>, %arg4: memref<256x256xf32, #tpu.memory_space<vmem>>, %arg5: memref<256x256xf32, #tpu.memory_space<vmem>>, %arg6: memref<1x256xf32, #tpu.memory_space<vmem>>, %arg7: memref<256x256xf32, #tpu.memory_space<vmem>>, %arg8: memref<256x256xf32, #tpu.memory_space<vmem>>, %arg9: memref<1x256xf32, #tpu.memory_space<vmem>>, %arg10: memref<256x128xf32, #tpu.memory_space<vmem>>, %arg11: memref<1x128xf32, #tpu.memory_space<vmem>>, %arg12: memref<8x128xf32, #tpu.memory_space<vmem>>, %arg13: memref<64x256xf32, #tpu.memory_space<vmem>>, %arg14: memref<64x256xf32, #tpu.memory_space<vmem>>) attributes {dimension_semantics = [], scalar_prefetch = 0 : i64, scratch_operands = 2 : i64, tpu.core_type = #tpu.core_type<tc>} {
    %c0 = arith.constant 0 : index
    %c0_0 = arith.constant 0 : index
    %0 = vector.load %arg0[%c0, %c0_0] : memref<64x64xf32, #tpu.memory_space<vmem>>, vector<64x64xf32>
    %c0_1 = arith.constant 0 : index
    %c0_2 = arith.constant 0 : index
    %1 = vector.load %arg1[%c0_1, %c0_2] : memref<64x256xf32, #tpu.memory_space<vmem>>, vector<64x256xf32>
    %cst = arith.constant dense<0.000000e+00> : vector<64x256xf32>
    %2 = tpu.matmul %0, %1, %cst {dimension_numbers = #tpu.dot_dimension_numbers<[1], [0], [0], [1], [0, 0, 1, 1], [], []>} : vector<64x64xf32>, vector<64x256xf32>, vector<64x256xf32> -> vector<64x256xf32>
    %c0_3 = arith.constant 0 : index
    %c0_4 = arith.constant 0 : index
    %3 = vector.load %arg3[%c0_3, %c0_4] : memref<1x256xf32, #tpu.memory_space<vmem>>, vector<1x256xf32>
    %4 = vector.broadcast %3 : vector<1x256xf32> to vector<64x256xf32>
    %5 = arith.addf %2, %4 : vector<64x256xf32>
    %c0_5 = arith.constant 0 : index
    %c0_6 = arith.constant 0 : index
    %6 = vector.load %arg13[%c0_5, %c0_6] : memref<64x256xf32, #tpu.memory_space<vmem>>, vector<64x256xf32>
    tpu.vector_store %arg13[%c0_5, %c0_6], %5 {strides = array<i32>} : memref<64x256xf32, #tpu.memory_space<vmem>>, vector<64x256xf32>,
    %c0_7 = arith.constant 0 : index
    %c0_8 = arith.constant 0 : index
    %7 = vector.load %arg2[%c0_7, %c0_8] : memref<256x256xf32, #tpu.memory_space<vmem>>, vector<256x256xf32>
    %cst_9 = arith.constant 0.000000e+00 : f32
    %8 = vector.broadcast %cst_9 : f32 to vector<8x256xf32>
    %c0_10 = arith.constant 0 : index
    %c0_11 = arith.constant 0 : index
    %9 = vector.load %arg13[%c0_10, %c0_11] : memref<64x256xf32, #tpu.memory_space<vmem>>, vector<8x256xf32>
    %cst_12 = arith.constant dense<0.000000e+00> : vector<8x256xf32>
    %10 = tpu.matmul %8, %7, %cst_12 {dimension_numbers = #tpu.dot_dimension_numbers<[1], [0], [0], [1], [0, 0, 1, 1], [], []>} : vector<8x256xf32>, vector<256x256xf32>, vector<8x256xf32> -> vector<8x256xf32>
    %11 = arith.addf %9, %10 : vector<8x256xf32>
    %12 = math.tanh %11 : vector<8x256xf32>
    %c0_13 = arith.constant 0 : index
    %c0_14 = arith.constant 0 : index
    %13 = vector.load %arg14[%c0_13, %c0_14] : memref<64x256xf32, #tpu.memory_space<vmem>>, vector<8x256xf32>
    tpu.vector_store %arg14[%c0_13, %c0_14], %12 {strides = array<i32>} : memref<64x256xf32, #tpu.memory_space<vmem>>, vector<8x256xf32>,
    %c8 = arith.constant 8 : index
    %c0_15 = arith.constant 0 : index
    %14 = vector.load %arg13[%c8, %c0_15] : memref<64x256xf32, #tpu.memory_space<vmem>>, vector<8x256xf32>
    %cst_16 = arith.constant dense<0.000000e+00> : vector<8x256xf32>
    %15 = tpu.matmul %12, %7, %cst_16 {dimension_numbers = #tpu.dot_dimension_numbers<[1], [0], [0], [1], [0, 0, 1, 1], [], []>} : vector<8x256xf32>, vector<256x256xf32>, vector<8x256xf32> -> vector<8x256xf32>
    %16 = arith.addf %14, %15 : vector<8x256xf32>
    %17 = math.tanh %16 : vector<8x256xf32>
    %c8_17 = arith.constant 8 : index
    %c0_18 = arith.constant 0 : index
    %18 = vector.load %arg14[%c8_17, %c0_18] : memref<64x256xf32, #tpu.memory_space<vmem>>, vector<8x256xf32>
    tpu.vector_store %arg14[%c8_17, %c0_18], %17 {strides = array<i32>} : memref<64x256xf32, #tpu.memory_space<vmem>>, vector<8x256xf32>,
    %c16 = arith.constant 16 : index
    %c0_19 = arith.constant 0 : index
    %19 = vector.load %arg13[%c16, %c0_19] : memref<64x256xf32, #tpu.memory_space<vmem>>, vector<8x256xf32>
    %cst_20 = arith.constant dense<0.000000e+00> : vector<8x256xf32>
    %20 = tpu.matmul %17, %7, %cst_20 {dimension_numbers = #tpu.dot_dimension_numbers<[1], [0], [0], [1], [0, 0, 1, 1], [], []>} : vector<8x256xf32>, vector<256x256xf32>, vector<8x256xf32> -> vector<8x256xf32>
    %21 = arith.addf %19, %20 : vector<8x256xf32>
    %22 = math.tanh %21 : vector<8x256xf32>
    %c16_21 = arith.constant 16 : index
    %c0_22 = arith.constant 0 : index
    %23 = vector.load %arg14[%c16_21, %c0_22] : memref<64x256xf32, #tpu.memory_space<vmem>>, vector<8x256xf32>
    tpu.vector_store %arg14[%c16_21, %c0_22], %22 {strides = array<i32>} : memref<64x256xf32, #tpu.memory_space<vmem>>, vector<8x256xf32>,
    %c24 = arith.constant 24 : index
    %c0_23 = arith.constant 0 : index
    %24 = vector.load %arg13[%c24, %c0_23] : memref<64x256xf32, #tpu.memory_space<vmem>>, vector<8x256xf32>
    %cst_24 = arith.constant dense<0.000000e+00> : vector<8x256xf32>
    %25 = tpu.matmul %22, %7, %cst_24 {dimension_numbers = #tpu.dot_dimension_numbers<[1], [0], [0], [1], [0, 0, 1, 1], [], []>} : vector<8x256xf32>, vector<256x256xf32>, vector<8x256xf32> -> vector<8x256xf32>
    %26 = arith.addf %24, %25 : vector<8x256xf32>
    %27 = math.tanh %26 : vector<8x256xf32>
    %c24_25 = arith.constant 24 : index
    %c0_26 = arith.constant 0 : index
    %28 = vector.load %arg14[%c24_25, %c0_26] : memref<64x256xf32, #tpu.memory_space<vmem>>, vector<8x256xf32>
    tpu.vector_store %arg14[%c24_25, %c0_26], %27 {strides = array<i32>} : memref<64x256xf32, #tpu.memory_space<vmem>>, vector<8x256xf32>,
    %c32 = arith.constant 32 : index
    %c0_27 = arith.constant 0 : index
    %29 = vector.load %arg13[%c32, %c0_27] : memref<64x256xf32, #tpu.memory_space<vmem>>, vector<8x256xf32>
    %cst_28 = arith.constant dense<0.000000e+00> : vector<8x256xf32>
    %30 = tpu.matmul %27, %7, %cst_28 {dimension_numbers = #tpu.dot_dimension_numbers<[1], [0], [0], [1], [0, 0, 1, 1], [], []>} : vector<8x256xf32>, vector<256x256xf32>, vector<8x256xf32> -> vector<8x256xf32>
    %31 = arith.addf %29, %30 : vector<8x256xf32>
    %32 = math.tanh %31 : vector<8x256xf32>
    %c32_29 = arith.constant 32 : index
    %c0_30 = arith.constant 0 : index
    %33 = vector.load %arg14[%c32_29, %c0_30] : memref<64x256xf32, #tpu.memory_space<vmem>>, vector<8x256xf32>
    tpu.vector_store %arg14[%c32_29, %c0_30], %32 {strides = array<i32>} : memref<64x256xf32, #tpu.memory_space<vmem>>, vector<8x256xf32>,
    %c40 = arith.constant 40 : index
    %c0_31 = arith.constant 0 : index
    %34 = vector.load %arg13[%c40, %c0_31] : memref<64x256xf32, #tpu.memory_space<vmem>>, vector<8x256xf32>
    %cst_32 = arith.constant dense<0.000000e+00> : vector<8x256xf32>
    %35 = tpu.matmul %32, %7, %cst_32 {dimension_numbers = #tpu.dot_dimension_numbers<[1], [0], [0], [1], [0, 0, 1, 1], [], []>} : vector<8x256xf32>, vector<256x256xf32>, vector<8x256xf32> -> vector<8x256xf32>
    %36 = arith.addf %34, %35 : vector<8x256xf32>
    %37 = math.tanh %36 : vector<8x256xf32>
    %c40_33 = arith.constant 40 : index
    %c0_34 = arith.constant 0 : index
    %38 = vector.load %arg14[%c40_33, %c0_34] : memref<64x256xf32, #tpu.memory_space<vmem>>, vector<8x256xf32>
    tpu.vector_store %arg14[%c40_33, %c0_34], %37 {strides = array<i32>} : memref<64x256xf32, #tpu.memory_space<vmem>>, vector<8x256xf32>,
    %c48 = arith.constant 48 : index
    %c0_35 = arith.constant 0 : index
    %39 = vector.load %arg13[%c48, %c0_35] : memref<64x256xf32, #tpu.memory_space<vmem>>, vector<8x256xf32>
    %cst_36 = arith.constant dense<0.000000e+00> : vector<8x256xf32>
    %40 = tpu.matmul %37, %7, %cst_36 {dimension_numbers = #tpu.dot_dimension_numbers<[1], [0], [0], [1], [0, 0, 1, 1], [], []>} : vector<8x256xf32>, vector<256x256xf32>, vector<8x256xf32> -> vector<8x256xf32>
    %41 = arith.addf %39, %40 : vector<8x256xf32>
    %42 = math.tanh %41 : vector<8x256xf32>
    %c48_37 = arith.constant 48 : index
    %c0_38 = arith.constant 0 : index
    %43 = vector.load %arg14[%c48_37, %c0_38] : memref<64x256xf32, #tpu.memory_space<vmem>>, vector<8x256xf32>
    tpu.vector_store %arg14[%c48_37, %c0_38], %42 {strides = array<i32>} : memref<64x256xf32, #tpu.memory_space<vmem>>, vector<8x256xf32>,
    %c56 = arith.constant 56 : index
    %c0_39 = arith.constant 0 : index
    %44 = vector.load %arg13[%c56, %c0_39] : memref<64x256xf32, #tpu.memory_space<vmem>>, vector<8x256xf32>
    %cst_40 = arith.constant dense<0.000000e+00> : vector<8x256xf32>
    %45 = tpu.matmul %42, %7, %cst_40 {dimension_numbers = #tpu.dot_dimension_numbers<[1], [0], [0], [1], [0, 0, 1, 1], [], []>} : vector<8x256xf32>, vector<256x256xf32>, vector<8x256xf32> -> vector<8x256xf32>
    %46 = arith.addf %44, %45 : vector<8x256xf32>
    %47 = math.tanh %46 : vector<8x256xf32>
    %c56_41 = arith.constant 56 : index
    %c0_42 = arith.constant 0 : index
    %48 = vector.load %arg14[%c56_41, %c0_42] : memref<64x256xf32, #tpu.memory_space<vmem>>, vector<8x256xf32>
    tpu.vector_store %arg14[%c56_41, %c0_42], %47 {strides = array<i32>} : memref<64x256xf32, #tpu.memory_space<vmem>>, vector<8x256xf32>,
    %c0_43 = arith.constant 0 : index
    %c0_44 = arith.constant 0 : index
    %49 = vector.load %arg14[%c0_43, %c0_44] : memref<64x256xf32, #tpu.memory_space<vmem>>, vector<64x256xf32>
    %c0_45 = arith.constant 0 : index
    %c0_46 = arith.constant 0 : index
    %50 = vector.load %arg4[%c0_45, %c0_46] : memref<256x256xf32, #tpu.memory_space<vmem>>, vector<256x256xf32>
    %cst_47 = arith.constant dense<0.000000e+00> : vector<64x256xf32>
    %51 = tpu.matmul %49, %50, %cst_47 {dimension_numbers = #tpu.dot_dimension_numbers<[1], [0], [0], [1], [0, 0, 1, 1], [], []>} : vector<64x256xf32>, vector<256x256xf32>, vector<64x256xf32> -> vector<64x256xf32>
    %c0_48 = arith.constant 0 : index
    %c0_49 = arith.constant 0 : index
    %52 = vector.load %arg6[%c0_48, %c0_49] : memref<1x256xf32, #tpu.memory_space<vmem>>, vector<1x256xf32>
    %53 = vector.broadcast %52 : vector<1x256xf32> to vector<64x256xf32>
    %54 = arith.addf %51, %53 : vector<64x256xf32>
    %c0_50 = arith.constant 0 : index
    %c0_51 = arith.constant 0 : index
    %55 = vector.load %arg13[%c0_50, %c0_51] : memref<64x256xf32, #tpu.memory_space<vmem>>, vector<64x256xf32>
    tpu.vector_store %arg13[%c0_50, %c0_51], %54 {strides = array<i32>} : memref<64x256xf32, #tpu.memory_space<vmem>>, vector<64x256xf32>,
    %c0_52 = arith.constant 0 : index
    %c0_53 = arith.constant 0 : index
    %56 = vector.load %arg5[%c0_52, %c0_53] : memref<256x256xf32, #tpu.memory_space<vmem>>, vector<256x256xf32>
    %cst_54 = arith.constant 0.000000e+00 : f32
    %57 = vector.broadcast %cst_54 : f32 to vector<8x256xf32>
    %c0_55 = arith.constant 0 : index
    %c0_56 = arith.constant 0 : index
    %58 = vector.load %arg13[%c0_55, %c0_56] : memref<64x256xf32, #tpu.memory_space<vmem>>, vector<8x256xf32>
    %cst_57 = arith.constant dense<0.000000e+00> : vector<8x256xf32>
    %59 = tpu.matmul %57, %56, %cst_57 {dimension_numbers = #tpu.dot_dimension_numbers<[1], [0], [0], [1], [0, 0, 1, 1], [], []>} : vector<8x256xf32>, vector<256x256xf32>, vector<8x256xf32> -> vector<8x256xf32>
    %60 = arith.addf %58, %59 : vector<8x256xf32>
    %61 = math.tanh %60 : vector<8x256xf32>
    %c0_58 = arith.constant 0 : index
    %c0_59 = arith.constant 0 : index
    %62 = vector.load %arg14[%c0_58, %c0_59] : memref<64x256xf32, #tpu.memory_space<vmem>>, vector<8x256xf32>
    tpu.vector_store %arg14[%c0_58, %c0_59], %61 {strides = array<i32>} : memref<64x256xf32, #tpu.memory_space<vmem>>, vector<8x256xf32>,
    %c8_60 = arith.constant 8 : index
    %c0_61 = arith.constant 0 : index
    %63 = vector.load %arg13[%c8_60, %c0_61] : memref<64x256xf32, #tpu.memory_space<vmem>>, vector<8x256xf32>
    %cst_62 = arith.constant dense<0.000000e+00> : vector<8x256xf32>
    %64 = tpu.matmul %61, %56, %cst_62 {dimension_numbers = #tpu.dot_dimension_numbers<[1], [0], [0], [1], [0, 0, 1, 1], [], []>} : vector<8x256xf32>, vector<256x256xf32>, vector<8x256xf32> -> vector<8x256xf32>
    %65 = arith.addf %63, %64 : vector<8x256xf32>
    %66 = math.tanh %65 : vector<8x256xf32>
    %c8_63 = arith.constant 8 : index
    %c0_64 = arith.constant 0 : index
    %67 = vector.load %arg14[%c8_63, %c0_64] : memref<64x256xf32, #tpu.memory_space<vmem>>, vector<8x256xf32>
    tpu.vector_store %arg14[%c8_63, %c0_64], %66 {strides = array<i32>} : memref<64x256xf32, #tpu.memory_space<vmem>>, vector<8x256xf32>,
    %c16_65 = arith.constant 16 : index
    %c0_66 = arith.constant 0 : index
    %68 = vector.load %arg13[%c16_65, %c0_66] : memref<64x256xf32, #tpu.memory_space<vmem>>, vector<8x256xf32>
    %cst_67 = arith.constant dense<0.000000e+00> : vector<8x256xf32>
    %69 = tpu.matmul %66, %56, %cst_67 {dimension_numbers = #tpu.dot_dimension_numbers<[1], [0], [0], [1], [0, 0, 1, 1], [], []>} : vector<8x256xf32>, vector<256x256xf32>, vector<8x256xf32> -> vector<8x256xf32>
    %70 = arith.addf %68, %69 : vector<8x256xf32>
    %71 = math.tanh %70 : vector<8x256xf32>
    %c16_68 = arith.constant 16 : index
    %c0_69 = arith.constant 0 : index
    %72 = vector.load %arg14[%c16_68, %c0_69] : memref<64x256xf32, #tpu.memory_space<vmem>>, vector<8x256xf32>
    tpu.vector_store %arg14[%c16_68, %c0_69], %71 {strides = array<i32>} : memref<64x256xf32, #tpu.memory_space<vmem>>, vector<8x256xf32>,
    %c24_70 = arith.constant 24 : index
    %c0_71 = arith.constant 0 : index
    %73 = vector.load %arg13[%c24_70, %c0_71] : memref<64x256xf32, #tpu.memory_space<vmem>>, vector<8x256xf32>
    %cst_72 = arith.constant dense<0.000000e+00> : vector<8x256xf32>
    %74 = tpu.matmul %71, %56, %cst_72 {dimension_numbers = #tpu.dot_dimension_numbers<[1], [0], [0], [1], [0, 0, 1, 1], [], []>} : vector<8x256xf32>, vector<256x256xf32>, vector<8x256xf32> -> vector<8x256xf32>
    %75 = arith.addf %73, %74 : vector<8x256xf32>
    %76 = math.tanh %75 : vector<8x256xf32>
    %c24_73 = arith.constant 24 : index
    %c0_74 = arith.constant 0 : index
    %77 = vector.load %arg14[%c24_73, %c0_74] : memref<64x256xf32, #tpu.memory_space<vmem>>, vector<8x256xf32>
    tpu.vector_store %arg14[%c24_73, %c0_74], %76 {strides = array<i32>} : memref<64x256xf32, #tpu.memory_space<vmem>>, vector<8x256xf32>,
    %c32_75 = arith.constant 32 : index
    %c0_76 = arith.constant 0 : index
    %78 = vector.load %arg13[%c32_75, %c0_76] : memref<64x256xf32, #tpu.memory_space<vmem>>, vector<8x256xf32>
    %cst_77 = arith.constant dense<0.000000e+00> : vector<8x256xf32>
    %79 = tpu.matmul %76, %56, %cst_77 {dimension_numbers = #tpu.dot_dimension_numbers<[1], [0], [0], [1], [0, 0, 1, 1], [], []>} : vector<8x256xf32>, vector<256x256xf32>, vector<8x256xf32> -> vector<8x256xf32>
    %80 = arith.addf %78, %79 : vector<8x256xf32>
    %81 = math.tanh %80 : vector<8x256xf32>
    %c32_78 = arith.constant 32 : index
    %c0_79 = arith.constant 0 : index
    %82 = vector.load %arg14[%c32_78, %c0_79] : memref<64x256xf32, #tpu.memory_space<vmem>>, vector<8x256xf32>
    tpu.vector_store %arg14[%c32_78, %c0_79], %81 {strides = array<i32>} : memref<64x256xf32, #tpu.memory_space<vmem>>, vector<8x256xf32>,
    %c40_80 = arith.constant 40 : index
    %c0_81 = arith.constant 0 : index
    %83 = vector.load %arg13[%c40_80, %c0_81] : memref<64x256xf32, #tpu.memory_space<vmem>>, vector<8x256xf32>
    %cst_82 = arith.constant dense<0.000000e+00> : vector<8x256xf32>
    %84 = tpu.matmul %81, %56, %cst_82 {dimension_numbers = #tpu.dot_dimension_numbers<[1], [0], [0], [1], [0, 0, 1, 1], [], []>} : vector<8x256xf32>, vector<256x256xf32>, vector<8x256xf32> -> vector<8x256xf32>
    %85 = arith.addf %83, %84 : vector<8x256xf32>
    %86 = math.tanh %85 : vector<8x256xf32>
    %c40_83 = arith.constant 40 : index
    %c0_84 = arith.constant 0 : index
    %87 = vector.load %arg14[%c40_83, %c0_84] : memref<64x256xf32, #tpu.memory_space<vmem>>, vector<8x256xf32>
    tpu.vector_store %arg14[%c40_83, %c0_84], %86 {strides = array<i32>} : memref<64x256xf32, #tpu.memory_space<vmem>>, vector<8x256xf32>,
    %c48_85 = arith.constant 48 : index
    %c0_86 = arith.constant 0 : index
    %88 = vector.load %arg13[%c48_85, %c0_86] : memref<64x256xf32, #tpu.memory_space<vmem>>, vector<8x256xf32>
    %cst_87 = arith.constant dense<0.000000e+00> : vector<8x256xf32>
    %89 = tpu.matmul %86, %56, %cst_87 {dimension_numbers = #tpu.dot_dimension_numbers<[1], [0], [0], [1], [0, 0, 1, 1], [], []>} : vector<8x256xf32>, vector<256x256xf32>, vector<8x256xf32> -> vector<8x256xf32>
    %90 = arith.addf %88, %89 : vector<8x256xf32>
    %91 = math.tanh %90 : vector<8x256xf32>
    %c48_88 = arith.constant 48 : index
    %c0_89 = arith.constant 0 : index
    %92 = vector.load %arg14[%c48_88, %c0_89] : memref<64x256xf32, #tpu.memory_space<vmem>>, vector<8x256xf32>
    tpu.vector_store %arg14[%c48_88, %c0_89], %91 {strides = array<i32>} : memref<64x256xf32, #tpu.memory_space<vmem>>, vector<8x256xf32>,
    %c56_90 = arith.constant 56 : index
    %c0_91 = arith.constant 0 : index
    %93 = vector.load %arg13[%c56_90, %c0_91] : memref<64x256xf32, #tpu.memory_space<vmem>>, vector<8x256xf32>
    %cst_92 = arith.constant dense<0.000000e+00> : vector<8x256xf32>
    %94 = tpu.matmul %91, %56, %cst_92 {dimension_numbers = #tpu.dot_dimension_numbers<[1], [0], [0], [1], [0, 0, 1, 1], [], []>} : vector<8x256xf32>, vector<256x256xf32>, vector<8x256xf32> -> vector<8x256xf32>
    %95 = arith.addf %93, %94 : vector<8x256xf32>
    %96 = math.tanh %95 : vector<8x256xf32>
    %c56_93 = arith.constant 56 : index
    %c0_94 = arith.constant 0 : index
    %97 = vector.load %arg14[%c56_93, %c0_94] : memref<64x256xf32, #tpu.memory_space<vmem>>, vector<8x256xf32>
    tpu.vector_store %arg14[%c56_93, %c0_94], %96 {strides = array<i32>} : memref<64x256xf32, #tpu.memory_space<vmem>>, vector<8x256xf32>,
    %c0_95 = arith.constant 0 : index
    %c0_96 = arith.constant 0 : index
    %98 = vector.load %arg14[%c0_95, %c0_96] : memref<64x256xf32, #tpu.memory_space<vmem>>, vector<64x256xf32>
    %c0_97 = arith.constant 0 : index
    %c0_98 = arith.constant 0 : index
    %99 = vector.load %arg7[%c0_97, %c0_98] : memref<256x256xf32, #tpu.memory_space<vmem>>, vector<256x256xf32>
    %cst_99 = arith.constant dense<0.000000e+00> : vector<64x256xf32>
    %100 = tpu.matmul %98, %99, %cst_99 {dimension_numbers = #tpu.dot_dimension_numbers<[1], [0], [0], [1], [0, 0, 1, 1], [], []>} : vector<64x256xf32>, vector<256x256xf32>, vector<64x256xf32> -> vector<64x256xf32>
    %c0_100 = arith.constant 0 : index
    %c0_101 = arith.constant 0 : index
    %101 = vector.load %arg9[%c0_100, %c0_101] : memref<1x256xf32, #tpu.memory_space<vmem>>, vector<1x256xf32>
    %102 = vector.broadcast %101 : vector<1x256xf32> to vector<64x256xf32>
    %103 = arith.addf %100, %102 : vector<64x256xf32>
    %c0_102 = arith.constant 0 : index
    %c0_103 = arith.constant 0 : index
    %104 = vector.load %arg13[%c0_102, %c0_103] : memref<64x256xf32, #tpu.memory_space<vmem>>, vector<64x256xf32>
    tpu.vector_store %arg13[%c0_102, %c0_103], %103 {strides = array<i32>} : memref<64x256xf32, #tpu.memory_space<vmem>>, vector<64x256xf32>,
    %c0_104 = arith.constant 0 : index
    %c0_105 = arith.constant 0 : index
    %105 = vector.load %arg8[%c0_104, %c0_105] : memref<256x256xf32, #tpu.memory_space<vmem>>, vector<256x256xf32>
    %cst_106 = arith.constant 0.000000e+00 : f32
    %106 = vector.broadcast %cst_106 : f32 to vector<8x256xf32>
    %c0_107 = arith.constant 0 : index
    %c0_108 = arith.constant 0 : index
    %107 = vector.load %arg13[%c0_107, %c0_108] : memref<64x256xf32, #tpu.memory_space<vmem>>, vector<8x256xf32>
    %cst_109 = arith.constant dense<0.000000e+00> : vector<8x256xf32>
    %108 = tpu.matmul %106, %105, %cst_109 {dimension_numbers = #tpu.dot_dimension_numbers<[1], [0], [0], [1], [0, 0, 1, 1], [], []>} : vector<8x256xf32>, vector<256x256xf32>, vector<8x256xf32> -> vector<8x256xf32>
    %109 = arith.addf %107, %108 : vector<8x256xf32>
    %110 = math.tanh %109 : vector<8x256xf32>
    %c8_110 = arith.constant 8 : index
    %c0_111 = arith.constant 0 : index
    %111 = vector.load %arg13[%c8_110, %c0_111] : memref<64x256xf32, #tpu.memory_space<vmem>>, vector<8x256xf32>
    %cst_112 = arith.constant dense<0.000000e+00> : vector<8x256xf32>
    %112 = tpu.matmul %110, %105, %cst_112 {dimension_numbers = #tpu.dot_dimension_numbers<[1], [0], [0], [1], [0, 0, 1, 1], [], []>} : vector<8x256xf32>, vector<256x256xf32>, vector<8x256xf32> -> vector<8x256xf32>
    %113 = arith.addf %111, %112 : vector<8x256xf32>
    %114 = math.tanh %113 : vector<8x256xf32>
    %c16_113 = arith.constant 16 : index
    %c0_114 = arith.constant 0 : index
    %115 = vector.load %arg13[%c16_113, %c0_114] : memref<64x256xf32, #tpu.memory_space<vmem>>, vector<8x256xf32>
    %cst_115 = arith.constant dense<0.000000e+00> : vector<8x256xf32>
    %116 = tpu.matmul %114, %105, %cst_115 {dimension_numbers = #tpu.dot_dimension_numbers<[1], [0], [0], [1], [0, 0, 1, 1], [], []>} : vector<8x256xf32>, vector<256x256xf32>, vector<8x256xf32> -> vector<8x256xf32>
    %117 = arith.addf %115, %116 : vector<8x256xf32>
    %118 = math.tanh %117 : vector<8x256xf32>
    %c24_116 = arith.constant 24 : index
    %c0_117 = arith.constant 0 : index
    %119 = vector.load %arg13[%c24_116, %c0_117] : memref<64x256xf32, #tpu.memory_space<vmem>>, vector<8x256xf32>
    %cst_118 = arith.constant dense<0.000000e+00> : vector<8x256xf32>
    %120 = tpu.matmul %118, %105, %cst_118 {dimension_numbers = #tpu.dot_dimension_numbers<[1], [0], [0], [1], [0, 0, 1, 1], [], []>} : vector<8x256xf32>, vector<256x256xf32>, vector<8x256xf32> -> vector<8x256xf32>
    %121 = arith.addf %119, %120 : vector<8x256xf32>
    %122 = math.tanh %121 : vector<8x256xf32>
    %c32_119 = arith.constant 32 : index
    %c0_120 = arith.constant 0 : index
    %123 = vector.load %arg13[%c32_119, %c0_120] : memref<64x256xf32, #tpu.memory_space<vmem>>, vector<8x256xf32>
    %cst_121 = arith.constant dense<0.000000e+00> : vector<8x256xf32>
    %124 = tpu.matmul %122, %105, %cst_121 {dimension_numbers = #tpu.dot_dimension_numbers<[1], [0], [0], [1], [0, 0, 1, 1], [], []>} : vector<8x256xf32>, vector<256x256xf32>, vector<8x256xf32> -> vector<8x256xf32>
    %125 = arith.addf %123, %124 : vector<8x256xf32>
    %126 = math.tanh %125 : vector<8x256xf32>
    %c40_122 = arith.constant 40 : index
    %c0_123 = arith.constant 0 : index
    %127 = vector.load %arg13[%c40_122, %c0_123] : memref<64x256xf32, #tpu.memory_space<vmem>>, vector<8x256xf32>
    %cst_124 = arith.constant dense<0.000000e+00> : vector<8x256xf32>
    %128 = tpu.matmul %126, %105, %cst_124 {dimension_numbers = #tpu.dot_dimension_numbers<[1], [0], [0], [1], [0, 0, 1, 1], [], []>} : vector<8x256xf32>, vector<256x256xf32>, vector<8x256xf32> -> vector<8x256xf32>
    %129 = arith.addf %127, %128 : vector<8x256xf32>
    %130 = math.tanh %129 : vector<8x256xf32>
    %c48_125 = arith.constant 48 : index
    %c0_126 = arith.constant 0 : index
    %131 = vector.load %arg13[%c48_125, %c0_126] : memref<64x256xf32, #tpu.memory_space<vmem>>, vector<8x256xf32>
    %cst_127 = arith.constant dense<0.000000e+00> : vector<8x256xf32>
    %132 = tpu.matmul %130, %105, %cst_127 {dimension_numbers = #tpu.dot_dimension_numbers<[1], [0], [0], [1], [0, 0, 1, 1], [], []>} : vector<8x256xf32>, vector<256x256xf32>, vector<8x256xf32> -> vector<8x256xf32>
    %133 = arith.addf %131, %132 : vector<8x256xf32>
    %134 = math.tanh %133 : vector<8x256xf32>
    %c56_128 = arith.constant 56 : index
    %c0_129 = arith.constant 0 : index
    %135 = vector.load %arg13[%c56_128, %c0_129] : memref<64x256xf32, #tpu.memory_space<vmem>>, vector<8x256xf32>
    %cst_130 = arith.constant dense<0.000000e+00> : vector<8x256xf32>
    %136 = tpu.matmul %134, %105, %cst_130 {dimension_numbers = #tpu.dot_dimension_numbers<[1], [0], [0], [1], [0, 0, 1, 1], [], []>} : vector<8x256xf32>, vector<256x256xf32>, vector<8x256xf32> -> vector<8x256xf32>
    %137 = arith.addf %135, %136 : vector<8x256xf32>
    %138 = math.tanh %137 : vector<8x256xf32>
    %c0_131 = arith.constant 0 : index
    %c0_132 = arith.constant 0 : index
    %139 = vector.load %arg10[%c0_131, %c0_132] : memref<256x128xf32, #tpu.memory_space<vmem>>, vector<256x128xf32>
    %cst_133 = arith.constant dense<0.000000e+00> : vector<8x128xf32>
    %140 = tpu.matmul %138, %139, %cst_133 {dimension_numbers = #tpu.dot_dimension_numbers<[1], [0], [0], [1], [0, 0, 1, 1], [], []>} : vector<8x256xf32>, vector<256x128xf32>, vector<8x128xf32> -> vector<8x128xf32>
    %c0_134 = arith.constant 0 : index
    %c0_135 = arith.constant 0 : index
    %141 = vector.load %arg11[%c0_134, %c0_135] : memref<1x128xf32, #tpu.memory_space<vmem>>, vector<1x128xf32>
    %142 = vector.broadcast %141 : vector<1x128xf32> to vector<8x128xf32>
    %143 = arith.addf %140, %142 : vector<8x128xf32>
    %c0_136 = arith.constant 0 : index
    %c0_137 = arith.constant 0 : index
    %144 = vector.load %arg12[%c0_136, %c0_137] : memref<8x128xf32, #tpu.memory_space<vmem>>, vector<8x128xf32>
    tpu.vector_store %arg12[%c0_136, %c0_137], %143 {strides = array<i32>} : memref<8x128xf32, #tpu.memory_space<vmem>>, vector<8x128xf32>,
    return
  }
}

</mosaic_0001>

<bundles_post_ra>
// kernel: cursor_rnn_forward.1
= control target key start
LH: loop header
LB: loop body
LE: loop exit
PB: predicated region body
PF: predicated region fallthrough
CT: control target
= control target key end

     0   :  { %17 = vsyncpa [#allocation5], 0  ;;  %s6563_s0 = inlined_call_operand.vmem [shape: f32[64,64], index: 0, kind: input, shape index: {}]   ;;  %s6564_s1 = inlined_call_operand.vmem [shape: f32[64,256], index: 1, kind: input, shape index: {}]   ;;  %s6565_s2 = inlined_call_operand.vmem [shape: f32[256,256], index: 2, kind: input, shape index: {}]   ;;  %s6566_s3 = inlined_call_operand.vmem [shape: f32[1,256], index: 3, kind: input, shape index: {}]   ;;  %s6567_s4 = inlined_call_operand.hbm [shape: f32[256,256], index: 4, kind: input, shape index: {}]   ;;  %s6568_s5 = inlined_call_operand.hbm [shape: f32[256,256], index: 5, kind: input, shape index: {}]   ;;  %s6569_s6 = inlined_call_operand.vmem [shape: f32[1,256], index: 6, kind: input, shape index: {}]   ;;  %s6570_s7 = inlined_call_operand.hbm [shape: f32[256,256], index: 7, kind: input, shape index: {}]   ;;  %s6571_s8 = inlined_call_operand.hbm [shape: f32[256,256], index: 8, kind: input, shape index: {}]   ;;  %s6572_s9 = inlined_call_operand.vmem [shape: f32[1,256], index: 9, kind: input, shape index: {}]   ;;  %s6573_s10 = inlined_call_operand.vmem [shape: f32[256,128], index: 10, kind: input, shape index: {}]   ;;  %s6574_s11 = inlined_call_operand.vmem [shape: f32[1,128], index: 11, kind: input, shape index: {}]   ;;  %s6575_s12 = inlined_call_operand.vmem [shape: f32[8,128], index: 12, kind: output, shape index: {}]  }
   0x1   :  { %18 = vsyncpa [#allocation7], 0 }
   0x2   :  { %19 = vsyncpa [#allocation10], 0  ;;  %s4966_s21 = smov [#allocation6]   ;;  %s4967_s23 = smov [#allocation4]  }
   0x3   :  { %s45_s22 = sshll.u32 %s4966_s21, 4  ;;  %s33_s24 = sshll.u32 %s4967_s23, 4  ;;  %s46_s22 = int_to_ptr.vmem [resolvable:$true] %s45_s22  ;;  %s5038_s24 = int_to_ptr.vmem [resolvable:$true] %s33_s24 }
   0x4   :  { %s4872_s27 = scalar_lea.hbm %s6568_s5, 8192 }
   0x5   :  { %p4873_p0 = scmp.ne.s32.totalorder %s6568_s5, %s4872_s27  ;;  %p4876_p1 = scmp.lt.u32.totalorder %s4872_s27, %s6568_s5 }
   0x7   :  { %p4878_p2 = pnand %p4876_p1, %p4873_p0 }
   0x9   :  { %4881 = shalt.err (!%p4878_p2)
}
   0xa   :  { %s4882_s14 = scalar_lea.vmem %s46_s22, 8192  ;;  %p4887_p4 = scmp.lt.s32.totalorder %s46_s22, %s46_s22 }
   0xb   :  { %p4883_p3 = scmp.ne.s32.totalorder %s46_s22, %s4882_s14  ;;  %p4888_p5 = scmp.lt.s32.totalorder %s4882_s14, %s4882_s14 }
   0xd   :  { %p4889_p6 = por %p4888_p5, %p4887_p4 }
   0xf   :  { %p4890_p7 = pnand %p4889_p6, %p4883_p3 }
  0x11   :  { %4893 = shalt.err (!%p4890_p7)
}
  0x12   :  { %s4968_s15 = smov 256   ;;  %s4969_s16 = smov 16  }
  0x13   :  { %51 = dma.hbm_to_vmem [thread:$0]  %s6568_s5, 8192, %s46_s22, [#allocation7], %s4968_s15, %s4968_s15, %s4969_s16  }
  0x14   :  { %s4894_s21 = scalar_lea.hbm %s6567_s4, 8192 }
  0x15   :  { %p4895_p8 = scmp.ne.s32.totalorder %s6567_s4, %s4894_s21  ;;  %p4898_p9 = scmp.lt.u32.totalorder %s4894_s21, %s6567_s4 }
  0x17   :  { %p4900_p10 = pnand %p4898_p9, %p4895_p8 }
  0x19   :  { %4903 = shalt.err (!%p4900_p10)
}
  0x1a   :  { %s4904_s28 = scalar_lea.vmem %s5038_s24, 8192  ;;  %p4909_p12 = scmp.lt.s32.totalorder %s5038_s24, %s5038_s24 }
  0x1b   :  { %p4905_p11 = scmp.ne.s32.totalorder %s5038_s24, %s4904_s28  ;;  %p4910_p13 = scmp.lt.s32.totalorder %s4904_s28, %s4904_s28 }
  0x1d   :  { %p4911_p0 = por %p4910_p13, %p4909_p12 }
  0x1f   :  { %p4912_p1 = pnand %p4911_p0, %p4905_p11 }
  0x21   :  { %4915 = shalt.err (!%p4912_p1)
}
  0x22   :  { %39 = dma.hbm_to_vmem [thread:$0]  %s6567_s4, 8192, %s5038_s24, [#allocation5], %s4968_s15, %s4968_s15, %s4969_s16  }
  0x23   :  { %s4970_s29 = smov [#allocation8]   ;;  %s4971_s13 = smov [#allocation9]  }
  0x24   :  { %s59_s30 = sshll.u32 %s4970_s29, 4  ;;  %s71_s14 = sshll.u32 %s4971_s13, 4  ;;  %s60_s30 = int_to_ptr.vmem [resolvable:$true] %s59_s30  ;;  %s5075_s14 = int_to_ptr.vmem [resolvable:$true] %s71_s14 }
  0x25   :  { %s4916_s19 = scalar_lea.hbm %s6570_s7, 8192 }
  0x26   :  { %p4917_p2 = scmp.ne.s32.totalorder %s6570_s7, %s4916_s19  ;;  %p4920_p3 = scmp.lt.u32.totalorder %s4916_s19, %s6570_s7 }
  0x28   :  { %p4922_p4 = pnand %p4920_p3, %p4917_p2 }
  0x2a   :  { %4925 = shalt.err (!%p4922_p4)
}
  0x2b   :  { %s4926_s4 = scalar_lea.vmem %s60_s30, 8192  ;;  %p4931_p6 = scmp.lt.s32.totalorder %s60_s30, %s60_s30 }
  0x2c   :  { %p4927_p5 = scmp.ne.s32.totalorder %s60_s30, %s4926_s4  ;;  %p4932_p7 = scmp.lt.s32.totalorder %s4926_s4, %s4926_s4 }
  0x2e   :  { %p4933_p8 = por %p4932_p7, %p4931_p6 }
  0x30   :  { %p4934_p9 = pnand %p4933_p8, %p4927_p5 }
  0x32   :  { %4937 = shalt.err (!%p4934_p9)
}
  0x33   :  { %65 = dma.hbm_to_vmem [thread:$0]  %s6570_s7, 8192, %s60_s30, [#allocation7], %s4968_s15, %s4968_s15, %s4969_s16  }
  0x34   :  { %s4938_s5 = scalar_lea.hbm %s6571_s8, 8192 }
  0x35   :  { %p4939_p10 = scmp.ne.s32.totalorder %s6571_s8, %s4938_s5  ;;  %p4942_p11 = scmp.lt.u32.totalorder %s4938_s5, %s6571_s8 }
  0x37   :  { %p4944_p12 = pnand %p4942_p11, %p4939_p10 }
  0x39   :  { %4947 = shalt.err (!%p4944_p12)
}
  0x3a   :  { %s4948_s18 = scalar_lea.vmem %s5075_s14, 8192  ;;  %p4953_p0 = scmp.lt.s32.totalorder %s5075_s14, %s5075_s14 }
  0x3b   :  { %p4949_p13 = scmp.ne.s32.totalorder %s5075_s14, %s4948_s18  ;;  %p4954_p1 = scmp.lt.s32.totalorder %s4948_s18, %s4948_s18 }
  0x3d   :  { %p4955_p2 = por %p4954_p1, %p4953_p0 }
  0x3f   :  { %p4956_p3 = pnand %p4955_p2, %p4949_p13 }
  0x41   :  { %4959 = shalt.err (!%p4956_p3)
}
  0x42   :  { %77 = dma.hbm_to_vmem [thread:$0]  %s6571_s8, 8192, %s5075_s14, [#allocation10], %s4968_s15, %s4968_s15, %s4969_s16  }
  0x43   :  { %4960 = dma.done.wait [#allocation5], 8192  }
  0x44   :  { %4961 = vsyncadd [#allocation5], 4294959104 }
  0x45   :  { %4962 = dma.done.wait [#allocation7], 16384  }
  0x46   :  { %4963 = vsyncadd [#allocation7], 4294950912 }
  0x47   :  { %4964 = dma.done.wait [#allocation10], 8192  }
  0x48   :  { %4965 = vsyncadd [#allocation10], 4294959104  ;;  %v4972_v0 = vmov 0.0   ;;  %v287_v1 = vld [vmem:[%s6565_s2 + $0x8] sm:$0xff]  ;;  %v289_v2 = vld [vmem:[%s6565_s2 + $0x18] sm:$0xff]  ;;  %vm132_vm0 = vcmask 523264  }
  0x49   :  { %221 = vmatprep.mubr.f32.mxu0 %v4972_v0  ;;  %416 = vmatprep.mubr.f32.mxu1 %v4972_v0  ;;  %v286_v3 = vld [vmem:[%s6565_s2] sm:$0xff]  ;;  %v5123_v4 = vpack.c.bf16 %v289_v2, %v287_v1  ;;  %v288_v5 = vld [vmem:[%s6565_s2 + $0x10] sm:$0xff]  ;;  %v291_v6 = vld [vmem:[%s6565_s2 + $0x28] sm:$0xff] }
  0x4a   :  { %v293_v7 = vld [vmem:[%s6565_s2 + $0x38] sm:$0xff]  ;;  %v5134_v8 = vpack.c.bf16 %v288_v5, %v286_v3  ;;  %v290_v10 = vld [vmem:[%s6565_s2 + $0x20] sm:$0xff]  ;;  %v292_v11 = vld [vmem:[%s6565_s2 + $0x30] sm:$0xff] }
  0x4b   :  { %v5136_v9 = vpack.c.bf16 %v293_v7, %v291_v6  ;;  %v295_v12 = vld [vmem:[%s6565_s2 + $0x48] sm:$0xff]  ;;  %2978 = vmatprep.subr.bf16.mxu1 %v5123_v4  ;;  %v297_v13 = vld [vmem:[%s6565_s2 + $0x58] sm:$0xff]  ;;  %v5152_v14 = vpack.c.bf16 %v292_v11, %v290_v10  ;;  %v294_v16 = vld [vmem:[%s6565_s2 + $0x40] sm:$0xff] }
  0x4c   :  { %2980 = vmatpush1.bf16.msra.mxu1 %v5134_v8  ;;  %v5155_v15 = vpack.c.bf16 %v297_v13, %v295_v12  ;;  %v296_v17 = vld [vmem:[%s6565_s2 + $0x50] sm:$0xff]  ;;  %v299_v18 = vld [vmem:[%s6565_s2 + $0x68] sm:$0xff]  ;;  %v301_v19 = vld [vmem:[%s6565_s2 + $0x78] sm:$0xff] }
  0x4d   :  { %2982 = vmatprep.subr.bf16.mxu1 %v5136_v9  ;;  %v5170_v20 = vpack.c.bf16 %v296_v17, %v294_v16  ;;  %v5173_v21 = vpack.c.bf16 %v301_v19, %v299_v18  ;;  %v298_v22 = vld [vmem:[%s6565_s2 + $0x60] sm:$0xff]  ;;  %v300_v23 = vld [vmem:[%s6565_s2 + $0x70] sm:$0xff]  ;;  %v303_v24 = vld [vmem:[%s6565_s2 + $0x88] sm:$0xff] }
  0x4e   :  { %v305_v25 = vld [vmem:[%s6565_s2 + $0x98] sm:$0xff]  ;;  %v5188_v26 = vpack.c.bf16 %v300_v23, %v298_v22  ;;  %v302_v28 = vld [vmem:[%s6565_s2 + $0x80] sm:$0xff]  ;;  %v304_v29 = vld [vmem:[%s6565_s2 + $0x90] sm:$0xff] }
  0x4f   :  { %v5191_v27 = vpack.c.bf16 %v305_v25, %v303_v24  ;;  %v307_v30 = vld [vmem:[%s6565_s2 + $0xa8] sm:$0xff]  ;;  %v309_v31 = vld [vmem:[%s6565_s2 + $0xb8] sm:$0xff]  ;;  %v5212_v34 = vpack.c.bf16 %v304_v29, %v302_v28  ;;  %v306_v35 = vld [vmem:[%s6565_s2 + $0xa0] sm:$0xff] }
  0x50   :  { %2984 = vmatpush1.bf16.msra.mxu1 %v5152_v14  ;;  %v105_v32 = vld [vmem:[%s6564_s1 + $0x8] sm:$0xff]  ;;  %v107_v33 = vld [vmem:[%s6564_s1 + $0x18] sm:$0xff]  ;;  %v104_v37 = vld [vmem:[%s6564_s1] sm:$0xff]  ;;  %v5221_v38 = vpack.c.bf16 %v309_v31, %v307_v30 }
  0x51   :  { %2986 = vmatprep.subr.bf16.mxu1 %v5155_v15  ;;  %v2961_v36 = vpack.c.bf16 %v107_v33, %v105_v32  ;;  %v308_v39 = vld [vmem:[%s6565_s2 + $0xb0] sm:$0xff]  ;;  %v311_v40 = vld [vmem:[%s6565_s2 + $0xc8] sm:$0xff]  ;;  %v313_v42 = vld [vmem:[%s6565_s2 + $0xd8] sm:$0xff] }
  0x52   :  { %v106_v41 = vld [vmem:[%s6564_s1 + $0x10] sm:$0xff]  ;;  %v109_v44 = vld [vmem:[%s6564_s1 + $0x28] sm:$0xff]  ;;  %v111_v45 = vld [vmem:[%s6564_s1 + $0x38] sm:$0xff]  ;;  %v5248_v49 = vpack.c.bf16 %v308_v39, %v306_v35  ;;  %v5257_v53 = vpack.c.bf16 %v313_v42, %v311_v40 }
  0x53   :  { %2962 = vmatprep.subr.bf16.mxu0 %v2961_v36  ;;  %v2963_v43 = vpack.c.bf16 %v106_v41, %v104_v37  ;;  %v2965_v46 = vpack.c.bf16 %v111_v45, %v109_v44  ;;  %v108_v47 = vld [vmem:[%s6564_s1 + $0x20] sm:$0xff]  ;;  %v110_v48 = vld [vmem:[%s6564_s1 + $0x30] sm:$0xff]  ;;  %v113_v52 = vld [vmem:[%s6564_s1 + $0x48] sm:$0xff] }
  0x54   :  { %2988 = vmatpush1.bf16.msra.mxu1 %v5170_v20  ;;  %v310_v50 = vld [vmem:[%s6565_s2 + $0xc0] sm:$0xff]  ;;  %v2967_v51 = vpack.c.bf16 %v110_v48, %v108_v47  ;;  %v312_v54 = vld [vmem:[%s6565_s2 + $0xd0] sm:$0xff]  ;;  %v315_v55 = vld [vmem:[%s6565_s2 + $0xe8] sm:$0xff] }
  0x55   :  { %2990 = vmatprep.subr.bf16.mxu1 %v5173_v21  ;;  %2964 = vmatpush1.bf16.msra.mxu0 %v2963_v43  ;;  %v115_v56 = vld [vmem:[%s6564_s1 + $0x58] sm:$0xff]  ;;  %v112_v59 = vld [vmem:[%s6564_s1 + $0x40] sm:$0xff]  ;;  %v114_v60 = vld [vmem:[%s6564_s1 + $0x50] sm:$0xff]  ;;  %v5284_v63 = vpack.c.bf16 %v312_v54, %v310_v50 }
  0x56   :  { %2966 = vmatprep.subr.bf16.mxu0 %v2965_v46  ;;  %v317_v57 = vld [vmem:[%s6565_s2 + $0xf8] sm:$0xff]  ;;  %v2969_v58 = vpack.c.bf16 %v115_v56, %v113_v52  ;;  %v117_v61 = vld [vmem:[%s6564_s1 + $0x68] sm:$0xff]  ;;  %v314_v1 = vld [vmem:[%s6565_s2 + $0xe0] sm:$0xff]  ;;  %v2971_v2 = vpack.c.bf16 %v114_v60, %v112_v59 }
  0x57   :  { %v119_v62 = vld [vmem:[%s6564_s1 + $0x78] sm:$0xff]  ;;  %v5290_v3 = vpack.c.bf16 %v317_v57, %v315_v55  ;;  %v316_v5 = vld [vmem:[%s6565_s2 + $0xf0] sm:$0xff]  ;;  %v116_v7 = vld [vmem:[%s6564_s1 + $0x60] sm:$0xff] }
  0x58   :  { %2992 = vmatpush1.bf16.msra.mxu1 %v5188_v26  ;;  %v2973_v6 = vpack.c.bf16 %v119_v62, %v117_v61  ;;  %v118_v10 = vld [vmem:[%s6564_s1 + $0x70] sm:$0xff]  ;;  %v319_v11 = vld [vmem:[%s6565_s2 + $0x108] sm:$0xff]  ;;  %v321_v12 = vld [vmem:[%s6565_s2 + $0x118] sm:$0xff]  ;;  %v5308_v13 = vpack.c.bf16 %v316_v5, %v314_v1 }
  0x59   :  { %2994 = vmatprep.subr.bf16.mxu1 %v5191_v27  ;;  %2968 = vmatpush1.bf16.msra.mxu0 %v2967_v51  ;;  %v2975_v16 = vpack.c.bf16 %v118_v10, %v116_v7  ;;  %v5311_v17 = vpack.c.bf16 %v321_v12, %v319_v11  ;;  %v318_v18 = vld [vmem:[%s6565_s2 + $0x100] sm:$0xff]  ;;  %v320_v19 = vld [vmem:[%s6565_s2 + $0x110] sm:$0xff]  ;;  %v323_v22 = vld [vmem:[%s6565_s2 + $0x128] sm:$0xff] }
  0x5a   :  { %2970 = vmatprep.subr.bf16.mxu0 %v2969_v58  ;;  %v325_v23 = vld [vmem:[%s6565_s2 + $0x138] sm:$0xff]  ;;  %v5326_v24 = vpack.c.bf16 %v320_v19, %v318_v18  ;;  %v96_v25 = vld [vmem:[%s6563_s0] sm:$0xff]  ;;  %v324_v30 = vld [vmem:[%s6565_s2 + $0x130] sm:$0xff] }
  0x5b   :  { %v5332_v28 = vpack.c.bf16 %v325_v23, %v323_v22  ;;  %v322_v29 = vld [vmem:[%s6565_s2 + $0x120] sm:$0xff]  ;;  %v327_v31 = vld [vmem:[%s6565_s2 + $0x148] sm:$0xff]  ;;  %v329_v32 = vld [vmem:[%s6565_s2 + $0x158] sm:$0xff]  ;;  %v122_v23 = vlaneseq }
  0x5c   :  { %2996 = vmatpush1.bf16.msra.mxu1 %v5212_v34  ;;  %v5349_v33 = vpack.c.bf16 %v324_v30, %v322_v29  ;;  %v5353_v35 = vpack.c.bf16 %v329_v32, %v327_v31  ;;  %v326_v36 = vld [vmem:[%s6565_s2 + $0x140] sm:$0xff]  ;;  %v328_v37 = vld [vmem:[%s6565_s2 + $0x150] sm:$0xff]  ;;  %v331_v39 = vld [vmem:[%s6565_s2 + $0x168] sm:$0xff] }
  0x5d   :  { %2998 = vmatprep.subr.bf16.mxu1 %v5221_v38  ;;  %2972 = vmatpush1.bf16.msra.mxu0 %v2971_v2  ;;  %v333_v40 = vld [vmem:[%s6565_s2 + $0x178] sm:$0xff]  ;;  %v5370_v41 = vpack.c.bf16 %v328_v37, %v326_v36  ;;  %v330_v43 = vld [vmem:[%s6565_s2 + $0x160] sm:$0xff]  ;;  %v332_v44 = vld [vmem:[%s6565_s2 + $0x170] sm:$0xff] }
  0x5e   :  { %2974 = vmatprep.subr.bf16.mxu0 %v2973_v6  ;;  %v5373_v42 = vpack.c.bf16 %v333_v40, %v331_v39  ;;  %v335_v45 = vld [vmem:[%s6565_s2 + $0x188] sm:$0xff]  ;;  %v337_v46 = vld [vmem:[%s6565_s2 + $0x198] sm:$0xff]  ;;  %v5390_v47 = vpack.c.bf16 %v332_v44, %v330_v43  ;;  %v334_v50 = vld [vmem:[%s6565_s2 + $0x180] sm:$0xff] }
  0x5f   :  { %v5393_v48 = vpack.c.bf16 %v337_v46, %v335_v45  ;;  %v336_v51 = vld [vmem:[%s6565_s2 + $0x190] sm:$0xff]  ;;  %v339_v52 = vld [vmem:[%s6565_s2 + $0x1a8] sm:$0xff]  ;;  %v341_v54 = vld [vmem:[%s6565_s2 + $0x1b8] sm:$0xff] }
  0x60   :  { %3000 = vmatpush1.bf16.msra.mxu1 %v5248_v49  ;;  %v5410_v55 = vpack.c.bf16 %v336_v51, %v334_v50  ;;  %v5413_v56 = vpack.c.bf16 %v341_v54, %v339_v52  ;;  %v338_v57 = vld [vmem:[%s6565_s2 + $0x1a0] sm:$0xff]  ;;  %v340_v58 = vld [vmem:[%s6565_s2 + $0x1b0] sm:$0xff]  ;;  %v343_v59 = vld [vmem:[%s6565_s2 + $0x1c8] sm:$0xff] }
  0x61   :  { %3002 = vmatprep.subr.bf16.mxu1 %v5257_v53  ;;  %2976 = vmatpush1.bf16.msra.mxu0 %v2975_v16  ;;  %v345_v60 = vld [vmem:[%s6565_s2 + $0x1d8] sm:$0xff]  ;;  %v5430_v61 = vpack.c.bf16 %v340_v58, %v338_v57  ;;  %v342_v1 = vld [vmem:[%s6565_s2 + $0x1c0] sm:$0xff]  ;;  %v344_v2 = vld [vmem:[%s6565_s2 + $0x1d0] sm:$0xff] }
  0x62   :  { %3234 = vmatprep.subr.bf16.mxu0 %v5123_v4  ;;  %v5433_v62 = vpack.c.bf16 %v345_v60, %v343_v59  ;;  %v347_v5 = vld [vmem:[%s6565_s2 + $0x1e8] sm:$0xff]  ;;  %v349_v6 = vld [vmem:[%s6565_s2 + $0x1f8] sm:$0xff]  ;;  %v5450_v7 = vpack.c.bf16 %v344_v2, %v342_v1  ;;  %v346_v11 = vld [vmem:[%s6565_s2 + $0x1e0] sm:$0xff] }
  0x63   :  { %v5453_v10 = vpack.c.bf16 %v349_v6, %v347_v5  ;;  %v348_v12 = vld [vmem:[%s6565_s2 + $0x1f0] sm:$0xff]  ;;  %v97_v18 = vld [vmem:[%s6563_s0 + $0x8] sm:$0xff]  ;;  %v120_v30 = vld [vmem:[%s6566_s3] sm:$0x3] }
  0x64   :  { %3004 = vmatpush1.bf16.msra.mxu1 %v5284_v63  ;;  %2917 = vmatmul.mubr.msk.f32.vlgmr.msra.gmra.mrb[0].mxu0 %vm132_vm0, %v96_v25  ;;  %v5464_v16 = vpack.c.bf16 %v348_v12, %v346_v11  ;;  %v123_v25 = vshrl.u32 %v122_v23, 7  ;;  %v98_v54 = vld [vmem:[%s6563_s0 + $0x10] sm:$0xff] }
  0x65   :  { %3006 = vmatprep.subr.bf16.mxu1 %v5290_v3  ;;  %227 = vmatprep.mubr.f32.mxu0 %v4972_v0 }
  0x66   :  { %3236 = vmatpush1.bf16.msra.mxu0 %v5134_v8  ;;  %v5527_v29 = vsub.s32 0, %v123_v25  ;;  %v5532_v31 = vsub.s32 1, %v123_v25  ;;  %v100_v25 = vld [vmem:[%s6563_s0 + $0x20] sm:$0xff] }
  0x67   :  { %3238 = vmatprep.subr.bf16.mxu0 %v5136_v9 }
  0x68   :  { %3008 = vmatpush1.bf16.msra.mxu1 %v5308_v13  ;;  %2918 = vmatmul.mubr.msk.f32.gmra.mrb[2].mxu0 %vm132_vm0, %v97_v18  ;;  %v5535_v32 = vrot.slane %v120_v30, %v5527_v29  ;;  %v5538_v36 = vrot.slane %v120_v30, %v5532_v31  ;;  %v99_v18 = vld [vmem:[%s6563_s0 + $0x18] sm:$0xff] }
  0x69   :  { %3010 = vmatprep.subr.bf16.mxu1 %v5311_v17  ;;  %233 = vmatprep.mubr.f32.mxu0 %v4972_v0 }
  0x6a   :  { %3240 = vmatpush1.bf16.msra.mxu0 %v5152_v14 }
  0x6b   :  { %3242 = vmatprep.subr.bf16.mxu0 %v5155_v15 }
  0x6c   :  { %3012 = vmatpush1.bf16.msra.mxu1 %v5326_v24  ;;  %2919 = vmatmul.mubr.msk.f32.gmra.mrb[4].mxu0 %vm132_vm0, %v98_v54  ;;  %v1005_v54 = vld [vmem:[#allocation4 + $0x38] sm:$0xff] }
  0x6d   :  { %3014 = vmatprep.subr.bf16.mxu1 %v5332_v28  ;;  %239 = vmatprep.mubr.f32.mxu0 %v4972_v0 }
  0x6e   :  { %3244 = vmatpush1.bf16.msra.mxu0 %v5170_v20 }
  0x6f   :  { %3246 = vmatprep.subr.bf16.mxu0 %v5173_v21 }
  0x70   :  { %3016 = vmatpush1.bf16.msra.mxu1 %v5349_v33  ;;  %2920 = vmatmul.mubr.msk.f32.gmra.mrb[6].mxu0 %vm132_vm0, %v99_v18 }
  0x71   :  { %3018 = vmatprep.subr.bf16.mxu1 %v5353_v35  ;;  %245 = vmatprep.mubr.f32.mxu0 %v4972_v0 }
  0x72   :  { %3248 = vmatpush1.bf16.msra.mxu0 %v5188_v26 }
  0x73   :  { %3250 = vmatprep.subr.bf16.mxu0 %v5191_v27 }
  0x74   :  { %3020 = vmatpush1.bf16.msra.mxu1 %v5370_v41  ;;  %2921 = vmatmul.mubr.msk.f32.gmra.mrb[8].mxu0 %vm132_vm0, %v100_v25  ;;  %v1011_v25 = vld [vmem:[#allocation4 + $0x68] sm:$0xff] }
  0x75   :  { %3022 = vmatprep.subr.bf16.mxu1 %v5373_v42  ;;  %251 = vmatprep.mubr.f32.mxu0 %v4972_v0 }
  0x76   :  { %3252 = vmatpush1.bf16.msra.mxu0 %v5212_v34 }
  0x77   :  { %3254 = vmatprep.subr.bf16.mxu0 %v5221_v38 }
  0x78   :  { %3024 = vmatpush1.bf16.msra.mxu1 %v5390_v47 }
  0x79   :  { %3026 = vmatprep.subr.bf16.mxu1 %v5393_v48 }
  0x7a   :  { %3256 = vmatpush1.bf16.msra.mxu0 %v5248_v49 }
  0x7b   :  { %3258 = vmatprep.subr.bf16.mxu0 %v5257_v53 }
  0x7c   :  { %3028 = vmatpush1.bf16.msra.mxu1 %v5410_v55 }
  0x7d   :  { %3030 = vmatprep.subr.bf16.mxu1 %v5413_v56 }
  0x7e   :  { %3260 = vmatpush1.bf16.msra.mxu0 %v5284_v63 }
  0x7f   :  { %3262 = vmatprep.subr.bf16.mxu0 %v5290_v3 }
  0x80   :  { %3032 = vmatpush1.bf16.msra.mxu1 %v5430_v61 }
  0x81   :  { %3034 = vmatprep.subr.bf16.mxu1 %v5433_v62 }
  0x82   :  { %3264 = vmatpush1.bf16.msra.mxu0 %v5308_v13 }
  0x83   :  { %3266 = vmatprep.subr.bf16.mxu0 %v5311_v17 }
  0x84   :  { %3036 = vmatpush1.bf16.msra.mxu1 %v5450_v7 }
  0x85   :  { %3038 = vmatprep.subr.bf16.mxu1 %v5453_v10 }
  0x86   :  { %3268 = vmatpush1.bf16.msra.mxu0 %v5326_v24 }
  0x87   :  { %3270 = vmatprep.subr.bf16.mxu0 %v5332_v28 }
  0x88   :  { %3040 = vmatpush1.bf16.msra.mxu1 %v5464_v16 }
  0x89   :  { %3042 = vmatprep.subr.bf16.mxu1 %v5123_v4 }
  0x8a   :  { %3272 = vmatpush1.bf16.msra.mxu0 %v5349_v33 }
  0x8b   :  { %417 = vmatmul.mubr.f32.vlgmr.msra.gmra.mrb[0].mxu1 %v4972_v0  ;;  %3274 = vmatprep.subr.bf16.mxu0 %v5353_v35 }
  0x8c   :  { %3044 = vmatpush1.bf16.msra.mxu1 %v5134_v8 }
  0x8d   :  { %3046 = vmatprep.subr.bf16.mxu1 %v5136_v9 }
  0x8e   :  { %3276 = vmatpush1.bf16.msra.mxu0 %v5370_v41 }
  0x8f   :  { %3278 = vmatprep.subr.bf16.mxu0 %v5373_v42 }
  0x90   :  { %3048 = vmatpush1.bf16.msra.mxu1 %v5152_v14 }
  0x91   :  { %3050 = vmatprep.subr.bf16.mxu1 %v5155_v15 }
  0x92   :  { %3280 = vmatpush1.bf16.msra.mxu0 %v5390_v47 }
  0x93   :  { %3282 = vmatprep.subr.bf16.mxu0 %v5393_v48 }
  0x94   :  { %3052 = vmatpush1.bf16.msra.mxu1 %v5170_v20 }
  0x95   :  { %3054 = vmatprep.subr.bf16.mxu1 %v5173_v21 }
  0x96   :  { %3284 = vmatpush1.bf16.msra.mxu0 %v5410_v55 }
  0x97   :  { %3286 = vmatprep.subr.bf16.mxu0 %v5413_v56 }
  0x98   :  { %3056 = vmatpush1.bf16.msra.mxu1 %v5188_v26 }
  0x99   :  { %3058 = vmatprep.subr.bf16.mxu1 %v5191_v27 }
  0x9a   :  { %3288 = vmatpush1.bf16.msra.mxu0 %v5430_v61 }
  0x9b   :  { %3290 = vmatprep.subr.bf16.mxu0 %v5433_v62 }
  0x9c   :  { %3060 = vmatpush1.bf16.msra.mxu1 %v5212_v34 }
  0x9d   :  { %3062 = vmatprep.subr.bf16.mxu1 %v5221_v38 }
  0x9e   :  { %3292 = vmatpush1.bf16.msra.mxu0 %v5450_v7 }
  0x9f   :  { %3294 = vmatprep.subr.bf16.mxu0 %v5453_v10 }
  0xa0   :  { %3064 = vmatpush1.bf16.msra.mxu1 %v5248_v49 }
  0xa1   :  { %3066 = vmatprep.subr.bf16.mxu1 %v5257_v53 }
  0xa2   :  { %3296 = vmatpush1.bf16.msra.mxu0 %v5464_v16 }
  0xa3   :  { %3298 = vmatprep.subr.bf16.mxu0 %v5123_v4 }
  0xa4   :  { %3068 = vmatpush1.bf16.msra.mxu1 %v5284_v63 }
  0xa5   :  { %3070 = vmatprep.subr.bf16.mxu1 %v5290_v3 }
  0xa8   :  { %3072 = vmatpush1.bf16.msra.mxu1 %v5308_v13 }
  0xa9   :  { %3074 = vmatprep.subr.bf16.mxu1 %v5311_v17 }
  0xac   :  { %3076 = vmatpush1.bf16.msra.mxu1 %v5326_v24 }
  0xad   :  { %3078 = vmatprep.subr.bf16.mxu1 %v5332_v28 }
  0xb0   :  { %3080 = vmatpush1.bf16.msra.mxu1 %v5349_v33 }
  0xb1   :  { %3082 = vmatprep.subr.bf16.mxu1 %v5353_v35 }
  0xb4   :  { %3084 = vmatpush1.bf16.msra.mxu1 %v5370_v41 }
  0xb5   :  { %3086 = vmatprep.subr.bf16.mxu1 %v5373_v42 }
  0xb8   :  { %3088 = vmatpush1.bf16.msra.mxu1 %v5390_v47 }
  0xb9   :  { %3090 = vmatprep.subr.bf16.mxu1 %v5393_v48 }
  0xbc   :  { %3092 = vmatpush1.bf16.msra.mxu1 %v5410_v55 }
  0xbd   :  { %3094 = vmatprep.subr.bf16.mxu1 %v5413_v56 }
  0xc0   :  { %3096 = vmatpush1.bf16.msra.mxu1 %v5430_v61 }
  0xc1   :  { %3098 = vmatprep.subr.bf16.mxu1 %v5433_v62 }
  0xc4   :  { %3100 = vmatpush1.bf16.msra.mxu1 %v5450_v7 }
  0xc5   :  { %3102 = vmatprep.subr.bf16.mxu1 %v5453_v10 }
  0xc8   :  { %3104 = vmatpush1.bf16.msra.mxu1 %v5464_v16 }
  0xc9   :  { %3106 = vmatprep.subr.bf16.mxu1 %v5123_v4 }
 0x137   :  { %v223_v19 = vpop.f32.mrb[0].mxu0 }
 0x138   :  { %v225_v22 = vpop.f32.mrb[1].mxu0  ;;  %v224_v37 = vadd.f32 %v223_v19, %v5535_v32  ;;  %v999_v19 = vld [vmem:[#allocation4 + $0x8] sm:$0xff] }
 0x139   :  { %v226_v39 = vadd.f32 %v225_v22, %v5538_v36  ;;  %v1001_v22 = vld [vmem:[#allocation4 + $0x18] sm:$0xff] }
 0x13a   :  { %v3489_v23 = vpack.c.bf16 %v1001_v22, %v999_v19  ;;  %v1006_v22 = vld [vmem:[#allocation4 + $0x40] sm:$0xff] }
 0x13b   :  { %v229_v51 = vpop.f32.mrb[2].mxu0 }
 0x13c   :  { %v231_v52 = vpop.f32.mrb[3].mxu0  ;;  %v230_v57 = vadd.f32 %v229_v51, %v5535_v32  ;;  %v1000_v51 = vld [vmem:[#allocation4 + $0x10] sm:$0xff] }
 0x13d   :  { %v232_v58 = vadd.f32 %v231_v52, %v5538_v36  ;;  %v1003_v52 = vld [vmem:[#allocation4 + $0x28] sm:$0xff] }
 0x13f   :  { %v235_v11 = vpop.f32.mrb[4].mxu0 }
 0x140   :  { %v237_v12 = vpop.f32.mrb[5].mxu0  ;;  %v236_v30 = vadd.f32 %v235_v11, %v5535_v32  ;;  %v1007_v11 = vld [vmem:[#allocation4 + $0x48] sm:$0xff] }
 0x15e   :  { %v418_v40 = vpop.f32.mrb[0].mxu1 }
 0x15f   :  { %v423_v43 = vadd.f32 %v418_v40, %v224_v37  ;;  %v420_v44 = vpop.f32.mrb[1].mxu1  ;;  %v238_v37 = vadd.f32 %v237_v12, %v5538_v36  ;;  %v1009_v12 = vld [vmem:[#allocation4 + $0x58] sm:$0xff] }
 0x160   :  { %v424_v45 = vadd.f32 %v420_v44, %v226_v39  ;;  %v3497_v19 = vpack.c.bf16 %v1009_v12, %v1007_v11  ;;  %v1018_v11 = vld [vmem:[#allocation4 + $0xa0] sm:$0xff]  ;;  %v1020_v12 = vld [vmem:[#allocation4 + $0xb0] sm:$0xff] }
 0x162   :  { %4776 = vtanh.f32 %v424_v45  ;;  %v998_v45 = vld [vmem:[#allocation4] sm:$0xff] }
 0x163   :  { %4778 = vtanh.f32 %v423_v43 }
 0x16c   :  { %v5542_v46 = vpop.eup %4776 }
 0x16d   :  { %v5544_v50 = vpop.eup %4778  ;;  %495 = vmatprep.mubr.f32.mxu1 %v5542_v46 }
 0x16e   :  { %496 = vmatmul.mubr.f32.vlgmr.msra.gmra.mrb[2].mxu1 %v5544_v50 }
 0x16f   :  { %3108 = vmatpush1.bf16.msra.mxu1 %v5134_v8 }
 0x170   :  { %3110 = vmatprep.subr.bf16.mxu1 %v5136_v9 }
 0x173   :  { %3112 = vmatpush1.bf16.msra.mxu1 %v5152_v14 }
 0x174   :  { %3114 = vmatprep.subr.bf16.mxu1 %v5155_v15 }
 0x177   :  { %3116 = vmatpush1.bf16.msra.mxu1 %v5170_v20 }
 0x178   :  { %3118 = vmatprep.subr.bf16.mxu1 %v5173_v21 }
 0x17b   :  { %3120 = vmatpush1.bf16.msra.mxu1 %v5188_v26 }
 0x17c   :  { %3122 = vmatprep.subr.bf16.mxu1 %v5191_v27 }
 0x17f   :  { %3124 = vmatpush1.bf16.msra.mxu1 %v5212_v34 }
 0x180   :  { %3126 = vmatprep.subr.bf16.mxu1 %v5221_v38 }
 0x183   :  { %3128 = vmatpush1.bf16.msra.mxu1 %v5248_v49 }
 0x184   :  { %3130 = vmatprep.subr.bf16.mxu1 %v5257_v53 }
 0x187   :  { %3132 = vmatpush1.bf16.msra.mxu1 %v5284_v63 }
 0x188   :  { %3134 = vmatprep.subr.bf16.mxu1 %v5290_v3 }
 0x18b   :  { %3136 = vmatpush1.bf16.msra.mxu1 %v5308_v13 }
 0x18c   :  { %3138 = vmatprep.subr.bf16.mxu1 %v5311_v17 }
 0x18f   :  { %3140 = vmatpush1.bf16.msra.mxu1 %v5326_v24 }
 0x190   :  { %3142 = vmatprep.subr.bf16.mxu1 %v5332_v28 }
 0x193   :  { %3144 = vmatpush1.bf16.msra.mxu1 %v5349_v33 }
 0x194   :  { %3146 = vmatprep.subr.bf16.mxu1 %v5353_v35 }
 0x197   :  { %3148 = vmatpush1.bf16.msra.mxu1 %v5370_v41 }
 0x198   :  { %3150 = vmatprep.subr.bf16.mxu1 %v5373_v42 }
 0x19b   :  { %3152 = vmatpush1.bf16.msra.mxu1 %v5390_v47 }
 0x19c   :  { %3154 = vmatprep.subr.bf16.mxu1 %v5393_v48 }
 0x19f   :  { %3156 = vmatpush1.bf16.msra.mxu1 %v5410_v55 }
 0x1a0   :  { %3158 = vmatprep.subr.bf16.mxu1 %v5413_v56 }
 0x1a3   :  { %3160 = vmatpush1.bf16.msra.mxu1 %v5430_v61 }
 0x1a4   :  { %3162 = vmatprep.subr.bf16.mxu1 %v5433_v62 }
 0x1a7   :  { %3164 = vmatpush1.bf16.msra.mxu1 %v5450_v7 }
 0x1a8   :  { %3166 = vmatprep.subr.bf16.mxu1 %v5453_v10 }
 0x1ab   :  { %3168 = vmatpush1.bf16.msra.mxu1 %v5464_v16 }
 0x1ac   :  { %3170 = vmatprep.subr.bf16.mxu1 %v5123_v4 }
 0x241   :  { %v497_v59 = vpop.f32.mrb[2].mxu1 }
 0x242   :  { %v502_v60 = vadd.f32 %v497_v59, %v230_v57  ;;  %v499_v1 = vpop.f32.mrb[3].mxu1  ;;  %v3491_v57 = vpack.c.bf16 %v1000_v51, %v998_v45  ;;  %v3493_v59 = vpack.c.bf16 %v1005_v54, %v1003_v52  ;;  %v1017_v45 = vld [vmem:[#allocation4 + $0x98] sm:$0xff]  ;;  %v1016_v54 = vld [vmem:[#allocation4 + $0x90] sm:$0xff] }
 0x243   :  { %v503_v2 = vadd.f32 %v499_v1, %v232_v58  ;;  %v1004_v1 = vld [vmem:[#allocation4 + $0x30] sm:$0xff] }
 0x245   :  { %4780 = vtanh.f32 %v503_v2 }
 0x246   :  { %4782 = vtanh.f32 %v502_v60  ;;  %v1002_v60 = vld [vmem:[#allocation4 + $0x20] sm:$0xff] }
 0x247   :  { %v3495_v18 = vpack.c.bf16 %v1004_v1, %v1002_v60 }
 0x24f   :  { %v5587_v5 = vpop.eup %4780 }
 0x250   :  { %v5589_v6 = vpop.eup %4782  ;;  %574 = vmatprep.mubr.f32.mxu1 %v5587_v5 }
 0x251   :  { %575 = vmatmul.mubr.f32.vlgmr.msra.gmra.mrb[4].mxu1 %v5589_v6 }
 0x252   :  { %3172 = vmatpush1.bf16.msra.mxu1 %v5134_v8 }
 0x253   :  { %3174 = vmatprep.subr.bf16.mxu1 %v5136_v9 }
 0x256   :  { %3176 = vmatpush1.bf16.msra.mxu1 %v5152_v14 }
 0x257   :  { %3178 = vmatprep.subr.bf16.mxu1 %v5155_v15 }
 0x25a   :  { %3180 = vmatpush1.bf16.msra.mxu1 %v5170_v20 }
 0x25b   :  { %3182 = vmatprep.subr.bf16.mxu1 %v5173_v21 }
 0x25e   :  { %3184 = vmatpush1.bf16.msra.mxu1 %v5188_v26 }
 0x25f   :  { %3186 = vmatprep.subr.bf16.mxu1 %v5191_v27 }
 0x262   :  { %3188 = vmatpush1.bf16.msra.mxu1 %v5212_v34 }
 0x263   :  { %3190 = vmatprep.subr.bf16.mxu1 %v5221_v38 }
 0x266   :  { %3192 = vmatpush1.bf16.msra.mxu1 %v5248_v49 }
 0x267   :  { %3194 = vmatprep.subr.bf16.mxu1 %v5257_v53 }
 0x26a   :  { %3196 = vmatpush1.bf16.msra.mxu1 %v5284_v63 }
 0x26b   :  { %3198 = vmatprep.subr.bf16.mxu1 %v5290_v3 }
 0x26e   :  { %3200 = vmatpush1.bf16.msra.mxu1 %v5308_v13 }
 0x26f   :  { %3202 = vmatprep.subr.bf16.mxu1 %v5311_v17 }
 0x272   :  { %3204 = vmatpush1.bf16.msra.mxu1 %v5326_v24 }
 0x273   :  { %3206 = vmatprep.subr.bf16.mxu1 %v5332_v28 }
 0x276   :  { %3208 = vmatpush1.bf16.msra.mxu1 %v5349_v33 }
 0x277   :  { %3210 = vmatprep.subr.bf16.mxu1 %v5353_v35 }
 0x27a   :  { %3212 = vmatpush1.bf16.msra.mxu1 %v5370_v41 }
 0x27b   :  { %3214 = vmatprep.subr.bf16.mxu1 %v5373_v42 }
 0x27e   :  { %3216 = vmatpush1.bf16.msra.mxu1 %v5390_v47 }
 0x27f   :  { %3218 = vmatprep.subr.bf16.mxu1 %v5393_v48 }
 0x282   :  { %3220 = vmatpush1.bf16.msra.mxu1 %v5410_v55 }
 0x283   :  { %3222 = vmatprep.subr.bf16.mxu1 %v5413_v56 }
 0x286   :  { %3224 = vmatpush1.bf16.msra.mxu1 %v5430_v61 }
 0x287   :  { %3226 = vmatprep.subr.bf16.mxu1 %v5433_v62 }
 0x28a   :  { %3228 = vmatpush1.bf16.msra.mxu1 %v5450_v7 }
 0x28b   :  { %3230 = vmatprep.subr.bf16.mxu1 %v5453_v10 }
 0x28e   :  { %3232 = vmatpush1.bf16.msra.mxu1 %v5464_v16 }
 0x28f   :  { %3490 = vmatprep.subr.bf16.mxu1 %v3489_v23  ;;  %v1008_v23 = vld [vmem:[#allocation4 + $0x50] sm:$0xff] }
 0x324   :  { %v576_v39 = vpop.f32.mrb[4].mxu1 }
 0x325   :  { %v581_v40 = vadd.f32 %v576_v39, %v236_v30  ;;  %v578_v43 = vpop.f32.mrb[5].mxu1  ;;  %v1013_v30 = vld [vmem:[#allocation4 + $0x78] sm:$0xff] }
 0x326   :  { %v582_v44 = vadd.f32 %v578_v43, %v238_v37  ;;  %v3499_v37 = vpack.c.bf16 %v1008_v23, %v1006_v22  ;;  %v3501_v39 = vpack.c.bf16 %v1013_v30, %v1011_v25  ;;  %v1012_v43 = vld [vmem:[#allocation4 + $0x70] sm:$0xff]  ;;  %v3511_v22 = vpack.c.bf16 %v1020_v12, %v1018_v11  ;;  %v1022_v25 = vld [vmem:[#allocation4 + $0xc0] sm:$0xff] }
 0x327   :  { %v1024_v30 = vld [vmem:[#allocation4 + $0xd0] sm:$0xff] }
 0x328   :  { %4784 = vtanh.f32 %v582_v44  ;;  %v1015_v44 = vld [vmem:[#allocation4 + $0x88] sm:$0xff] }
 0x329   :  { %4786 = vtanh.f32 %v581_v40  ;;  %v1010_v40 = vld [vmem:[#allocation4 + $0x60] sm:$0xff]  ;;  %v3505_v52 = vpack.c.bf16 %v1017_v45, %v1015_v44  ;;  %v1028_v45 = vld [vmem:[#allocation4 + $0xf0] sm:$0xff] }
 0x32a   :  { %v3503_v51 = vpack.c.bf16 %v1012_v43, %v1010_v40  ;;  %v3515_v40 = vpack.c.bf16 %v1024_v30, %v1022_v25  ;;  %v1026_v44 = vld [vmem:[#allocation4 + $0xe0] sm:$0xff] }
 0x332   :  { %v5636_v58 = vpop.eup %4784 }
 0x333   :  { %v5638_v2 = vpop.eup %4786  ;;  %653 = vmatprep.mubr.f32.mxu1 %v5636_v58 }
 0x334   :  { %654 = vmatmul.mubr.f32.vlgmr.msra.gmra.mrb[6].mxu1 %v5638_v2 }
 0x335   :  { %3492 = vmatpush1.bf16.msra.mxu1 %v3491_v57  ;;  %1138 = vmatprep.mubr.f32.mxu1 %v5542_v46  ;;  %v1014_v46 = vld [vmem:[#allocation4 + $0x80] sm:$0xff]  ;;  %v1019_v57 = vld [vmem:[#allocation4 + $0xa8] sm:$0xff] }
 0x336   :  { %3494 = vmatprep.subr.bf16.mxu1 %v3493_v59  ;;  %v1021_v59 = vld [vmem:[#allocation4 + $0xb8] sm:$0xff]  ;;  %v3507_v60 = vpack.c.bf16 %v1016_v54, %v1014_v46  ;;  %v3519_v46 = vpack.c.bf16 %v1028_v45, %v1026_v44 }
 0x337   :  { %v3509_v1 = vpack.c.bf16 %v1021_v59, %v1019_v57  ;;  %v1030_v57 = vld [vmem:[#allocation4 + $0x100] sm:$0xff]  ;;  %v1032_v59 = vld [vmem:[#allocation4 + $0x110] sm:$0xff] }
 0x338   :  { %v3523_v11 = vpack.c.bf16 %v1032_v59, %v1030_v57 }
 0x339   :  { %3496 = vmatpush1.bf16.msra.mxu1 %v3495_v18  ;;  %v1023_v18 = vld [vmem:[#allocation4 + $0xc8] sm:$0xff] }
 0x33a   :  { %3498 = vmatprep.subr.bf16.mxu1 %v3497_v19  ;;  %v1025_v19 = vld [vmem:[#allocation4 + $0xd8] sm:$0xff] }
 0x33b   :  { %v3513_v23 = vpack.c.bf16 %v1025_v19, %v1023_v18  ;;  %v1034_v18 = vld [vmem:[#allocation4 + $0x120] sm:$0xff]  ;;  %v1036_v19 = vld [vmem:[#allocation4 + $0x130] sm:$0xff] }
 0x33c   :  { %v3527_v25 = vpack.c.bf16 %v1036_v19, %v1034_v18 }
 0x33d   :  { %3500 = vmatpush1.bf16.msra.mxu1 %v3499_v37  ;;  %v1027_v37 = vld [vmem:[#allocation4 + $0xe8] sm:$0xff] }
 0x33e   :  { %3502 = vmatprep.subr.bf16.mxu1 %v3501_v39  ;;  %v1029_v39 = vld [vmem:[#allocation4 + $0xf8] sm:$0xff] }
 0x33f   :  { %v3517_v43 = vpack.c.bf16 %v1029_v39, %v1027_v37  ;;  %v1038_v37 = vld [vmem:[#allocation4 + $0x140] sm:$0xff]  ;;  %v1040_v39 = vld [vmem:[#allocation4 + $0x150] sm:$0xff] }
 0x340   :  { %v3531_v44 = vpack.c.bf16 %v1040_v39, %v1038_v37 }
 0x341   :  { %3504 = vmatpush1.bf16.msra.mxu1 %v3503_v51  ;;  %v1031_v51 = vld [vmem:[#allocation4 + $0x108] sm:$0xff] }
 0x342   :  { %3506 = vmatprep.subr.bf16.mxu1 %v3505_v52  ;;  %v1033_v52 = vld [vmem:[#allocation4 + $0x118] sm:$0xff] }
 0x343   :  { %v3521_v54 = vpack.c.bf16 %v1033_v52, %v1031_v51  ;;  %v1042_v51 = vld [vmem:[#allocation4 + $0x160] sm:$0xff]  ;;  %v1044_v52 = vld [vmem:[#allocation4 + $0x170] sm:$0xff] }
 0x344   :  { %v3535_v57 = vpack.c.bf16 %v1044_v52, %v1042_v51 }
 0x345   :  { %3508 = vmatpush1.bf16.msra.mxu1 %v3507_v60  ;;  %v1035_v60 = vld [vmem:[#allocation4 + $0x128] sm:$0xff] }
 0x346   :  { %3510 = vmatprep.subr.bf16.mxu1 %v3509_v1  ;;  %v1037_v1 = vld [vmem:[#allocation4 + $0x138] sm:$0xff] }
 0x347   :  { %v3525_v12 = vpack.c.bf16 %v1037_v1, %v1035_v60  ;;  %v1046_v60 = vld [vmem:[#allocation4 + $0x180] sm:$0xff]  ;;  %v1048_v1 = vld [vmem:[#allocation4 + $0x190] sm:$0xff] }
 0x348   :  { %v3539_v18 = vpack.c.bf16 %v1048_v1, %v1046_v60  ;;  %v101_v1 = vld [vmem:[%s6563_s0 + $0x28] sm:$0xff] }
 0x349   :  { %3512 = vmatpush1.bf16.msra.mxu1 %v3511_v22  ;;  %v1039_v22 = vld [vmem:[#allocation4 + $0x148] sm:$0xff]  ;;  %2922 = vmatmul.mubr.msk.f32.gmra.mrb[10].mxu0 %vm132_vm0, %v101_v1  ;;  %v1230_v1 = vld [vmem:[#allocation6 + $0xd8] sm:$0xff] }
 0x34a   :  { %3514 = vmatprep.subr.bf16.mxu1 %v3513_v23  ;;  %v1041_v23 = vld [vmem:[#allocation4 + $0x158] sm:$0xff]  ;;  %257 = vmatprep.mubr.f32.mxu0 %v4972_v0 }
 0x34b   :  { %v3529_v30 = vpack.c.bf16 %v1041_v23, %v1039_v22  ;;  %v1050_v22 = vld [vmem:[#allocation4 + $0x1a0] sm:$0xff]  ;;  %v1052_v23 = vld [vmem:[#allocation4 + $0x1b0] sm:$0xff] }
 0x34c   :  { %v3543_v37 = vpack.c.bf16 %v1052_v23, %v1050_v22 }
 0x34d   :  { %3516 = vmatpush1.bf16.msra.mxu1 %v3515_v40  ;;  %v1043_v40 = vld [vmem:[#allocation4 + $0x168] sm:$0xff] }
 0x34e   :  { %3518 = vmatprep.subr.bf16.mxu1 %v3517_v43  ;;  %v1045_v43 = vld [vmem:[#allocation4 + $0x178] sm:$0xff] }
 0x34f   :  { %v3533_v45 = vpack.c.bf16 %v1045_v43, %v1043_v40  ;;  %v1054_v40 = vld [vmem:[#allocation4 + $0x1c0] sm:$0xff]  ;;  %v1056_v43 = vld [vmem:[#allocation4 + $0x1d0] sm:$0xff] }
 0x350   :  { %v3547_v51 = vpack.c.bf16 %v1056_v43, %v1054_v40 }
 0x351   :  { %3520 = vmatpush1.bf16.msra.mxu1 %v3519_v46  ;;  %v1047_v46 = vld [vmem:[#allocation4 + $0x188] sm:$0xff] }
 0x352   :  { %3522 = vmatprep.subr.bf16.mxu1 %v3521_v54  ;;  %v1049_v54 = vld [vmem:[#allocation4 + $0x198] sm:$0xff] }
 0x353   :  { %v3537_v59 = vpack.c.bf16 %v1049_v54, %v1047_v46  ;;  %v1058_v46 = vld [vmem:[#allocation4 + $0x1e0] sm:$0xff]  ;;  %v1060_v54 = vld [vmem:[#allocation4 + $0x1f0] sm:$0xff] }
 0x355   :  { %3524 = vmatpush1.bf16.msra.mxu1 %v3523_v11  ;;  %v1051_v11 = vld [vmem:[#allocation4 + $0x1a8] sm:$0xff] }
 0x356   :  { %3526 = vmatprep.subr.bf16.mxu1 %v3525_v12  ;;  %v1053_v12 = vld [vmem:[#allocation4 + $0x1b8] sm:$0xff] }
 0x357   :  { %v3541_v19 = vpack.c.bf16 %v1053_v12, %v1051_v11 }
 0x359   :  { %3528 = vmatpush1.bf16.msra.mxu1 %v3527_v25  ;;  %v1055_v25 = vld [vmem:[#allocation4 + $0x1c8] sm:$0xff] }
 0x35a   :  { %3530 = vmatprep.subr.bf16.mxu1 %v3529_v30  ;;  %v1057_v30 = vld [vmem:[#allocation4 + $0x1d8] sm:$0xff] }
 0x35b   :  { %v3545_v39 = vpack.c.bf16 %v1057_v30, %v1055_v25 }
 0x35d   :  { %3532 = vmatpush1.bf16.msra.mxu1 %v3531_v44  ;;  %v1059_v44 = vld [vmem:[#allocation4 + $0x1e8] sm:$0xff] }
 0x35e   :  { %3534 = vmatprep.subr.bf16.mxu1 %v3533_v45  ;;  %v1061_v45 = vld [vmem:[#allocation4 + $0x1f8] sm:$0xff] }
 0x35f   :  { %v3549_v52 = vpack.c.bf16 %v1061_v45, %v1059_v44 }
 0x361   :  { %3536 = vmatpush1.bf16.msra.mxu1 %v3535_v57  ;;  %v3551_v57 = vpack.c.bf16 %v1060_v54, %v1058_v46 }
 0x362   :  { %3538 = vmatprep.subr.bf16.mxu1 %v3537_v59  ;;  %v241_v59 = vpop.f32.mrb[6].mxu0 }
 0x363   :  { %v243_v60 = vpop.f32.mrb[7].mxu0 }
 0x365   :  { %3540 = vmatpush1.bf16.msra.mxu1 %v3539_v18 }
 0x366   :  { %3542 = vmatprep.subr.bf16.mxu1 %v3541_v19 }
 0x369   :  { %3544 = vmatpush1.bf16.msra.mxu1 %v3543_v37 }
 0x36a   :  { %3546 = vmatprep.subr.bf16.mxu1 %v3545_v39 }
 0x36d   :  { %3548 = vmatpush1.bf16.msra.mxu1 %v3547_v51 }
 0x36e   :  { %3550 = vmatprep.subr.bf16.mxu1 %v3549_v52 }
 0x371   :  { %3552 = vmatpush1.bf16.msra.mxu1 %v3551_v57  ;;  %v1223_v57 = vld [vmem:[#allocation6 + $0xa0] sm:$0xff] }
 0x374   :  { %1139 = vmatmul.mubr.f32.vlgmr.msra.gmra.mrb[8].mxu1 %v5544_v50  ;;  %v102_v50 = vld [vmem:[%s6563_s0 + $0x30] sm:$0xff] }
 0x375   :  { %1144 = vmatprep.mubr.f32.mxu1 %v5587_v5  ;;  %2923 = vmatmul.mubr.msk.f32.gmra.mrb[12].mxu0 %vm132_vm0, %v102_v50  ;;  %v103_v5 = vld [vmem:[%s6563_s0 + $0x38] sm:$0xff] }
 0x376   :  { %263 = vmatprep.mubr.f32.mxu0 %v4972_v0 }
 0x378   :  { %1145 = vmatmul.mubr.f32.gmra.mrb[10].mxu1 %v5589_v6  ;;  %v242_v6 = vadd.f32 %v241_v59, %v5535_v32  ;;  %v1225_v59 = vld [vmem:[#allocation6 + $0xb0] sm:$0xff] }
 0x379   :  { %1150 = vmatprep.mubr.f32.mxu1 %v5636_v58  ;;  %2924 = vmatmul.mubr.msk.f32.gmra.mrb[14].mxu0 %vm132_vm0, %v103_v5  ;;  %v244_v58 = vadd.f32 %v243_v60, %v5538_v36  ;;  %v1228_v60 = vld [vmem:[#allocation6 + $0xc8] sm:$0xff]  ;;  %v5795_v50 = vpack.c.bf16 %v1225_v59, %v1223_v57  ;;  %v1251_v57 = vld [vmem:[#allocation6 + $0x180] sm:$0xff]  ;;  %v1253_v59 = vld [vmem:[#allocation6 + $0x190] sm:$0xff] }
 0x37a   :  { %v5798_v5 = vpack.c.bf16 %v1230_v1, %v1228_v60  ;;  %v5839_v60 = vpack.c.bf16 %v1253_v59, %v1251_v57  ;;  %v1256_v1 = vld [vmem:[#allocation6 + $0x1a8] sm:$0xff]  ;;  %v1926_v57 = vld [vmem:[#allocation8 + $0x58] sm:$0xff] }
 0x37c   :  { %1151 = vmatmul.mubr.f32.gmra.mrb[12].mxu1 %v5638_v2 }
 0x407   :  { %v655_v2 = vpop.f32.mrb[6].mxu1 }
 0x408   :  { %v660_v11 = vadd.f32 %v655_v2, %v242_v6  ;;  %v657_v12 = vpop.f32.mrb[7].mxu1  ;;  %v1227_v6 = vld [vmem:[#allocation6 + $0xc0] sm:$0xff]  ;;  %v1232_v2 = vld [vmem:[#allocation6 + $0xe8] sm:$0xff] }
 0x409   :  { %v661_v18 = vadd.f32 %v657_v12, %v244_v58  ;;  %v1229_v58 = vld [vmem:[#allocation6 + $0xd0] sm:$0xff] }
 0x40a   :  { %v5801_v12 = vpack.c.bf16 %v1229_v58, %v1227_v6  ;;  %v1258_v6 = vld [vmem:[#allocation6 + $0x1b8] sm:$0xff]  ;;  %v1255_v58 = vld [vmem:[#allocation6 + $0x1a0] sm:$0xff] }
 0x40b   :  { %4788 = vtanh.f32 %v661_v18 }
 0x40c   :  { %4790 = vtanh.f32 %v660_v11  ;;  %v1234_v11 = vld [vmem:[#allocation6 + $0xf8] sm:$0xff] }
 0x40d   :  { %v5804_v18 = vpack.c.bf16 %v1234_v11, %v1232_v2  ;;  %v5842_v2 = vpack.c.bf16 %v1258_v6, %v1256_v1  ;;  %v1257_v11 = vld [vmem:[#allocation6 + $0x1b0] sm:$0xff]  ;;  %v1923_v1 = vld [vmem:[#allocation8 + $0x40] sm:$0xff] }
 0x40e   :  { %v1925_v6 = vld [vmem:[#allocation8 + $0x50] sm:$0xff] }
 0x415   :  { %v4789_v19 = vpop.eup %4788 }
 0x416   :  { %v4791_v22 = vpop.eup %4790  ;;  %732 = vmatprep.mubr.f32.mxu0 %v4789_v19  ;;  %1156 = vmatprep.mubr.f32.mxu1 %v4789_v19  ;;  %v1231_v19 = vld [vmem:[#allocation6 + $0xe0] sm:$0xff] }
 0x417   :  { %733 = vmatmul.mubr.f32.vlgmr.msra.gmra.mrb[8].mxu0 %v4791_v22  ;;  %1157 = vmatmul.mubr.f32.gmra.mrb[14].mxu1 %v4791_v22  ;;  %v1233_v22 = vld [vmem:[#allocation6 + $0xf0] sm:$0xff] }
 0x418   :  { %3300 = vmatpush1.bf16.msra.mxu0 %v5134_v8 }
 0x419   :  { %3302 = vmatprep.subr.bf16.mxu0 %v5136_v9 }
 0x41c   :  { %3304 = vmatpush1.bf16.msra.mxu0 %v5152_v14 }
 0x41d   :  { %3306 = vmatprep.subr.bf16.mxu0 %v5155_v15 }
 0x420   :  { %3308 = vmatpush1.bf16.msra.mxu0 %v5170_v20 }
 0x421   :  { %3310 = vmatprep.subr.bf16.mxu0 %v5173_v21 }
 0x424   :  { %3312 = vmatpush1.bf16.msra.mxu0 %v5188_v26 }
 0x425   :  { %3314 = vmatprep.subr.bf16.mxu0 %v5191_v27 }
 0x428   :  { %3316 = vmatpush1.bf16.msra.mxu0 %v5212_v34 }
 0x429   :  { %3318 = vmatprep.subr.bf16.mxu0 %v5221_v38 }
 0x42c   :  { %3320 = vmatpush1.bf16.msra.mxu0 %v5248_v49 }
 0x42d   :  { %3322 = vmatprep.subr.bf16.mxu0 %v5257_v53 }
 0x430   :  { %3324 = vmatpush1.bf16.msra.mxu0 %v5284_v63 }
 0x431   :  { %3326 = vmatprep.subr.bf16.mxu0 %v5290_v3 }
 0x434   :  { %3328 = vmatpush1.bf16.msra.mxu0 %v5308_v13 }
 0x435   :  { %3330 = vmatprep.subr.bf16.mxu0 %v5311_v17 }
 0x438   :  { %3332 = vmatpush1.bf16.msra.mxu0 %v5326_v24 }
 0x439   :  { %3334 = vmatprep.subr.bf16.mxu0 %v5332_v28 }
 0x43c   :  { %3336 = vmatpush1.bf16.msra.mxu0 %v5349_v33 }
 0x43d   :  { %3338 = vmatprep.subr.bf16.mxu0 %v5353_v35 }
 0x440   :  { %3340 = vmatpush1.bf16.msra.mxu0 %v5370_v41 }
 0x441   :  { %3342 = vmatprep.subr.bf16.mxu0 %v5373_v42 }
 0x444   :  { %3344 = vmatpush1.bf16.msra.mxu0 %v5390_v47 }
 0x445   :  { %3346 = vmatprep.subr.bf16.mxu0 %v5393_v48 }
 0x448   :  { %3348 = vmatpush1.bf16.msra.mxu0 %v5410_v55 }
 0x449   :  { %3350 = vmatprep.subr.bf16.mxu0 %v5413_v56 }
 0x44c   :  { %3352 = vmatpush1.bf16.msra.mxu0 %v5430_v61 }
 0x44d   :  { %3354 = vmatprep.subr.bf16.mxu0 %v5433_v62 }
 0x450   :  { %3356 = vmatpush1.bf16.msra.mxu0 %v5450_v7 }
 0x451   :  { %3358 = vmatprep.subr.bf16.mxu0 %v5453_v10 }
 0x454   :  { %3360 = vmatpush1.bf16.msra.mxu0 %v5464_v16 }
 0x455   :  { %3362 = vmatprep.subr.bf16.mxu0 %v5123_v4 }
 0x4ea   :  { %v734_v23 = vpop.f32.mrb[8].mxu0 }
 0x4eb   :  { %v4689_v25 = vadd.f32 %v734_v23, %v5535_v32  ;;  %v736_v30 = vpop.f32.mrb[9].mxu0  ;;  %v1236_v23 = vld [vmem:[#allocation6 + $0x108] sm:$0xff] }
 0x4ec   :  { %v4690_v37 = vadd.f32 %v736_v30, %v5538_v36  ;;  %v5807_v30 = vpack.c.bf16 %v1233_v22, %v1231_v19  ;;  %v1260_v19 = vld [vmem:[#allocation6 + $0x1c8] sm:$0xff]  ;;  %v1262_v22 = vld [vmem:[#allocation6 + $0x1d8] sm:$0xff] }
 0x4ee   :  { %4792 = vtanh.f32 %v4690_v37 }
 0x4ef   :  { %4794 = vtanh.f32 %v4689_v25  ;;  %v1238_v25 = vld [vmem:[#allocation6 + $0x118] sm:$0xff] }
 0x4f0   :  { %v5810_v37 = vpack.c.bf16 %v1238_v25, %v1236_v23  ;;  %v5845_v23 = vpack.c.bf16 %v1257_v11, %v1255_v58  ;;  %v5848_v25 = vpack.c.bf16 %v1262_v22, %v1260_v19  ;;  %v4075_v58 = vpack.c.bf16 %v1925_v6, %v1923_v1  ;;  %v1928_v11 = vld [vmem:[#allocation8 + $0x68] sm:$0xff]  ;;  %v1930_v19 = vld [vmem:[#allocation8 + $0x78] sm:$0xff] }
 0x4f1   :  { %v4077_v22 = vpack.c.bf16 %v1930_v19, %v1928_v11  ;;  %v1944_v1 = vld [vmem:[#allocation8 + $0xe8] sm:$0xff]  ;;  %v1946_v6 = vld [vmem:[#allocation8 + $0xf8] sm:$0xff]  ;;  %v1943_v11 = vld [vmem:[#allocation8 + $0xe0] sm:$0xff] }
 0x4f2   :  { %v1945_v19 = vld [vmem:[#allocation8 + $0xf0] sm:$0xff] }
 0x4f8   :  { %v4793_v39 = vpop.eup %4792 }
 0x4f9   :  { %v4795_v40 = vpop.eup %4794  ;;  %811 = vmatprep.mubr.f32.mxu0 %v4793_v39  ;;  %1162 = vmatprep.mubr.f32.mxu1 %v4793_v39  ;;  %v1235_v39 = vld [vmem:[#allocation6 + $0x100] sm:$0xff] }
 0x4fa   :  { %812 = vmatmul.mubr.f32.vlgmr.msra.gmra.mrb[10].mxu0 %v4795_v40  ;;  %1163 = vmatmul.mubr.f32.gmra.mrb[16].mxu1 %v4795_v40  ;;  %v1237_v40 = vld [vmem:[#allocation6 + $0x110] sm:$0xff] }
 0x4fb   :  { %3364 = vmatpush1.bf16.msra.mxu0 %v5134_v8 }
 0x4fc   :  { %3366 = vmatprep.subr.bf16.mxu0 %v5136_v9 }
 0x4ff   :  { %3368 = vmatpush1.bf16.msra.mxu0 %v5152_v14 }
 0x500   :  { %3370 = vmatprep.subr.bf16.mxu0 %v5155_v15 }
 0x503   :  { %3372 = vmatpush1.bf16.msra.mxu0 %v5170_v20 }
 0x504   :  { %3374 = vmatprep.subr.bf16.mxu0 %v5173_v21 }
 0x507   :  { %3376 = vmatpush1.bf16.msra.mxu0 %v5188_v26 }
 0x508   :  { %3378 = vmatprep.subr.bf16.mxu0 %v5191_v27 }
 0x50b   :  { %3380 = vmatpush1.bf16.msra.mxu0 %v5212_v34 }
 0x50c   :  { %3382 = vmatprep.subr.bf16.mxu0 %v5221_v38 }
 0x50f   :  { %3384 = vmatpush1.bf16.msra.mxu0 %v5248_v49 }
 0x510   :  { %3386 = vmatprep.subr.bf16.mxu0 %v5257_v53 }
 0x513   :  { %3388 = vmatpush1.bf16.msra.mxu0 %v5284_v63 }
 0x514   :  { %3390 = vmatprep.subr.bf16.mxu0 %v5290_v3 }
 0x517   :  { %3392 = vmatpush1.bf16.msra.mxu0 %v5308_v13 }
 0x518   :  { %3394 = vmatprep.subr.bf16.mxu0 %v5311_v17 }
 0x51b   :  { %3396 = vmatpush1.bf16.msra.mxu0 %v5326_v24 }
 0x51c   :  { %3398 = vmatprep.subr.bf16.mxu0 %v5332_v28 }
 0x51f   :  { %3400 = vmatpush1.bf16.msra.mxu0 %v5349_v33 }
 0x520   :  { %3402 = vmatprep.subr.bf16.mxu0 %v5353_v35 }
 0x523   :  { %3404 = vmatpush1.bf16.msra.mxu0 %v5370_v41 }
 0x524   :  { %3406 = vmatprep.subr.bf16.mxu0 %v5373_v42 }
 0x527   :  { %3408 = vmatpush1.bf16.msra.mxu0 %v5390_v47 }
 0x528   :  { %3410 = vmatprep.subr.bf16.mxu0 %v5393_v48 }
 0x52b   :  { %3412 = vmatpush1.bf16.msra.mxu0 %v5410_v55 }
 0x52c   :  { %3414 = vmatprep.subr.bf16.mxu0 %v5413_v56 }
 0x52f   :  { %3416 = vmatpush1.bf16.msra.mxu0 %v5430_v61 }
 0x530   :  { %3418 = vmatprep.subr.bf16.mxu0 %v5433_v62 }
 0x533   :  { %3420 = vmatpush1.bf16.msra.mxu0 %v5450_v7 }
 0x534   :  { %3422 = vmatprep.subr.bf16.mxu0 %v5453_v10 }
 0x537   :  { %3424 = vmatpush1.bf16.msra.mxu0 %v5464_v16 }
 0x538   :  { %3426 = vmatprep.subr.bf16.mxu0 %v5123_v4  ;;  %v1204_v4 = vld [vmem:[#allocation6 + $0x8] sm:$0xff] }
 0x5cd   :  { %v813_v43 = vpop.f32.mrb[10].mxu0 }
 0x5ce   :  { %v4691_v44 = vadd.f32 %v813_v43, %v5535_v32  ;;  %v815_v45 = vpop.f32.mrb[11].mxu0  ;;  %v1240_v43 = vld [vmem:[#allocation6 + $0x128] sm:$0xff] }
 0x5cf   :  { %v4692_v51 = vadd.f32 %v815_v45, %v5538_v36  ;;  %v5813_v45 = vpack.c.bf16 %v1237_v40, %v1235_v39  ;;  %v1259_v39 = vld [vmem:[#allocation6 + $0x1c0] sm:$0xff]  ;;  %v1261_v40 = vld [vmem:[#allocation6 + $0x1d0] sm:$0xff] }
 0x5d1   :  { %4796 = vtanh.f32 %v4692_v51 }
 0x5d2   :  { %4798 = vtanh.f32 %v4691_v44  ;;  %v1242_v44 = vld [vmem:[#allocation6 + $0x138] sm:$0xff] }
 0x5d3   :  { %v5816_v51 = vpack.c.bf16 %v1242_v44, %v1240_v43  ;;  %v5851_v43 = vpack.c.bf16 %v1261_v40, %v1259_v39  ;;  %v1264_v44 = vld [vmem:[#allocation6 + $0x1e8] sm:$0xff]  ;;  %v1927_v39 = vld [vmem:[#allocation8 + $0x60] sm:$0xff]  ;;  %v1929_v40 = vld [vmem:[#allocation8 + $0x70] sm:$0xff] }
 0x5db   :  { %v4797_v52 = vpop.eup %4796 }
 0x5dc   :  { %v4799_v46 = vpop.eup %4798  ;;  %890 = vmatprep.mubr.f32.mxu0 %v4797_v52  ;;  %1168 = vmatprep.mubr.f32.mxu1 %v4797_v52  ;;  %v1239_v52 = vld [vmem:[#allocation6 + $0x120] sm:$0xff] }
 0x5dd   :  { %891 = vmatmul.mubr.f32.vlgmr.msra.gmra.mrb[12].mxu0 %v4799_v46  ;;  %1169 = vmatmul.mubr.f32.gmra.mrb[18].mxu1 %v4799_v46  ;;  %v1241_v46 = vld [vmem:[#allocation6 + $0x130] sm:$0xff] }
 0x5de   :  { %3428 = vmatpush1.bf16.msra.mxu0 %v5134_v8  ;;  %v1206_v8 = vld [vmem:[#allocation6 + $0x18] sm:$0xff] }
 0x5df   :  { %3430 = vmatprep.subr.bf16.mxu0 %v5136_v9  ;;  %v1203_v9 = vld [vmem:[#allocation6] sm:$0xff] }
 0x5e2   :  { %3432 = vmatpush1.bf16.msra.mxu0 %v5152_v14  ;;  %v5763_v14 = vpack.c.bf16 %v1206_v8, %v1204_v4  ;;  %v1244_v4 = vld [vmem:[#allocation6 + $0x148] sm:$0xff]  ;;  %v1246_v8 = vld [vmem:[#allocation6 + $0x158] sm:$0xff] }
 0x5e3   :  { %3434 = vmatprep.subr.bf16.mxu0 %v5155_v15  ;;  %v1205_v15 = vld [vmem:[#allocation6 + $0x10] sm:$0xff] }
 0x5e4   :  { %3554 = vmatprep.subr.bf16.mxu1 %v5763_v14 }
 0x5e6   :  { %3436 = vmatpush1.bf16.msra.mxu0 %v5170_v20  ;;  %v1208_v20 = vld [vmem:[#allocation6 + $0x28] sm:$0xff] }
 0x5e7   :  { %3438 = vmatprep.subr.bf16.mxu0 %v5173_v21  ;;  %v1210_v21 = vld [vmem:[#allocation6 + $0x38] sm:$0xff] }
 0x5ea   :  { %3440 = vmatpush1.bf16.msra.mxu0 %v5188_v26  ;;  %v5765_v26 = vpack.c.bf16 %v1205_v15, %v1203_v9  ;;  %v5819_v9 = vpack.c.bf16 %v1241_v46, %v1239_v52  ;;  %v5822_v15 = vpack.c.bf16 %v1246_v8, %v1244_v4  ;;  %v1266_v52 = vld [vmem:[#allocation6 + $0x1f8] sm:$0xff]  ;;  %v1263_v4 = vld [vmem:[#allocation6 + $0x1e0] sm:$0xff]  ;;  %v1265_v8 = vld [vmem:[#allocation6 + $0x1f0] sm:$0xff] }
 0x5eb   :  { %3442 = vmatprep.subr.bf16.mxu0 %v5191_v27  ;;  %v5767_v27 = vpack.c.bf16 %v1210_v21, %v1208_v20  ;;  %v1243_v20 = vld [vmem:[#allocation6 + $0x140] sm:$0xff]  ;;  %v1245_v21 = vld [vmem:[#allocation6 + $0x150] sm:$0xff]  ;;  %v5855_v46 = vpack.c.bf16 %v1266_v52, %v1264_v44  ;;  %v4079_v44 = vpack.c.bf16 %v1929_v40, %v1927_v39  ;;  %v1932_v52 = vld [vmem:[#allocation8 + $0x88] sm:$0xff] }
 0x5ec   :  { %3556 = vmatpush1.bf16.msra.mxu1 %v5765_v26  ;;  %v1948_v39 = vld [vmem:[#allocation8 + $0x108] sm:$0xff]  ;;  %v1950_v40 = vld [vmem:[#allocation8 + $0x118] sm:$0xff] }
 0x5ed   :  { %3558 = vmatprep.subr.bf16.mxu1 %v5767_v27 }
 0x5ee   :  { %3444 = vmatpush1.bf16.msra.mxu0 %v5212_v34  ;;  %v1207_v34 = vld [vmem:[#allocation6 + $0x20] sm:$0xff] }
 0x5ef   :  { %3446 = vmatprep.subr.bf16.mxu0 %v5221_v38  ;;  %v1209_v38 = vld [vmem:[#allocation6 + $0x30] sm:$0xff] }
 0x5f2   :  { %3448 = vmatpush1.bf16.msra.mxu0 %v5248_v49  ;;  %v1212_v49 = vld [vmem:[#allocation6 + $0x48] sm:$0xff] }
 0x5f3   :  { %3450 = vmatprep.subr.bf16.mxu0 %v5257_v53  ;;  %v1214_v53 = vld [vmem:[#allocation6 + $0x58] sm:$0xff] }
 0x5f6   :  { %3452 = vmatpush1.bf16.msra.mxu0 %v5284_v63  ;;  %v5771_v63 = vpack.c.bf16 %v1209_v38, %v1207_v34  ;;  %v5825_v34 = vpack.c.bf16 %v1245_v21, %v1243_v20  ;;  %v5857_v20 = vpack.c.bf16 %v1265_v8, %v1263_v4  ;;  %v1916_v21 = vld [vmem:[#allocation8 + $0x8] sm:$0xff]  ;;  %v1934_v4 = vld [vmem:[#allocation8 + $0x98] sm:$0xff] }
 0x5f7   :  { %3454 = vmatprep.subr.bf16.mxu0 %v5290_v3  ;;  %v5774_v3 = vpack.c.bf16 %v1214_v53, %v1212_v49  ;;  %v4081_v8 = vpack.c.bf16 %v1934_v4, %v1932_v52  ;;  %v1947_v52 = vld [vmem:[#allocation8 + $0x100] sm:$0xff]  ;;  %v1949_v4 = vld [vmem:[#allocation8 + $0x110] sm:$0xff] }
 0x5f8   :  { %3560 = vmatpush1.bf16.msra.mxu1 %v5771_v63 }
 0x5f9   :  { %3562 = vmatprep.subr.bf16.mxu1 %v5774_v3 }
 0x5fa   :  { %3456 = vmatpush1.bf16.msra.mxu0 %v5308_v13  ;;  %v1211_v13 = vld [vmem:[#allocation6 + $0x40] sm:$0xff] }
 0x5fb   :  { %3458 = vmatprep.subr.bf16.mxu0 %v5311_v17  ;;  %v1213_v17 = vld [vmem:[#allocation6 + $0x50] sm:$0xff] }
 0x5fe   :  { %3460 = vmatpush1.bf16.msra.mxu0 %v5326_v24  ;;  %v1216_v24 = vld [vmem:[#allocation6 + $0x68] sm:$0xff] }
 0x5ff   :  { %3462 = vmatprep.subr.bf16.mxu0 %v5332_v28  ;;  %v1218_v28 = vld [vmem:[#allocation6 + $0x78] sm:$0xff] }
 0x602   :  { %3464 = vmatpush1.bf16.msra.mxu0 %v5349_v33  ;;  %v5777_v33 = vpack.c.bf16 %v1213_v17, %v1211_v13 }
 0x603   :  { %3466 = vmatprep.subr.bf16.mxu0 %v5353_v35  ;;  %v5780_v35 = vpack.c.bf16 %v1218_v28, %v1216_v24  ;;  %v1248_v28 = vld [vmem:[#allocation6 + $0x168] sm:$0xff] }
 0x604   :  { %3564 = vmatpush1.bf16.msra.mxu1 %v5777_v33 }
 0x605   :  { %3566 = vmatprep.subr.bf16.mxu1 %v5780_v35 }
 0x606   :  { %3468 = vmatpush1.bf16.msra.mxu0 %v5370_v41  ;;  %v1215_v41 = vld [vmem:[#allocation6 + $0x60] sm:$0xff] }
 0x607   :  { %3470 = vmatprep.subr.bf16.mxu0 %v5373_v42  ;;  %v1217_v42 = vld [vmem:[#allocation6 + $0x70] sm:$0xff] }
 0x60a   :  { %3472 = vmatpush1.bf16.msra.mxu0 %v5390_v47  ;;  %v1220_v47 = vld [vmem:[#allocation6 + $0x88] sm:$0xff] }
 0x60b   :  { %3474 = vmatprep.subr.bf16.mxu0 %v5393_v48  ;;  %v1222_v48 = vld [vmem:[#allocation6 + $0x98] sm:$0xff] }
 0x60e   :  { %3476 = vmatpush1.bf16.msra.mxu0 %v5410_v55  ;;  %v5783_v55 = vpack.c.bf16 %v1217_v42, %v1215_v41  ;;  %v1250_v41 = vld [vmem:[#allocation6 + $0x178] sm:$0xff] }
 0x60f   :  { %3478 = vmatprep.subr.bf16.mxu0 %v5413_v56  ;;  %v5786_v56 = vpack.c.bf16 %v1222_v48, %v1220_v47  ;;  %v5831_v42 = vpack.c.bf16 %v1250_v41, %v1248_v28  ;;  %v1247_v47 = vld [vmem:[#allocation6 + $0x160] sm:$0xff]  ;;  %v1249_v48 = vld [vmem:[#allocation6 + $0x170] sm:$0xff]  ;;  %v1922_v28 = vld [vmem:[#allocation8 + $0x38] sm:$0xff] }
 0x610   :  { %3568 = vmatpush1.bf16.msra.mxu1 %v5783_v55 }
 0x611   :  { %3570 = vmatprep.subr.bf16.mxu1 %v5786_v56 }
 0x612   :  { %3480 = vmatpush1.bf16.msra.mxu0 %v5430_v61  ;;  %v1219_v61 = vld [vmem:[#allocation6 + $0x80] sm:$0xff] }
 0x613   :  { %3482 = vmatprep.subr.bf16.mxu0 %v5433_v62  ;;  %v1221_v62 = vld [vmem:[#allocation6 + $0x90] sm:$0xff] }
 0x616   :  { %3484 = vmatpush1.bf16.msra.mxu0 %v5450_v7  ;;  %v1224_v7 = vld [vmem:[#allocation6 + $0xa8] sm:$0xff] }
 0x617   :  { %3486 = vmatprep.subr.bf16.mxu0 %v5453_v10  ;;  %v1226_v10 = vld [vmem:[#allocation6 + $0xb8] sm:$0xff] }
 0x618   :  { %v5792_v54 = vpack.c.bf16 %v1226_v10, %v1224_v7  ;;  %v1254_v7 = vld [vmem:[#allocation6 + $0x198] sm:$0xff] }
 0x61a   :  { %3488 = vmatpush1.bf16.msra.mxu0 %v5464_v16  ;;  %v5789_v16 = vpack.c.bf16 %v1221_v62, %v1219_v61  ;;  %v5833_v61 = vpack.c.bf16 %v1249_v48, %v1247_v47  ;;  %v1252_v62 = vld [vmem:[#allocation6 + $0x188] sm:$0xff]  ;;  %v1919_v47 = vld [vmem:[#allocation8 + $0x20] sm:$0xff]  ;;  %v1921_v48 = vld [vmem:[#allocation8 + $0x30] sm:$0xff] }
 0x61b   :  { %v5837_v10 = vpack.c.bf16 %v1254_v7, %v1252_v62  ;;  %v4071_v62 = vpack.c.bf16 %v1921_v48, %v1919_v47  ;;  %v1924_v7 = vld [vmem:[#allocation8 + $0x48] sm:$0xff]  ;;  %v1942_v48 = vld [vmem:[#allocation8 + $0xd8] sm:$0xff] }
 0x61c   :  { %3572 = vmatpush1.bf16.msra.mxu1 %v5789_v16  ;;  %v4073_v59 = vpack.c.bf16 %v1926_v57, %v1924_v7  ;;  %v1940_v47 = vld [vmem:[#allocation8 + $0xc8] sm:$0xff]  ;;  %v1939_v7 = vld [vmem:[#allocation8 + $0xc0] sm:$0xff]  ;;  %v1941_v57 = vld [vmem:[#allocation8 + $0xd0] sm:$0xff] }
 0x61d   :  { %3574 = vmatprep.subr.bf16.mxu1 %v5792_v54 }
 0x620   :  { %3576 = vmatpush1.bf16.msra.mxu1 %v5795_v50 }
 0x621   :  { %3578 = vmatprep.subr.bf16.mxu1 %v5798_v5 }
 0x624   :  { %3580 = vmatpush1.bf16.msra.mxu1 %v5801_v12 }
 0x625   :  { %3582 = vmatprep.subr.bf16.mxu1 %v5804_v18 }
 0x628   :  { %3584 = vmatpush1.bf16.msra.mxu1 %v5807_v30 }
 0x629   :  { %3586 = vmatprep.subr.bf16.mxu1 %v5810_v37 }
 0x62c   :  { %3588 = vmatpush1.bf16.msra.mxu1 %v5813_v45 }
 0x62d   :  { %3590 = vmatprep.subr.bf16.mxu1 %v5816_v51 }
 0x630   :  { %3592 = vmatpush1.bf16.msra.mxu1 %v5819_v9 }
 0x631   :  { %3594 = vmatprep.subr.bf16.mxu1 %v5822_v15 }
 0x634   :  { %3596 = vmatpush1.bf16.msra.mxu1 %v5825_v34 }
 0x635   :  { %3598 = vmatprep.subr.bf16.mxu1 %v5831_v42 }
 0x638   :  { %3600 = vmatpush1.bf16.msra.mxu1 %v5833_v61 }
 0x639   :  { %3602 = vmatprep.subr.bf16.mxu1 %v5837_v10 }
 0x63c   :  { %3604 = vmatpush1.bf16.msra.mxu1 %v5839_v60 }
 0x63d   :  { %3606 = vmatprep.subr.bf16.mxu1 %v5842_v2 }
 0x640   :  { %3608 = vmatpush1.bf16.msra.mxu1 %v5845_v23 }
 0x641   :  { %3610 = vmatprep.subr.bf16.mxu1 %v5848_v25 }
 0x644   :  { %3612 = vmatpush1.bf16.msra.mxu1 %v5851_v43 }
 0x645   :  { %3614 = vmatprep.subr.bf16.mxu1 %v5855_v46 }
 0x648   :  { %3616 = vmatpush1.bf16.msra.mxu1 %v5857_v20 }
 0x649   :  { %3618 = vmatprep.subr.bf16.mxu1 %v5763_v14 }
 0x6b0   :  { %v892_v38 = vpop.f32.mrb[12].mxu0 }
 0x6b1   :  { %v4693_v49 = vadd.f32 %v892_v38, %v5535_v32  ;;  %v894_v53 = vpop.f32.mrb[13].mxu0  ;;  %v1918_v38 = vld [vmem:[#allocation8 + $0x18] sm:$0xff] }
 0x6b2   :  { %v4694_v13 = vadd.f32 %v894_v53, %v5538_v36  ;;  %v1915_v53 = vld [vmem:[#allocation8] sm:$0xff] }
 0x6b4   :  { %4800 = vtanh.f32 %v4694_v13  ;;  %v1917_v13 = vld [vmem:[#allocation8 + $0x10] sm:$0xff] }
 0x6b5   :  { %4802 = vtanh.f32 %v4693_v49  ;;  %v4065_v49 = vpack.c.bf16 %v1918_v38, %v1916_v21  ;;  %v1931_v21 = vld [vmem:[#allocation8 + $0x80] sm:$0xff]  ;;  %v1933_v38 = vld [vmem:[#allocation8 + $0x90] sm:$0xff] }
 0x6b7   :  { %4066 = vmatprep.subr.bf16.mxu0 %v4065_v49  ;;  %v4083_v49 = vpack.c.bf16 %v1933_v38, %v1931_v21  ;;  %v1952_v21 = vld [vmem:[#allocation8 + $0x128] sm:$0xff]  ;;  %v1954_v38 = vld [vmem:[#allocation8 + $0x138] sm:$0xff] }
 0x6be   :  { %v4801_v17 = vpop.eup %4800 }
 0x6bf   :  { %v4803_v24 = vpop.eup %4802  ;;  %969 = vmatprep.mubr.f32.mxu0 %v4801_v17  ;;  %1174 = vmatprep.mubr.f32.mxu1 %v4801_v17  ;;  %v4067_v17 = vpack.c.bf16 %v1917_v13, %v1915_v53  ;;  %v1936_v53 = vld [vmem:[#allocation8 + $0xa8] sm:$0xff]  ;;  %v1938_v13 = vld [vmem:[#allocation8 + $0xb8] sm:$0xff] }
 0x6c0   :  { %970 = vmatmul.mubr.f32.vlgmr.msra.gmra.mrb[14].mxu0 %v4803_v24  ;;  %1175 = vmatmul.mubr.f32.gmra.mrb[20].mxu1 %v4803_v24  ;;  %v1920_v24 = vld [vmem:[#allocation8 + $0x28] sm:$0xff] }
 0x6c1   :  { %v4069_v41 = vpack.c.bf16 %v1922_v28, %v1920_v24  ;;  %4068 = vmatpush1.bf16.msra.mxu0 %v4067_v17  ;;  %v4085_v17 = vpack.c.bf16 %v1938_v13, %v1936_v53  ;;  %v1935_v24 = vld [vmem:[#allocation8 + $0xa0] sm:$0xff]  ;;  %v1937_v28 = vld [vmem:[#allocation8 + $0xb0] sm:$0xff] }
 0x6c2   :  { %v1951_v53 = vld [vmem:[#allocation8 + $0x120] sm:$0xff]  ;;  %v1953_v13 = vld [vmem:[#allocation8 + $0x130] sm:$0xff] }
 0x6c3   :  { %4070 = vmatprep.subr.bf16.mxu0 %v4069_v41  ;;  %v4087_v41 = vpack.c.bf16 %v1937_v28, %v1935_v24  ;;  %v1956_v24 = vld [vmem:[#allocation8 + $0x148] sm:$0xff]  ;;  %v1958_v28 = vld [vmem:[#allocation8 + $0x158] sm:$0xff] }
 0x6c5   :  { %4072 = vmatpush1.bf16.msra.mxu0 %v4071_v62  ;;  %v4089_v62 = vpack.c.bf16 %v1942_v48, %v1940_v47  ;;  %v1955_v47 = vld [vmem:[#allocation8 + $0x140] sm:$0xff]  ;;  %v1957_v48 = vld [vmem:[#allocation8 + $0x150] sm:$0xff] }
 0x6c6   :  { %4074 = vmatprep.subr.bf16.mxu0 %v4073_v59  ;;  %v4091_v59 = vpack.c.bf16 %v1941_v57, %v1939_v7  ;;  %v1960_v7 = vld [vmem:[#allocation8 + $0x168] sm:$0xff]  ;;  %v1962_v57 = vld [vmem:[#allocation8 + $0x178] sm:$0xff] }
 0x6c9   :  { %4076 = vmatpush1.bf16.msra.mxu0 %v4075_v58  ;;  %v4093_v58 = vpack.c.bf16 %v1946_v6, %v1944_v1  ;;  %v1959_v1 = vld [vmem:[#allocation8 + $0x160] sm:$0xff]  ;;  %v1961_v6 = vld [vmem:[#allocation8 + $0x170] sm:$0xff] }
 0x6ca   :  { %4078 = vmatprep.subr.bf16.mxu0 %v4077_v22  ;;  %v4095_v22 = vpack.c.bf16 %v1945_v19, %v1943_v11 }
 0x6cd   :  { %4080 = vmatpush1.bf16.msra.mxu0 %v4079_v44  ;;  %v4097_v44 = vpack.c.bf16 %v1950_v40, %v1948_v39 }
 0x6ce   :  { %4082 = vmatprep.subr.bf16.mxu0 %v4081_v8  ;;  %v4099_v8 = vpack.c.bf16 %v1949_v4, %v1947_v52  ;;  %v1963_v4 = vld [vmem:[#allocation8 + $0x180] sm:$0xff] }
 0x6d1   :  { %4084 = vmatpush1.bf16.msra.mxu0 %v4083_v49  ;;  %v4101_v49 = vpack.c.bf16 %v1954_v38, %v1952_v21  ;;  %v1968_v38 = vld [vmem:[#allocation8 + $0x1a8] sm:$0xff] }
 0x6d2   :  { %4086 = vmatprep.subr.bf16.mxu0 %v4085_v17  ;;  %v4103_v17 = vpack.c.bf16 %v1953_v13, %v1951_v53  ;;  %v1967_v13 = vld [vmem:[#allocation8 + $0x1a0] sm:$0xff] }
 0x6d5   :  { %4088 = vmatpush1.bf16.msra.mxu0 %v4087_v41  ;;  %v4105_v41 = vpack.c.bf16 %v1958_v28, %v1956_v24  ;;  %v1972_v28 = vld [vmem:[#allocation8 + $0x1c8] sm:$0xff] }
 0x6d6   :  { %4090 = vmatprep.subr.bf16.mxu0 %v4089_v62  ;;  %v4107_v62 = vpack.c.bf16 %v1957_v48, %v1955_v47  ;;  %v1971_v47 = vld [vmem:[#allocation8 + $0x1c0] sm:$0xff] }
 0x6d9   :  { %4092 = vmatpush1.bf16.msra.mxu0 %v4091_v59  ;;  %v4109_v59 = vpack.c.bf16 %v1962_v57, %v1960_v7  ;;  %v1976_v7 = vld [vmem:[#allocation8 + $0x1e8] sm:$0xff]  ;;  %v1978_v57 = vld [vmem:[#allocation8 + $0x1f8] sm:$0xff] }
 0x6da   :  { %4094 = vmatprep.subr.bf16.mxu0 %v4093_v58  ;;  %v4111_v58 = vpack.c.bf16 %v1961_v6, %v1959_v1  ;;  %v4125_v1 = vpack.c.bf16 %v1978_v57, %v1976_v7  ;;  %v1975_v6 = vld [vmem:[#allocation8 + $0x1e0] sm:$0xff] }
 0x6dd   :  { %4096 = vmatpush1.bf16.msra.mxu0 %v4095_v22 }
 0x6de   :  { %4098 = vmatprep.subr.bf16.mxu0 %v4097_v44 }
 0x6e1   :  { %4100 = vmatpush1.bf16.msra.mxu0 %v4099_v8  ;;  %v1965_v8 = vld [vmem:[#allocation8 + $0x190] sm:$0xff] }
 0x6e2   :  { %4102 = vmatprep.subr.bf16.mxu0 %v4101_v49  ;;  %v4115_v21 = vpack.c.bf16 %v1965_v8, %v1963_v4  ;;  %v1970_v49 = vld [vmem:[#allocation8 + $0x1b8] sm:$0xff] }
 0x6e3   :  { %v4117_v53 = vpack.c.bf16 %v1970_v49, %v1968_v38 }
 0x6e5   :  { %4104 = vmatpush1.bf16.msra.mxu0 %v4103_v17  ;;  %v1969_v17 = vld [vmem:[#allocation8 + $0x1b0] sm:$0xff] }
 0x6e6   :  { %4106 = vmatprep.subr.bf16.mxu0 %v4105_v41  ;;  %v4119_v24 = vpack.c.bf16 %v1969_v17, %v1967_v13  ;;  %v1974_v41 = vld [vmem:[#allocation8 + $0x1d8] sm:$0xff] }
 0x6e7   :  { %v4121_v48 = vpack.c.bf16 %v1974_v41, %v1972_v28 }
 0x6e9   :  { %4108 = vmatpush1.bf16.msra.mxu0 %v4107_v62  ;;  %v1973_v62 = vld [vmem:[#allocation8 + $0x1d0] sm:$0xff] }
 0x6ea   :  { %4110 = vmatprep.subr.bf16.mxu0 %v4109_v59  ;;  %v4123_v59 = vpack.c.bf16 %v1973_v62, %v1971_v47 }
 0x6ed   :  { %4112 = vmatpush1.bf16.msra.mxu0 %v4111_v58  ;;  %v1977_v58 = vld [vmem:[#allocation8 + $0x1f0] sm:$0xff] }
 0x793   :  { %v971_v11 = vpop.f32.mrb[14].mxu0 }
 0x794   :  { %v4695_v19 = vadd.f32 %v971_v11, %v5535_v32  ;;  %v973_v22 = vpop.f32.mrb[15].mxu0  ;;  %v1964_v32 = vld [vmem:[#allocation8 + $0x188] sm:$0xff]  ;;  %v4127_v11 = vpack.c.bf16 %v1977_v58, %v1975_v6 }
 0x795   :  { %v4696_v39 = vadd.f32 %v973_v22, %v5538_v36  ;;  %v1966_v36 = vld [vmem:[#allocation8 + $0x198] sm:$0xff] }
 0x796   :  { %v4113_v52 = vpack.c.bf16 %v1966_v36, %v1964_v32 }
 0x797   :  { %4804 = vtanh.f32 %v4696_v39 }
 0x798   :  { %4806 = vtanh.f32 %v4695_v19  ;;  %4114 = vmatprep.subr.bf16.mxu0 %v4113_v52  ;;  %v1062_v19 = vld [vmem:[%s6569_s6] sm:$0x3] }
 0x799   :  { %4116 = vmatpush1.bf16.msra.mxu0 %v4115_v21  ;;  %v5902_v22 = vrot.slane %v1062_v19, %v5527_v29  ;;  %v5905_v39 = vrot.slane %v1062_v19, %v5532_v31 }
 0x79a   :  { %4118 = vmatprep.subr.bf16.mxu0 %v4117_v53 }
 0x79d   :  { %4120 = vmatpush1.bf16.msra.mxu0 %v4119_v24 }
 0x79e   :  { %4122 = vmatprep.subr.bf16.mxu0 %v4121_v48 }
 0x7a1   :  { %v4805_v40 = vpop.eup %4804  ;;  %4124 = vmatpush1.bf16.msra.mxu0 %v4123_v59 }
 0x7a2   :  { %v4807_v44 = vpop.eup %4806  ;;  %1180 = vmatprep.mubr.f32.mxu1 %v4805_v40  ;;  %4126 = vmatprep.subr.bf16.mxu0 %v4125_v1 }
 0x7a3   :  { %1181 = vmatmul.mubr.f32.gmra.mrb[22].mxu1 %v4807_v44 }
 0x7a4   :  { %1333 = vmatprep.mubr.f32.mxu1 %v4972_v0 }
 0x7a5   :  { %4128 = vmatpush1.bf16.msra.mxu0 %v4127_v11 }
 0x7a7   :  { %1334 = vmatmul.mubr.f32.vlgmr.msra.gmra.mrb[8].mxu1 %v4972_v0 }
 0x7a8   :  { %3620 = vmatpush1.bf16.msra.mxu1 %v5765_v26 }
 0x7a9   :  { %3622 = vmatprep.subr.bf16.mxu1 %v5767_v27 }
 0x7ac   :  { %3624 = vmatpush1.bf16.msra.mxu1 %v5771_v63 }
 0x7ad   :  { %3626 = vmatprep.subr.bf16.mxu1 %v5774_v3 }
 0x7b0   :  { %3628 = vmatpush1.bf16.msra.mxu1 %v5777_v33 }
 0x7b1   :  { %3630 = vmatprep.subr.bf16.mxu1 %v5780_v35 }
 0x7b4   :  { %3632 = vmatpush1.bf16.msra.mxu1 %v5783_v55 }
 0x7b5   :  { %3634 = vmatprep.subr.bf16.mxu1 %v5786_v56 }
 0x7b8   :  { %3636 = vmatpush1.bf16.msra.mxu1 %v5789_v16 }
 0x7b9   :  { %3638 = vmatprep.subr.bf16.mxu1 %v5792_v54 }
 0x7bc   :  { %3640 = vmatpush1.bf16.msra.mxu1 %v5795_v50 }
 0x7bd   :  { %3642 = vmatprep.subr.bf16.mxu1 %v5798_v5 }
 0x7c0   :  { %3644 = vmatpush1.bf16.msra.mxu1 %v5801_v12 }
 0x7c1   :  { %3646 = vmatprep.subr.bf16.mxu1 %v5804_v18 }
 0x7c4   :  { %3648 = vmatpush1.bf16.msra.mxu1 %v5807_v30 }
 0x7c5   :  { %3650 = vmatprep.subr.bf16.mxu1 %v5810_v37 }
 0x7c8   :  { %3652 = vmatpush1.bf16.msra.mxu1 %v5813_v45 }
 0x7c9   :  { %3654 = vmatprep.subr.bf16.mxu1 %v5816_v51 }
 0x7cc   :  { %3656 = vmatpush1.bf16.msra.mxu1 %v5819_v9 }
 0x7cd   :  { %3658 = vmatprep.subr.bf16.mxu1 %v5822_v15 }
 0x7d0   :  { %3660 = vmatpush1.bf16.msra.mxu1 %v5825_v34 }
 0x7d1   :  { %3662 = vmatprep.subr.bf16.mxu1 %v5831_v42 }
 0x7d4   :  { %3664 = vmatpush1.bf16.msra.mxu1 %v5833_v61 }
 0x7d5   :  { %3666 = vmatprep.subr.bf16.mxu1 %v5837_v10 }
 0x7d8   :  { %3668 = vmatpush1.bf16.msra.mxu1 %v5839_v60 }
 0x7d9   :  { %3670 = vmatprep.subr.bf16.mxu1 %v5842_v2 }
 0x7dc   :  { %3672 = vmatpush1.bf16.msra.mxu1 %v5845_v23 }
 0x7dd   :  { %3674 = vmatprep.subr.bf16.mxu1 %v5848_v25 }
 0x7e0   :  { %3676 = vmatpush1.bf16.msra.mxu1 %v5851_v43 }
 0x7e1   :  { %3678 = vmatprep.subr.bf16.mxu1 %v5855_v46 }
 0x7e4   :  { %3680 = vmatpush1.bf16.msra.mxu1 %v5857_v20 }
 0x7e5   :  { %3682 = vmatprep.subr.bf16.mxu1 %v5763_v14 }
 0x87a   :  { %v1335_v40 = vpop.f32.mrb[8].mxu1 }
 0x87b   :  { %v4697_v44 = vadd.f32 %v1335_v40, %v5902_v22  ;;  %v1337_v32 = vpop.f32.mrb[9].mxu1 }
 0x87c   :  { %v4698_v36 = vadd.f32 %v1337_v32, %v5905_v39 }
 0x87e   :  { %4808 = vtanh.f32 %v4698_v36 }
 0x87f   :  { %4810 = vtanh.f32 %v4697_v44 }
 0x888   :  { %v4809_v52 = vpop.eup %4808 }
 0x889   :  { %v4811_v4 = vpop.eup %4810  ;;  %1412 = vmatprep.mubr.f32.mxu1 %v4809_v52  ;;  %2055 = vmatprep.mubr.f32.mxu0 %v4809_v52 }
 0x88a   :  { %1413 = vmatmul.mubr.f32.vlgmr.msra.gmra.mrb[10].mxu1 %v4811_v4  ;;  %2056 = vmatmul.mubr.f32.vlgmr.msra.gmra.mrb[16].mxu0 %v4811_v4 }
 0x88b   :  { %3684 = vmatpush1.bf16.msra.mxu1 %v5765_v26 }
 0x88c   :  { %3686 = vmatprep.subr.bf16.mxu1 %v5767_v27 }
 0x88f   :  { %3688 = vmatpush1.bf16.msra.mxu1 %v5771_v63 }
 0x890   :  { %3690 = vmatprep.subr.bf16.mxu1 %v5774_v3 }
 0x893   :  { %3692 = vmatpush1.bf16.msra.mxu1 %v5777_v33 }
 0x894   :  { %3694 = vmatprep.subr.bf16.mxu1 %v5780_v35 }
 0x897   :  { %3696 = vmatpush1.bf16.msra.mxu1 %v5783_v55 }
 0x898   :  { %3698 = vmatprep.subr.bf16.mxu1 %v5786_v56 }
 0x89b   :  { %3700 = vmatpush1.bf16.msra.mxu1 %v5789_v16 }
 0x89c   :  { %3702 = vmatprep.subr.bf16.mxu1 %v5792_v54 }
 0x89f   :  { %3704 = vmatpush1.bf16.msra.mxu1 %v5795_v50 }
 0x8a0   :  { %3706 = vmatprep.subr.bf16.mxu1 %v5798_v5 }
 0x8a3   :  { %3708 = vmatpush1.bf16.msra.mxu1 %v5801_v12 }
 0x8a4   :  { %3710 = vmatprep.subr.bf16.mxu1 %v5804_v18 }
 0x8a7   :  { %3712 = vmatpush1.bf16.msra.mxu1 %v5807_v30 }
 0x8a8   :  { %3714 = vmatprep.subr.bf16.mxu1 %v5810_v37 }
 0x8ab   :  { %3716 = vmatpush1.bf16.msra.mxu1 %v5813_v45 }
 0x8ac   :  { %3718 = vmatprep.subr.bf16.mxu1 %v5816_v51 }
 0x8af   :  { %3720 = vmatpush1.bf16.msra.mxu1 %v5819_v9 }
 0x8b0   :  { %3722 = vmatprep.subr.bf16.mxu1 %v5822_v15 }
 0x8b3   :  { %3724 = vmatpush1.bf16.msra.mxu1 %v5825_v34 }
 0x8b4   :  { %3726 = vmatprep.subr.bf16.mxu1 %v5831_v42 }
 0x8b7   :  { %3728 = vmatpush1.bf16.msra.mxu1 %v5833_v61 }
 0x8b8   :  { %3730 = vmatprep.subr.bf16.mxu1 %v5837_v10 }
 0x8bb   :  { %3732 = vmatpush1.bf16.msra.mxu1 %v5839_v60 }
 0x8bc   :  { %3734 = vmatprep.subr.bf16.mxu1 %v5842_v2 }
 0x8bf   :  { %3736 = vmatpush1.bf16.msra.mxu1 %v5845_v23 }
 0x8c0   :  { %3738 = vmatprep.subr.bf16.mxu1 %v5848_v25 }
 0x8c3   :  { %3740 = vmatpush1.bf16.msra.mxu1 %v5851_v43 }
 0x8c4   :  { %3742 = vmatprep.subr.bf16.mxu1 %v5855_v46 }
 0x8c7   :  { %3744 = vmatpush1.bf16.msra.mxu1 %v5857_v20 }
 0x8c8   :  { %3746 = vmatprep.subr.bf16.mxu1 %v5763_v14 }
 0x95d   :  { %v1414_v8 = vpop.f32.mrb[10].mxu1 }
 0x95e   :  { %v4699_v21 = vadd.f32 %v1414_v8, %v5902_v22  ;;  %v1416_v38 = vpop.f32.mrb[11].mxu1 }
 0x95f   :  { %v4700_v49 = vadd.f32 %v1416_v38, %v5905_v39 }
 0x961   :  { %4812 = vtanh.f32 %v4700_v49 }
 0x962   :  { %4814 = vtanh.f32 %v4699_v21 }
 0x96b   :  { %v4813_v53 = vpop.eup %4812 }
 0x96c   :  { %v4815_v13 = vpop.eup %4814  ;;  %1491 = vmatprep.mubr.f32.mxu1 %v4813_v53  ;;  %2061 = vmatprep.mubr.f32.mxu0 %v4813_v53  ;;  %v2140_v53 = vld [vmem:[#allocation9 + $0xa0] sm:$0xff] }
 0x96d   :  { %1492 = vmatmul.mubr.f32.vlgmr.msra.gmra.mrb[12].mxu1 %v4815_v13  ;;  %2062 = vmatmul.mubr.f32.gmra.mrb[18].mxu0 %v4815_v13  ;;  %v2142_v13 = vld [vmem:[#allocation9 + $0xb0] sm:$0xff] }
 0x96e   :  { %3748 = vmatpush1.bf16.msra.mxu1 %v5765_v26 }
 0x96f   :  { %3750 = vmatprep.subr.bf16.mxu1 %v5767_v27 }
 0x972   :  { %3752 = vmatpush1.bf16.msra.mxu1 %v5771_v63 }
 0x973   :  { %3754 = vmatprep.subr.bf16.mxu1 %v5774_v3 }
 0x976   :  { %3756 = vmatpush1.bf16.msra.mxu1 %v5777_v33 }
 0x977   :  { %3758 = vmatprep.subr.bf16.mxu1 %v5780_v35 }
 0x97a   :  { %3760 = vmatpush1.bf16.msra.mxu1 %v5783_v55 }
 0x97b   :  { %3762 = vmatprep.subr.bf16.mxu1 %v5786_v56 }
 0x97e   :  { %3764 = vmatpush1.bf16.msra.mxu1 %v5789_v16 }
 0x97f   :  { %3766 = vmatprep.subr.bf16.mxu1 %v5792_v54 }
 0x982   :  { %3768 = vmatpush1.bf16.msra.mxu1 %v5795_v50 }
 0x983   :  { %3770 = vmatprep.subr.bf16.mxu1 %v5798_v5 }
 0x986   :  { %3772 = vmatpush1.bf16.msra.mxu1 %v5801_v12 }
 0x987   :  { %3774 = vmatprep.subr.bf16.mxu1 %v5804_v18 }
 0x98a   :  { %3776 = vmatpush1.bf16.msra.mxu1 %v5807_v30 }
 0x98b   :  { %3778 = vmatprep.subr.bf16.mxu1 %v5810_v37 }
 0x98e   :  { %3780 = vmatpush1.bf16.msra.mxu1 %v5813_v45 }
 0x98f   :  { %3782 = vmatprep.subr.bf16.mxu1 %v5816_v51 }
 0x992   :  { %3784 = vmatpush1.bf16.msra.mxu1 %v5819_v9 }
 0x993   :  { %3786 = vmatprep.subr.bf16.mxu1 %v5822_v15 }
 0x996   :  { %3788 = vmatpush1.bf16.msra.mxu1 %v5825_v34 }
 0x997   :  { %3790 = vmatprep.subr.bf16.mxu1 %v5831_v42 }
 0x99a   :  { %3792 = vmatpush1.bf16.msra.mxu1 %v5833_v61 }
 0x99b   :  { %3794 = vmatprep.subr.bf16.mxu1 %v5837_v10 }
 0x99e   :  { %3796 = vmatpush1.bf16.msra.mxu1 %v5839_v60 }
 0x99f   :  { %3798 = vmatprep.subr.bf16.mxu1 %v5842_v2 }
 0x9a2   :  { %3800 = vmatpush1.bf16.msra.mxu1 %v5845_v23 }
 0x9a3   :  { %3802 = vmatprep.subr.bf16.mxu1 %v5848_v25 }
 0x9a6   :  { %3804 = vmatpush1.bf16.msra.mxu1 %v5851_v43 }
 0x9a7   :  { %3806 = vmatprep.subr.bf16.mxu1 %v5855_v46 }
 0x9aa   :  { %3808 = vmatpush1.bf16.msra.mxu1 %v5857_v20 }
 0x9ab   :  { %3810 = vmatprep.subr.bf16.mxu1 %v5763_v14 }
 0xa40   :  { %v1493_v17 = vpop.f32.mrb[12].mxu1 }
 0xa41   :  { %v4701_v24 = vadd.f32 %v1493_v17, %v5902_v22  ;;  %v1495_v28 = vpop.f32.mrb[13].mxu1  ;;  %v2145_v17 = vld [vmem:[#allocation9 + $0xc8] sm:$0xff] }
 0xa42   :  { %v4702_v41 = vadd.f32 %v1495_v28, %v5905_v39  ;;  %v6142_v28 = vpack.c.bf16 %v2142_v13, %v2140_v53  ;;  %v2168_v53 = vld [vmem:[#allocation9 + $0x180] sm:$0xff]  ;;  %v2170_v13 = vld [vmem:[#allocation9 + $0x190] sm:$0xff] }
 0xa44   :  { %4816 = vtanh.f32 %v4702_v41 }
 0xa45   :  { %4818 = vtanh.f32 %v4701_v24  ;;  %v2147_v24 = vld [vmem:[#allocation9 + $0xd8] sm:$0xff] }
 0xa46   :  { %v6145_v41 = vpack.c.bf16 %v2147_v24, %v2145_v17  ;;  %v6186_v17 = vpack.c.bf16 %v2170_v13, %v2168_v53  ;;  %v2173_v24 = vld [vmem:[#allocation9 + $0x1a8] sm:$0xff] }
 0xa4e   :  { %v4817_v47 = vpop.eup %4816 }
 0xa4f   :  { %v4819_v48 = vpop.eup %4818  ;;  %1570 = vmatprep.mubr.f32.mxu1 %v4817_v47  ;;  %2067 = vmatprep.mubr.f32.mxu0 %v4817_v47  ;;  %v2144_v47 = vld [vmem:[#allocation9 + $0xc0] sm:$0xff] }
 0xa50   :  { %1571 = vmatmul.mubr.f32.vlgmr.msra.gmra.mrb[14].mxu1 %v4819_v48  ;;  %2068 = vmatmul.mubr.f32.gmra.mrb[20].mxu0 %v4819_v48  ;;  %v2146_v48 = vld [vmem:[#allocation9 + $0xd0] sm:$0xff] }
 0xa51   :  { %3812 = vmatpush1.bf16.msra.mxu1 %v5765_v26 }
 0xa52   :  { %3814 = vmatprep.subr.bf16.mxu1 %v5767_v27 }
 0xa55   :  { %3816 = vmatpush1.bf16.msra.mxu1 %v5771_v63 }
 0xa56   :  { %3818 = vmatprep.subr.bf16.mxu1 %v5774_v3 }
 0xa59   :  { %3820 = vmatpush1.bf16.msra.mxu1 %v5777_v33 }
 0xa5a   :  { %3822 = vmatprep.subr.bf16.mxu1 %v5780_v35 }
 0xa5d   :  { %3824 = vmatpush1.bf16.msra.mxu1 %v5783_v55 }
 0xa5e   :  { %3826 = vmatprep.subr.bf16.mxu1 %v5786_v56 }
 0xa61   :  { %3828 = vmatpush1.bf16.msra.mxu1 %v5789_v16 }
 0xa62   :  { %3830 = vmatprep.subr.bf16.mxu1 %v5792_v54 }
 0xa65   :  { %3832 = vmatpush1.bf16.msra.mxu1 %v5795_v50 }
 0xa66   :  { %3834 = vmatprep.subr.bf16.mxu1 %v5798_v5 }
 0xa69   :  { %3836 = vmatpush1.bf16.msra.mxu1 %v5801_v12 }
 0xa6a   :  { %3838 = vmatprep.subr.bf16.mxu1 %v5804_v18 }
 0xa6d   :  { %3840 = vmatpush1.bf16.msra.mxu1 %v5807_v30 }
 0xa6e   :  { %3842 = vmatprep.subr.bf16.mxu1 %v5810_v37 }
 0xa71   :  { %3844 = vmatpush1.bf16.msra.mxu1 %v5813_v45 }
 0xa72   :  { %3846 = vmatprep.subr.bf16.mxu1 %v5816_v51 }
 0xa75   :  { %3848 = vmatpush1.bf16.msra.mxu1 %v5819_v9 }
 0xa76   :  { %3850 = vmatprep.subr.bf16.mxu1 %v5822_v15 }
 0xa79   :  { %3852 = vmatpush1.bf16.msra.mxu1 %v5825_v34 }
 0xa7a   :  { %3854 = vmatprep.subr.bf16.mxu1 %v5831_v42 }
 0xa7d   :  { %3856 = vmatpush1.bf16.msra.mxu1 %v5833_v61 }
 0xa7e   :  { %3858 = vmatprep.subr.bf16.mxu1 %v5837_v10 }
 0xa81   :  { %3860 = vmatpush1.bf16.msra.mxu1 %v5839_v60 }
 0xa82   :  { %3862 = vmatprep.subr.bf16.mxu1 %v5842_v2 }
 0xa85   :  { %3864 = vmatpush1.bf16.msra.mxu1 %v5845_v23 }
 0xa86   :  { %3866 = vmatprep.subr.bf16.mxu1 %v5848_v25 }
 0xa89   :  { %3868 = vmatpush1.bf16.msra.mxu1 %v5851_v43 }
 0xa8a   :  { %3870 = vmatprep.subr.bf16.mxu1 %v5855_v46 }
 0xa8d   :  { %3872 = vmatpush1.bf16.msra.mxu1 %v5857_v20 }
 0xa8e   :  { %3874 = vmatprep.subr.bf16.mxu1 %v5763_v14 }
 0xb23   :  { %v1572_v62 = vpop.f32.mrb[14].mxu1 }
 0xb24   :  { %v4703_v7 = vadd.f32 %v1572_v62, %v5902_v22  ;;  %v1574_v57 = vpop.f32.mrb[15].mxu1  ;;  %v2149_v62 = vld [vmem:[#allocation9 + $0xe8] sm:$0xff] }
 0xb25   :  { %v4704_v59 = vadd.f32 %v1574_v57, %v5905_v39  ;;  %v6148_v57 = vpack.c.bf16 %v2146_v48, %v2144_v47  ;;  %v2175_v47 = vld [vmem:[#allocation9 + $0x1b8] sm:$0xff]  ;;  %v2172_v48 = vld [vmem:[#allocation9 + $0x1a0] sm:$0xff] }
 0xb27   :  { %4820 = vtanh.f32 %v4704_v59 }
 0xb28   :  { %4822 = vtanh.f32 %v4703_v7  ;;  %v2151_v7 = vld [vmem:[#allocation9 + $0xf8] sm:$0xff] }
 0xb29   :  { %v6151_v59 = vpack.c.bf16 %v2151_v7, %v2149_v62  ;;  %v6189_v62 = vpack.c.bf16 %v2175_v47, %v2173_v24  ;;  %v2174_v7 = vld [vmem:[#allocation9 + $0x1b0] sm:$0xff] }
 0xb31   :  { %v4821_v1 = vpop.eup %4820 }
 0xb32   :  { %v4823_v6 = vpop.eup %4822  ;;  %1649 = vmatprep.mubr.f32.mxu1 %v4821_v1  ;;  %2073 = vmatprep.mubr.f32.mxu0 %v4821_v1  ;;  %v2148_v1 = vld [vmem:[#allocation9 + $0xe0] sm:$0xff] }
 0xb33   :  { %1650 = vmatmul.mubr.f32.vlgmr.msra.gmra.mrb[16].mxu1 %v4823_v6  ;;  %2074 = vmatmul.mubr.f32.gmra.mrb[22].mxu0 %v4823_v6  ;;  %v2150_v6 = vld [vmem:[#allocation9 + $0xf0] sm:$0xff] }
 0xb34   :  { %3876 = vmatpush1.bf16.msra.mxu1 %v5765_v26 }
 0xb35   :  { %3878 = vmatprep.subr.bf16.mxu1 %v5767_v27 }
 0xb38   :  { %3880 = vmatpush1.bf16.msra.mxu1 %v5771_v63 }
 0xb39   :  { %3882 = vmatprep.subr.bf16.mxu1 %v5774_v3 }
 0xb3c   :  { %3884 = vmatpush1.bf16.msra.mxu1 %v5777_v33 }
 0xb3d   :  { %3886 = vmatprep.subr.bf16.mxu1 %v5780_v35 }
 0xb40   :  { %3888 = vmatpush1.bf16.msra.mxu1 %v5783_v55 }
 0xb41   :  { %3890 = vmatprep.subr.bf16.mxu1 %v5786_v56 }
 0xb44   :  { %3892 = vmatpush1.bf16.msra.mxu1 %v5789_v16 }
 0xb45   :  { %3894 = vmatprep.subr.bf16.mxu1 %v5792_v54 }
 0xb48   :  { %3896 = vmatpush1.bf16.msra.mxu1 %v5795_v50 }
 0xb49   :  { %3898 = vmatprep.subr.bf16.mxu1 %v5798_v5 }
 0xb4c   :  { %3900 = vmatpush1.bf16.msra.mxu1 %v5801_v12 }
 0xb4d   :  { %3902 = vmatprep.subr.bf16.mxu1 %v5804_v18 }
 0xb50   :  { %3904 = vmatpush1.bf16.msra.mxu1 %v5807_v30 }
 0xb51   :  { %3906 = vmatprep.subr.bf16.mxu1 %v5810_v37 }
 0xb54   :  { %3908 = vmatpush1.bf16.msra.mxu1 %v5813_v45 }
 0xb55   :  { %3910 = vmatprep.subr.bf16.mxu1 %v5816_v51 }
 0xb58   :  { %3912 = vmatpush1.bf16.msra.mxu1 %v5819_v9 }
 0xb59   :  { %3914 = vmatprep.subr.bf16.mxu1 %v5822_v15 }
 0xb5c   :  { %3916 = vmatpush1.bf16.msra.mxu1 %v5825_v34 }
 0xb5d   :  { %3918 = vmatprep.subr.bf16.mxu1 %v5831_v42 }
 0xb60   :  { %3920 = vmatpush1.bf16.msra.mxu1 %v5833_v61 }
 0xb61   :  { %3922 = vmatprep.subr.bf16.mxu1 %v5837_v10 }
 0xb64   :  { %3924 = vmatpush1.bf16.msra.mxu1 %v5839_v60 }
 0xb65   :  { %3926 = vmatprep.subr.bf16.mxu1 %v5842_v2 }
 0xb68   :  { %3928 = vmatpush1.bf16.msra.mxu1 %v5845_v23 }
 0xb69   :  { %3930 = vmatprep.subr.bf16.mxu1 %v5848_v25 }
 0xb6c   :  { %3932 = vmatpush1.bf16.msra.mxu1 %v5851_v43 }
 0xb6d   :  { %3934 = vmatprep.subr.bf16.mxu1 %v5855_v46 }
 0xb70   :  { %3936 = vmatpush1.bf16.msra.mxu1 %v5857_v20 }
 0xb71   :  { %3938 = vmatprep.subr.bf16.mxu1 %v5763_v14 }
 0xc06   :  { %v1651_v58 = vpop.f32.mrb[16].mxu1 }
 0xc07   :  { %v4705_v11 = vadd.f32 %v1651_v58, %v5902_v22  ;;  %v1653_v19 = vpop.f32.mrb[17].mxu1  ;;  %v2153_v58 = vld [vmem:[#allocation9 + $0x108] sm:$0xff] }
 0xc08   :  { %v4706_v40 = vadd.f32 %v1653_v19, %v5905_v39  ;;  %v6154_v19 = vpack.c.bf16 %v2150_v6, %v2148_v1  ;;  %v2177_v1 = vld [vmem:[#allocation9 + $0x1c8] sm:$0xff]  ;;  %v2179_v6 = vld [vmem:[#allocation9 + $0x1d8] sm:$0xff] }
 0xc0a   :  { %4824 = vtanh.f32 %v4706_v40 }
 0xc0b   :  { %4826 = vtanh.f32 %v4705_v11  ;;  %v2155_v11 = vld [vmem:[#allocation9 + $0x118] sm:$0xff] }
 0xc0c   :  { %v6157_v40 = vpack.c.bf16 %v2155_v11, %v2153_v58  ;;  %v6192_v58 = vpack.c.bf16 %v2174_v7, %v2172_v48  ;;  %v6195_v11 = vpack.c.bf16 %v2179_v6, %v2177_v1 }
 0xc14   :  { %v4825_v44 = vpop.eup %4824 }
 0xc15   :  { %v4827_v32 = vpop.eup %4826  ;;  %1728 = vmatprep.mubr.f32.mxu1 %v4825_v44  ;;  %2079 = vmatprep.mubr.f32.mxu0 %v4825_v44  ;;  %v2152_v44 = vld [vmem:[#allocation9 + $0x100] sm:$0xff] }
 0xc16   :  { %1729 = vmatmul.mubr.f32.vlgmr.msra.gmra.mrb[18].mxu1 %v4827_v32  ;;  %2080 = vmatmul.mubr.f32.gmra.mrb[24].mxu0 %v4827_v32  ;;  %v2154_v32 = vld [vmem:[#allocation9 + $0x110] sm:$0xff] }
 0xc17   :  { %3940 = vmatpush1.bf16.msra.mxu1 %v5765_v26 }
 0xc18   :  { %3942 = vmatprep.subr.bf16.mxu1 %v5767_v27 }
 0xc1b   :  { %3944 = vmatpush1.bf16.msra.mxu1 %v5771_v63 }
 0xc1c   :  { %3946 = vmatprep.subr.bf16.mxu1 %v5774_v3 }
 0xc1f   :  { %3948 = vmatpush1.bf16.msra.mxu1 %v5777_v33 }
 0xc20   :  { %3950 = vmatprep.subr.bf16.mxu1 %v5780_v35 }
 0xc23   :  { %3952 = vmatpush1.bf16.msra.mxu1 %v5783_v55 }
 0xc24   :  { %3954 = vmatprep.subr.bf16.mxu1 %v5786_v56 }
 0xc27   :  { %3956 = vmatpush1.bf16.msra.mxu1 %v5789_v16 }
 0xc28   :  { %3958 = vmatprep.subr.bf16.mxu1 %v5792_v54 }
 0xc2b   :  { %3960 = vmatpush1.bf16.msra.mxu1 %v5795_v50 }
 0xc2c   :  { %3962 = vmatprep.subr.bf16.mxu1 %v5798_v5 }
 0xc2f   :  { %3964 = vmatpush1.bf16.msra.mxu1 %v5801_v12 }
 0xc30   :  { %3966 = vmatprep.subr.bf16.mxu1 %v5804_v18 }
 0xc33   :  { %3968 = vmatpush1.bf16.msra.mxu1 %v5807_v30 }
 0xc34   :  { %3970 = vmatprep.subr.bf16.mxu1 %v5810_v37 }
 0xc37   :  { %3972 = vmatpush1.bf16.msra.mxu1 %v5813_v45 }
 0xc38   :  { %3974 = vmatprep.subr.bf16.mxu1 %v5816_v51 }
 0xc3b   :  { %3976 = vmatpush1.bf16.msra.mxu1 %v5819_v9 }
 0xc3c   :  { %3978 = vmatprep.subr.bf16.mxu1 %v5822_v15 }
 0xc3f   :  { %3980 = vmatpush1.bf16.msra.mxu1 %v5825_v34 }
 0xc40   :  { %3982 = vmatprep.subr.bf16.mxu1 %v5831_v42 }
 0xc43   :  { %3984 = vmatpush1.bf16.msra.mxu1 %v5833_v61 }
 0xc44   :  { %3986 = vmatprep.subr.bf16.mxu1 %v5837_v10 }
 0xc47   :  { %3988 = vmatpush1.bf16.msra.mxu1 %v5839_v60 }
 0xc48   :  { %3990 = vmatprep.subr.bf16.mxu1 %v5842_v2 }
 0xc4b   :  { %3992 = vmatpush1.bf16.msra.mxu1 %v5845_v23 }
 0xc4c   :  { %3994 = vmatprep.subr.bf16.mxu1 %v5848_v25 }
 0xc4f   :  { %3996 = vmatpush1.bf16.msra.mxu1 %v5851_v43 }
 0xc50   :  { %3998 = vmatprep.subr.bf16.mxu1 %v5855_v46 }
 0xc53   :  { %4000 = vmatpush1.bf16.msra.mxu1 %v5857_v20 }
 0xc54   :  { %4002 = vmatprep.subr.bf16.mxu1 %v5763_v14  ;;  %v2121_v14 = vld [vmem:[#allocation9 + $0x8] sm:$0xff] }
 0xce9   :  { %v1730_v36 = vpop.f32.mrb[18].mxu1 }
 0xcea   :  { %v4707_v52 = vadd.f32 %v1730_v36, %v5902_v22  ;;  %v1732_v4 = vpop.f32.mrb[19].mxu1  ;;  %v2157_v36 = vld [vmem:[#allocation9 + $0x128] sm:$0xff] }
 0xceb   :  { %v4708_v8 = vadd.f32 %v1732_v4, %v5905_v39  ;;  %v6160_v4 = vpack.c.bf16 %v2154_v32, %v2152_v44  ;;  %v2176_v44 = vld [vmem:[#allocation9 + $0x1c0] sm:$0xff]  ;;  %v2178_v32 = vld [vmem:[#allocation9 + $0x1d0] sm:$0xff] }
 0xced   :  { %4828 = vtanh.f32 %v4708_v8 }
 0xcee   :  { %4830 = vtanh.f32 %v4707_v52  ;;  %v2159_v52 = vld [vmem:[#allocation9 + $0x138] sm:$0xff] }
 0xcef   :  { %v6163_v8 = vpack.c.bf16 %v2159_v52, %v2157_v36  ;;  %v6198_v36 = vpack.c.bf16 %v2178_v32, %v2176_v44  ;;  %v2181_v52 = vld [vmem:[#allocation9 + $0x1e8] sm:$0xff] }
 0xcf7   :  { %v4829_v21 = vpop.eup %4828 }
 0xcf8   :  { %v4831_v38 = vpop.eup %4830  ;;  %1807 = vmatprep.mubr.f32.mxu1 %v4829_v21  ;;  %2085 = vmatprep.mubr.f32.mxu0 %v4829_v21  ;;  %v2156_v21 = vld [vmem:[#allocation9 + $0x120] sm:$0xff] }
 0xcf9   :  { %1808 = vmatmul.mubr.f32.vlgmr.msra.gmra.mrb[20].mxu1 %v4831_v38  ;;  %2086 = vmatmul.mubr.f32.gmra.mrb[26].mxu0 %v4831_v38  ;;  %v2158_v38 = vld [vmem:[#allocation9 + $0x130] sm:$0xff] }
 0xcfa   :  { %4004 = vmatpush1.bf16.msra.mxu1 %v5765_v26  ;;  %v2123_v26 = vld [vmem:[#allocation9 + $0x18] sm:$0xff] }
 0xcfb   :  { %4006 = vmatprep.subr.bf16.mxu1 %v5767_v27  ;;  %v2120_v27 = vld [vmem:[#allocation9] sm:$0xff] }
 0xcfe   :  { %4008 = vmatpush1.bf16.msra.mxu1 %v5771_v63  ;;  %v6110_v63 = vpack.c.bf16 %v2123_v26, %v2121_v14  ;;  %v2161_v14 = vld [vmem:[#allocation9 + $0x148] sm:$0xff]  ;;  %v2163_v26 = vld [vmem:[#allocation9 + $0x158] sm:$0xff] }
 0xcff   :  { %4010 = vmatprep.subr.bf16.mxu1 %v5774_v3  ;;  %v2122_v3 = vld [vmem:[#allocation9 + $0x10] sm:$0xff] }
 0xd00   :  { %4130 = vmatprep.subr.bf16.mxu0 %v6110_v63 }
 0xd02   :  { %4012 = vmatpush1.bf16.msra.mxu1 %v5777_v33  ;;  %v2125_v33 = vld [vmem:[#allocation9 + $0x28] sm:$0xff] }
 0xd03   :  { %4014 = vmatprep.subr.bf16.mxu1 %v5780_v35  ;;  %v2127_v35 = vld [vmem:[#allocation9 + $0x38] sm:$0xff] }
 0xd06   :  { %4016 = vmatpush1.bf16.msra.mxu1 %v5783_v55  ;;  %v6112_v55 = vpack.c.bf16 %v2122_v3, %v2120_v27  ;;  %v6166_v27 = vpack.c.bf16 %v2158_v38, %v2156_v21  ;;  %v6169_v3 = vpack.c.bf16 %v2163_v26, %v2161_v14  ;;  %v2183_v21 = vld [vmem:[#allocation9 + $0x1f8] sm:$0xff]  ;;  %v2180_v14 = vld [vmem:[#allocation9 + $0x1e0] sm:$0xff]  ;;  %v2182_v26 = vld [vmem:[#allocation9 + $0x1f0] sm:$0xff] }
 0xd07   :  { %4018 = vmatprep.subr.bf16.mxu1 %v5786_v56  ;;  %v6114_v56 = vpack.c.bf16 %v2127_v35, %v2125_v33  ;;  %v2160_v33 = vld [vmem:[#allocation9 + $0x140] sm:$0xff]  ;;  %v2162_v35 = vld [vmem:[#allocation9 + $0x150] sm:$0xff]  ;;  %v6202_v38 = vpack.c.bf16 %v2183_v21, %v2181_v52 }
 0xd08   :  { %4132 = vmatpush1.bf16.msra.mxu0 %v6112_v55 }
 0xd09   :  { %4134 = vmatprep.subr.bf16.mxu0 %v6114_v56 }
 0xd0a   :  { %4020 = vmatpush1.bf16.msra.mxu1 %v5789_v16  ;;  %v2124_v16 = vld [vmem:[#allocation9 + $0x20] sm:$0xff] }
 0xd0b   :  { %4022 = vmatprep.subr.bf16.mxu1 %v5792_v54  ;;  %v2126_v54 = vld [vmem:[#allocation9 + $0x30] sm:$0xff] }
 0xd0e   :  { %4024 = vmatpush1.bf16.msra.mxu1 %v5795_v50  ;;  %v2129_v50 = vld [vmem:[#allocation9 + $0x48] sm:$0xff] }
 0xd0f   :  { %4026 = vmatprep.subr.bf16.mxu1 %v5798_v5  ;;  %v2131_v5 = vld [vmem:[#allocation9 + $0x58] sm:$0xff] }
 0xd12   :  { %4028 = vmatpush1.bf16.msra.mxu1 %v5801_v12  ;;  %v6118_v12 = vpack.c.bf16 %v2126_v54, %v2124_v16  ;;  %v6172_v16 = vpack.c.bf16 %v2162_v35, %v2160_v33  ;;  %v6204_v33 = vpack.c.bf16 %v2182_v26, %v2180_v14 }
 0xd13   :  { %4030 = vmatprep.subr.bf16.mxu1 %v5804_v18  ;;  %v6121_v18 = vpack.c.bf16 %v2131_v5, %v2129_v50 }
 0xd14   :  { %4136 = vmatpush1.bf16.msra.mxu0 %v6118_v12 }
 0xd15   :  { %4138 = vmatprep.subr.bf16.mxu0 %v6121_v18 }
 0xd16   :  { %4032 = vmatpush1.bf16.msra.mxu1 %v5807_v30  ;;  %v2128_v30 = vld [vmem:[#allocation9 + $0x40] sm:$0xff] }
 0xd17   :  { %4034 = vmatprep.subr.bf16.mxu1 %v5810_v37  ;;  %v2130_v37 = vld [vmem:[#allocation9 + $0x50] sm:$0xff] }
 0xd1a   :  { %4036 = vmatpush1.bf16.msra.mxu1 %v5813_v45  ;;  %v2133_v45 = vld [vmem:[#allocation9 + $0x68] sm:$0xff] }
 0xd1b   :  { %4038 = vmatprep.subr.bf16.mxu1 %v5816_v51  ;;  %v2135_v51 = vld [vmem:[#allocation9 + $0x78] sm:$0xff] }
 0xd1e   :  { %4040 = vmatpush1.bf16.msra.mxu1 %v5819_v9  ;;  %v6124_v9 = vpack.c.bf16 %v2130_v37, %v2128_v30 }
 0xd1f   :  { %4042 = vmatprep.subr.bf16.mxu1 %v5822_v15  ;;  %v6127_v15 = vpack.c.bf16 %v2135_v51, %v2133_v45  ;;  %v2165_v51 = vld [vmem:[#allocation9 + $0x168] sm:$0xff] }
 0xd20   :  { %4140 = vmatpush1.bf16.msra.mxu0 %v6124_v9 }
 0xd21   :  { %4142 = vmatprep.subr.bf16.mxu0 %v6127_v15 }
 0xd22   :  { %4044 = vmatpush1.bf16.msra.mxu1 %v5825_v34  ;;  %v2132_v34 = vld [vmem:[#allocation9 + $0x60] sm:$0xff] }
 0xd23   :  { %4046 = vmatprep.subr.bf16.mxu1 %v5831_v42  ;;  %v2134_v42 = vld [vmem:[#allocation9 + $0x70] sm:$0xff] }
 0xd26   :  { %4048 = vmatpush1.bf16.msra.mxu1 %v5833_v61  ;;  %v2137_v61 = vld [vmem:[#allocation9 + $0x88] sm:$0xff] }
 0xd27   :  { %4050 = vmatprep.subr.bf16.mxu1 %v5837_v10  ;;  %v2139_v10 = vld [vmem:[#allocation9 + $0x98] sm:$0xff] }
 0xd2a   :  { %4052 = vmatpush1.bf16.msra.mxu1 %v5839_v60  ;;  %v6130_v60 = vpack.c.bf16 %v2134_v42, %v2132_v34  ;;  %v2167_v34 = vld [vmem:[#allocation9 + $0x178] sm:$0xff] }
 0xd2b   :  { %4054 = vmatprep.subr.bf16.mxu1 %v5842_v2  ;;  %v6133_v2 = vpack.c.bf16 %v2139_v10, %v2137_v61  ;;  %v6178_v42 = vpack.c.bf16 %v2167_v34, %v2165_v51  ;;  %v2164_v61 = vld [vmem:[#allocation9 + $0x160] sm:$0xff]  ;;  %v2166_v10 = vld [vmem:[#allocation9 + $0x170] sm:$0xff] }
 0xd2c   :  { %4144 = vmatpush1.bf16.msra.mxu0 %v6130_v60 }
 0xd2d   :  { %4146 = vmatprep.subr.bf16.mxu0 %v6133_v2 }
 0xd2e   :  { %4056 = vmatpush1.bf16.msra.mxu1 %v5845_v23  ;;  %v2136_v23 = vld [vmem:[#allocation9 + $0x80] sm:$0xff] }
 0xd2f   :  { %4058 = vmatprep.subr.bf16.mxu1 %v5848_v25  ;;  %v2138_v25 = vld [vmem:[#allocation9 + $0x90] sm:$0xff] }
 0xd32   :  { %4060 = vmatpush1.bf16.msra.mxu1 %v5851_v43  ;;  %v2141_v43 = vld [vmem:[#allocation9 + $0xa8] sm:$0xff] }
 0xd33   :  { %4062 = vmatprep.subr.bf16.mxu1 %v5855_v46  ;;  %v2143_v46 = vld [vmem:[#allocation9 + $0xb8] sm:$0xff] }
 0xd34   :  { %v6139_v49 = vpack.c.bf16 %v2143_v46, %v2141_v43  ;;  %v2171_v43 = vld [vmem:[#allocation9 + $0x198] sm:$0xff] }
 0xd36   :  { %4064 = vmatpush1.bf16.msra.mxu1 %v5857_v20  ;;  %v6136_v20 = vpack.c.bf16 %v2138_v25, %v2136_v23  ;;  %v6180_v23 = vpack.c.bf16 %v2166_v10, %v2164_v61  ;;  %v2169_v25 = vld [vmem:[#allocation9 + $0x188] sm:$0xff] }
 0xd37   :  { %v6184_v46 = vpack.c.bf16 %v2171_v43, %v2169_v25 }
 0xd38   :  { %4148 = vmatpush1.bf16.msra.mxu0 %v6136_v20 }
 0xd39   :  { %4150 = vmatprep.subr.bf16.mxu0 %v6139_v49 }
 0xd3c   :  { %4152 = vmatpush1.bf16.msra.mxu0 %v6142_v28 }
 0xd3d   :  { %4154 = vmatprep.subr.bf16.mxu0 %v6145_v41 }
 0xd40   :  { %4156 = vmatpush1.bf16.msra.mxu0 %v6148_v57 }
 0xd41   :  { %4158 = vmatprep.subr.bf16.mxu0 %v6151_v59 }
 0xd44   :  { %4160 = vmatpush1.bf16.msra.mxu0 %v6154_v19 }
 0xd45   :  { %4162 = vmatprep.subr.bf16.mxu0 %v6157_v40 }
 0xd48   :  { %4164 = vmatpush1.bf16.msra.mxu0 %v6160_v4 }
 0xd49   :  { %4166 = vmatprep.subr.bf16.mxu0 %v6163_v8 }
 0xd4c   :  { %4168 = vmatpush1.bf16.msra.mxu0 %v6166_v27 }
 0xd4d   :  { %4170 = vmatprep.subr.bf16.mxu0 %v6169_v3 }
 0xd50   :  { %4172 = vmatpush1.bf16.msra.mxu0 %v6172_v16 }
 0xd51   :  { %4174 = vmatprep.subr.bf16.mxu0 %v6178_v42 }
 0xd54   :  { %4176 = vmatpush1.bf16.msra.mxu0 %v6180_v23 }
 0xd55   :  { %4178 = vmatprep.subr.bf16.mxu0 %v6184_v46 }
 0xd58   :  { %4180 = vmatpush1.bf16.msra.mxu0 %v6186_v17 }
 0xd59   :  { %4182 = vmatprep.subr.bf16.mxu0 %v6189_v62 }
 0xd5c   :  { %4184 = vmatpush1.bf16.msra.mxu0 %v6192_v58 }
 0xd5d   :  { %4186 = vmatprep.subr.bf16.mxu0 %v6195_v11 }
 0xd60   :  { %4188 = vmatpush1.bf16.msra.mxu0 %v6198_v36 }
 0xd61   :  { %4190 = vmatprep.subr.bf16.mxu0 %v6202_v38 }
 0xd64   :  { %4192 = vmatpush1.bf16.msra.mxu0 %v6204_v33 }
 0xd65   :  { %4194 = vmatprep.subr.bf16.mxu0 %v6110_v63 }
 0xdcc   :  { %v1809_v54 = vpop.f32.mrb[20].mxu1 }
 0xdcd   :  { %v4709_v50 = vadd.f32 %v1809_v54, %v5902_v22  ;;  %v1811_v5 = vpop.f32.mrb[21].mxu1 }
 0xdce   :  { %v4710_v30 = vadd.f32 %v1811_v5, %v5905_v39 }
 0xdd0   :  { %4832 = vtanh.f32 %v4710_v30 }
 0xdd1   :  { %4834 = vtanh.f32 %v4709_v50 }
 0xdda   :  { %v4833_v37 = vpop.eup %4832 }
 0xddb   :  { %v4835_v45 = vpop.eup %4834  ;;  %1886 = vmatprep.mubr.f32.mxu1 %v4833_v37  ;;  %2091 = vmatprep.mubr.f32.mxu0 %v4833_v37 }
 0xddc   :  { %1887 = vmatmul.mubr.f32.vlgmr.msra.gmra.mrb[22].mxu1 %v4835_v45  ;;  %2092 = vmatmul.mubr.f32.gmra.mrb[28].mxu0 %v4835_v45 }
 0xeaf   :  { %v1888_v35 = vpop.f32.mrb[22].mxu1 }
 0xeb0   :  { %v4711_v54 = vadd.f32 %v1888_v35, %v5902_v22  ;;  %v1890_v50 = vpop.f32.mrb[23].mxu1 }
 0xeb1   :  { %v4712_v5 = vadd.f32 %v1890_v50, %v5905_v39 }
 0xeb3   :  { %4836 = vtanh.f32 %v4712_v5 }
 0xeb4   :  { %4838 = vtanh.f32 %v4711_v54 }
 0xebd   :  { %v4837_v30 = vpop.eup %4836 }
 0xebe   :  { %v4839_v37 = vpop.eup %4838  ;;  %2097 = vmatprep.mubr.f32.mxu0 %v4837_v30 }
 0xebf   :  { %2098 = vmatmul.mubr.f32.gmra.mrb[30].mxu0 %v4839_v37 }
 0xec0   :  { %2250 = vmatprep.mubr.f32.mxu0 %v4972_v0 }
 0xec3   :  { %2251 = vmatmul.mubr.f32.vlgmr.msra.gmra.mrb[16].mxu0 %v4972_v0  ;;  %v1979_v0 = vld [vmem:[%s6572_s9] sm:$0x3] }
 0xec4   :  { %4196 = vmatpush1.bf16.msra.mxu0 %v6112_v55  ;;  %v6249_v22 = vrot.slane %v1979_v0, %v5527_v29  ;;  %v6252_v39 = vrot.slane %v1979_v0, %v5532_v31 }
 0xec5   :  { %4198 = vmatprep.subr.bf16.mxu0 %v6114_v56 }
 0xec8   :  { %4200 = vmatpush1.bf16.msra.mxu0 %v6118_v12 }
 0xec9   :  { %4202 = vmatprep.subr.bf16.mxu0 %v6121_v18 }
 0xecc   :  { %4204 = vmatpush1.bf16.msra.mxu0 %v6124_v9 }
 0xecd   :  { %4206 = vmatprep.subr.bf16.mxu0 %v6127_v15 }
 0xed0   :  { %4208 = vmatpush1.bf16.msra.mxu0 %v6130_v60 }
 0xed1   :  { %4210 = vmatprep.subr.bf16.mxu0 %v6133_v2 }
 0xed4   :  { %4212 = vmatpush1.bf16.msra.mxu0 %v6136_v20 }
 0xed5   :  { %4214 = vmatprep.subr.bf16.mxu0 %v6139_v49 }
 0xed8   :  { %4216 = vmatpush1.bf16.msra.mxu0 %v6142_v28 }
 0xed9   :  { %4218 = vmatprep.subr.bf16.mxu0 %v6145_v41 }
 0xedc   :  { %4220 = vmatpush1.bf16.msra.mxu0 %v6148_v57 }
 0xedd   :  { %4222 = vmatprep.subr.bf16.mxu0 %v6151_v59 }
 0xee0   :  { %4224 = vmatpush1.bf16.msra.mxu0 %v6154_v19 }
 0xee1   :  { %4226 = vmatprep.subr.bf16.mxu0 %v6157_v40 }
 0xee4   :  { %4228 = vmatpush1.bf16.msra.mxu0 %v6160_v4 }
 0xee5   :  { %4230 = vmatprep.subr.bf16.mxu0 %v6163_v8 }
 0xee8   :  { %4232 = vmatpush1.bf16.msra.mxu0 %v6166_v27 }
 0xee9   :  { %4234 = vmatprep.subr.bf16.mxu0 %v6169_v3 }
 0xeec   :  { %4236 = vmatpush1.bf16.msra.mxu0 %v6172_v16 }
 0xeed   :  { %4238 = vmatprep.subr.bf16.mxu0 %v6178_v42 }
 0xef0   :  { %4240 = vmatpush1.bf16.msra.mxu0 %v6180_v23 }
 0xef1   :  { %4242 = vmatprep.subr.bf16.mxu0 %v6184_v46 }
 0xef4   :  { %4244 = vmatpush1.bf16.msra.mxu0 %v6186_v17 }
 0xef5   :  { %4246 = vmatprep.subr.bf16.mxu0 %v6189_v62 }
 0xef8   :  { %4248 = vmatpush1.bf16.msra.mxu0 %v6192_v58 }
 0xef9   :  { %4250 = vmatprep.subr.bf16.mxu0 %v6195_v11 }
 0xefc   :  { %4252 = vmatpush1.bf16.msra.mxu0 %v6198_v36 }
 0xefd   :  { %4254 = vmatprep.subr.bf16.mxu0 %v6202_v38 }
 0xf00   :  { %4256 = vmatpush1.bf16.msra.mxu0 %v6204_v33 }
 0xf01   :  { %4258 = vmatprep.subr.bf16.mxu0 %v6110_v63 }
 0xf96   :  { %v2252_v45 = vpop.f32.mrb[16].mxu0 }
 0xf97   :  { %v4713_v51 = vadd.f32 %v2252_v45, %v6249_v22  ;;  %v2254_v34 = vpop.f32.mrb[17].mxu0 }
 0xf98   :  { %v4714_v61 = vadd.f32 %v2254_v34, %v6252_v39 }
 0xf9a   :  { %4840 = vtanh.f32 %v4714_v61 }
 0xf9b   :  { %4842 = vtanh.f32 %v4713_v51 }
 0xfa4   :  { %v4841_v10 = vpop.eup %4840 }
 0xfa5   :  { %v4843_v25 = vpop.eup %4842  ;;  %2327 = vmatprep.mubr.f32.mxu0 %v4841_v10 }
 0xfa6   :  { %2328 = vmatmul.mubr.f32.vlgmr.msra.gmra.mrb[18].mxu0 %v4843_v25 }
 0xfa7   :  { %4260 = vmatpush1.bf16.msra.mxu0 %v6112_v55 }
 0xfa8   :  { %4262 = vmatprep.subr.bf16.mxu0 %v6114_v56 }
 0xfab   :  { %4264 = vmatpush1.bf16.msra.mxu0 %v6118_v12 }
 0xfac   :  { %4266 = vmatprep.subr.bf16.mxu0 %v6121_v18 }
 0xfaf   :  { %4268 = vmatpush1.bf16.msra.mxu0 %v6124_v9 }
 0xfb0   :  { %4270 = vmatprep.subr.bf16.mxu0 %v6127_v15 }
 0xfb3   :  { %4272 = vmatpush1.bf16.msra.mxu0 %v6130_v60 }
 0xfb4   :  { %4274 = vmatprep.subr.bf16.mxu0 %v6133_v2 }
 0xfb7   :  { %4276 = vmatpush1.bf16.msra.mxu0 %v6136_v20 }
 0xfb8   :  { %4278 = vmatprep.subr.bf16.mxu0 %v6139_v49 }
 0xfbb   :  { %4280 = vmatpush1.bf16.msra.mxu0 %v6142_v28 }
 0xfbc   :  { %4282 = vmatprep.subr.bf16.mxu0 %v6145_v41 }
 0xfbf   :  { %4284 = vmatpush1.bf16.msra.mxu0 %v6148_v57 }
 0xfc0   :  { %4286 = vmatprep.subr.bf16.mxu0 %v6151_v59 }
 0xfc3   :  { %4288 = vmatpush1.bf16.msra.mxu0 %v6154_v19 }
 0xfc4   :  { %4290 = vmatprep.subr.bf16.mxu0 %v6157_v40 }
 0xfc7   :  { %4292 = vmatpush1.bf16.msra.mxu0 %v6160_v4 }
 0xfc8   :  { %4294 = vmatprep.subr.bf16.mxu0 %v6163_v8 }
 0xfcb   :  { %4296 = vmatpush1.bf16.msra.mxu0 %v6166_v27 }
 0xfcc   :  { %4298 = vmatprep.subr.bf16.mxu0 %v6169_v3 }
 0xfcf   :  { %4300 = vmatpush1.bf16.msra.mxu0 %v6172_v16 }
 0xfd0   :  { %4302 = vmatprep.subr.bf16.mxu0 %v6178_v42 }
 0xfd3   :  { %4304 = vmatpush1.bf16.msra.mxu0 %v6180_v23 }
 0xfd4   :  { %4306 = vmatprep.subr.bf16.mxu0 %v6184_v46 }
 0xfd7   :  { %4308 = vmatpush1.bf16.msra.mxu0 %v6186_v17 }
 0xfd8   :  { %4310 = vmatprep.subr.bf16.mxu0 %v6189_v62 }
 0xfdb   :  { %4312 = vmatpush1.bf16.msra.mxu0 %v6192_v58 }
 0xfdc   :  { %4314 = vmatprep.subr.bf16.mxu0 %v6195_v11 }
 0xfdf   :  { %4316 = vmatpush1.bf16.msra.mxu0 %v6198_v36 }
 0xfe0   :  { %4318 = vmatprep.subr.bf16.mxu0 %v6202_v38 }
 0xfe3   :  { %4320 = vmatpush1.bf16.msra.mxu0 %v6204_v33 }
 0xfe4   :  { %4322 = vmatprep.subr.bf16.mxu0 %v6110_v63 }
0x1079   :  { %v2329_v29 = vpop.f32.mrb[18].mxu0 }
0x107a   :  { %v4715_v31 = vadd.f32 %v2329_v29, %v6249_v22  ;;  %v2331_v43 = vpop.f32.mrb[19].mxu0 }
0x107b   :  { %v4716_v53 = vadd.f32 %v2331_v43, %v6252_v39  ;;  %v2809_v43 = vld [vmem:[%s6573_s10 + $0x48] sm:$0xff] }
0x107d   :  { %4844 = vtanh.f32 %v4716_v53 }
0x107e   :  { %4846 = vtanh.f32 %v4715_v31  ;;  %v2808_v31 = vld [vmem:[%s6573_s10 + $0x40] sm:$0xff] }
0x107f   :  { %v4659_v53 = vpack.c.bf16 %v2809_v43, %v2808_v31 }
0x1087   :  { %v4845_v13 = vpop.eup %4844 }
0x1088   :  { %v4847_v24 = vpop.eup %4846  ;;  %2404 = vmatprep.mubr.f32.mxu0 %v4845_v13  ;;  %v2826_v13 = vld [vmem:[%s6573_s10 + $0xd0] sm:$0xff] }
0x1089   :  { %2405 = vmatmul.mubr.f32.vlgmr.msra.gmra.mrb[20].mxu0 %v4847_v24  ;;  %v2827_v24 = vld [vmem:[%s6573_s10 + $0xd8] sm:$0xff] }
0x108a   :  { %4324 = vmatpush1.bf16.msra.mxu0 %v6112_v55 }
0x108b   :  { %4326 = vmatprep.subr.bf16.mxu0 %v6114_v56 }
0x108e   :  { %4328 = vmatpush1.bf16.msra.mxu0 %v6118_v12 }
0x108f   :  { %4330 = vmatprep.subr.bf16.mxu0 %v6121_v18 }
0x1092   :  { %4332 = vmatpush1.bf16.msra.mxu0 %v6124_v9 }
0x1093   :  { %4334 = vmatprep.subr.bf16.mxu0 %v6127_v15 }
0x1096   :  { %4336 = vmatpush1.bf16.msra.mxu0 %v6130_v60 }
0x1097   :  { %4338 = vmatprep.subr.bf16.mxu0 %v6133_v2 }
0x109a   :  { %4340 = vmatpush1.bf16.msra.mxu0 %v6136_v20 }
0x109b   :  { %4342 = vmatprep.subr.bf16.mxu0 %v6139_v49 }
0x109e   :  { %4344 = vmatpush1.bf16.msra.mxu0 %v6142_v28 }
0x109f   :  { %4346 = vmatprep.subr.bf16.mxu0 %v6145_v41 }
0x10a2   :  { %4348 = vmatpush1.bf16.msra.mxu0 %v6148_v57 }
0x10a3   :  { %4350 = vmatprep.subr.bf16.mxu0 %v6151_v59 }
0x10a6   :  { %4352 = vmatpush1.bf16.msra.mxu0 %v6154_v19 }
0x10a7   :  { %4354 = vmatprep.subr.bf16.mxu0 %v6157_v40 }
0x10aa   :  { %4356 = vmatpush1.bf16.msra.mxu0 %v6160_v4 }
0x10ab   :  { %4358 = vmatprep.subr.bf16.mxu0 %v6163_v8 }
0x10ae   :  { %4360 = vmatpush1.bf16.msra.mxu0 %v6166_v27 }
0x10af   :  { %4362 = vmatprep.subr.bf16.mxu0 %v6169_v3 }
0x10b2   :  { %4364 = vmatpush1.bf16.msra.mxu0 %v6172_v16 }
0x10b3   :  { %4366 = vmatprep.subr.bf16.mxu0 %v6178_v42 }
0x10b6   :  { %4368 = vmatpush1.bf16.msra.mxu0 %v6180_v23 }
0x10b7   :  { %4370 = vmatprep.subr.bf16.mxu0 %v6184_v46 }
0x10ba   :  { %4372 = vmatpush1.bf16.msra.mxu0 %v6186_v17 }
0x10bb   :  { %4374 = vmatprep.subr.bf16.mxu0 %v6189_v62 }
0x10be   :  { %4376 = vmatpush1.bf16.msra.mxu0 %v6192_v58 }
0x10bf   :  { %4378 = vmatprep.subr.bf16.mxu0 %v6195_v11 }
0x10c2   :  { %4380 = vmatpush1.bf16.msra.mxu0 %v6198_v36 }
0x10c3   :  { %4382 = vmatprep.subr.bf16.mxu0 %v6202_v38 }
0x10c6   :  { %4384 = vmatpush1.bf16.msra.mxu0 %v6204_v33 }
0x10c7   :  { %4386 = vmatprep.subr.bf16.mxu0 %v6110_v63 }
0x115c   :  { %v2406_v47 = vpop.f32.mrb[20].mxu0 }
0x115d   :  { %v4717_v48 = vadd.f32 %v2406_v47, %v6249_v22  ;;  %v2408_v7 = vpop.f32.mrb[21].mxu0  ;;  %v4661_v47 = vpack.c.bf16 %v2827_v24, %v2826_v13 }
0x115e   :  { %v4718_v1 = vadd.f32 %v2408_v7, %v6252_v39  ;;  %v2811_v7 = vld [vmem:[%s6573_s10 + $0x58] sm:$0xff] }
0x1160   :  { %4848 = vtanh.f32 %v4718_v1 }
0x1161   :  { %4850 = vtanh.f32 %v4717_v48  ;;  %v2810_v48 = vld [vmem:[%s6573_s10 + $0x50] sm:$0xff] }
0x1162   :  { %v4663_v1 = vpack.c.bf16 %v2811_v7, %v2810_v48 }
0x116a   :  { %v4849_v6 = vpop.eup %4848 }
0x116b   :  { %v4851_v44 = vpop.eup %4850  ;;  %2481 = vmatprep.mubr.f32.mxu0 %v4849_v6  ;;  %v2828_v6 = vld [vmem:[%s6573_s10 + $0xe0] sm:$0xff] }
0x116c   :  { %2482 = vmatmul.mubr.f32.vlgmr.msra.gmra.mrb[22].mxu0 %v4851_v44  ;;  %v2829_v44 = vld [vmem:[%s6573_s10 + $0xe8] sm:$0xff] }
0x116d   :  { %4388 = vmatpush1.bf16.msra.mxu0 %v6112_v55 }
0x116e   :  { %4390 = vmatprep.subr.bf16.mxu0 %v6114_v56 }
0x1171   :  { %4392 = vmatpush1.bf16.msra.mxu0 %v6118_v12 }
0x1172   :  { %4394 = vmatprep.subr.bf16.mxu0 %v6121_v18 }
0x1175   :  { %4396 = vmatpush1.bf16.msra.mxu0 %v6124_v9 }
0x1176   :  { %4398 = vmatprep.subr.bf16.mxu0 %v6127_v15 }
0x1179   :  { %4400 = vmatpush1.bf16.msra.mxu0 %v6130_v60 }
0x117a   :  { %4402 = vmatprep.subr.bf16.mxu0 %v6133_v2 }
0x117d   :  { %4404 = vmatpush1.bf16.msra.mxu0 %v6136_v20 }
0x117e   :  { %4406 = vmatprep.subr.bf16.mxu0 %v6139_v49 }
0x1181   :  { %4408 = vmatpush1.bf16.msra.mxu0 %v6142_v28 }
0x1182   :  { %4410 = vmatprep.subr.bf16.mxu0 %v6145_v41 }
0x1185   :  { %4412 = vmatpush1.bf16.msra.mxu0 %v6148_v57 }
0x1186   :  { %4414 = vmatprep.subr.bf16.mxu0 %v6151_v59 }
0x1189   :  { %4416 = vmatpush1.bf16.msra.mxu0 %v6154_v19 }
0x118a   :  { %4418 = vmatprep.subr.bf16.mxu0 %v6157_v40 }
0x118d   :  { %4420 = vmatpush1.bf16.msra.mxu0 %v6160_v4 }
0x118e   :  { %4422 = vmatprep.subr.bf16.mxu0 %v6163_v8 }
0x1191   :  { %4424 = vmatpush1.bf16.msra.mxu0 %v6166_v27 }
0x1192   :  { %4426 = vmatprep.subr.bf16.mxu0 %v6169_v3 }
0x1195   :  { %4428 = vmatpush1.bf16.msra.mxu0 %v6172_v16 }
0x1196   :  { %4430 = vmatprep.subr.bf16.mxu0 %v6178_v42 }
0x1199   :  { %4432 = vmatpush1.bf16.msra.mxu0 %v6180_v23 }
0x119a   :  { %4434 = vmatprep.subr.bf16.mxu0 %v6184_v46 }
0x119d   :  { %4436 = vmatpush1.bf16.msra.mxu0 %v6186_v17 }
0x119e   :  { %4438 = vmatprep.subr.bf16.mxu0 %v6189_v62 }
0x11a1   :  { %4440 = vmatpush1.bf16.msra.mxu0 %v6192_v58 }
0x11a2   :  { %4442 = vmatprep.subr.bf16.mxu0 %v6195_v11 }
0x11a5   :  { %4444 = vmatpush1.bf16.msra.mxu0 %v6198_v36 }
0x11a6   :  { %4446 = vmatprep.subr.bf16.mxu0 %v6202_v38 }
0x11a9   :  { %4448 = vmatpush1.bf16.msra.mxu0 %v6204_v33 }
0x11aa   :  { %4450 = vmatprep.subr.bf16.mxu0 %v6110_v63 }
0x123f   :  { %v2483_v32 = vpop.f32.mrb[22].mxu0 }
0x1240   :  { %v4719_v52 = vadd.f32 %v2483_v32, %v6249_v22  ;;  %v2485_v21 = vpop.f32.mrb[23].mxu0  ;;  %v2812_v32 = vld [vmem:[%s6573_s10 + $0x60] sm:$0xff] }
0x1241   :  { %v4720_v14 = vadd.f32 %v2485_v21, %v6252_v39  ;;  %v2813_v21 = vld [vmem:[%s6573_s10 + $0x68] sm:$0xff] }
0x1243   :  { %4852 = vtanh.f32 %v4720_v14  ;;  %v2830_v14 = vld [vmem:[%s6573_s10 + $0xf0] sm:$0xff] }
0x1244   :  { %4854 = vtanh.f32 %v4719_v52  ;;  %v4665_v52 = vpack.c.bf16 %v2829_v44, %v2828_v6 }
0x124d   :  { %v4853_v26 = vpop.eup %4852 }
0x124e   :  { %v4855_v35 = vpop.eup %4854  ;;  %2558 = vmatprep.mubr.f32.mxu0 %v4853_v26  ;;  %v2831_v26 = vld [vmem:[%s6573_s10 + $0xf8] sm:$0xff] }
0x124f   :  { %2559 = vmatmul.mubr.f32.vlgmr.msra.gmra.mrb[24].mxu0 %v4855_v35  ;;  %v4667_v35 = vpack.c.bf16 %v2813_v21, %v2812_v32 }
0x1250   :  { %4452 = vmatpush1.bf16.msra.mxu0 %v6112_v55 }
0x1251   :  { %4454 = vmatprep.subr.bf16.mxu0 %v6114_v56 }
0x1254   :  { %4456 = vmatpush1.bf16.msra.mxu0 %v6118_v12 }
0x1255   :  { %4458 = vmatprep.subr.bf16.mxu0 %v6121_v18 }
0x1258   :  { %4460 = vmatpush1.bf16.msra.mxu0 %v6124_v9 }
0x1259   :  { %4462 = vmatprep.subr.bf16.mxu0 %v6127_v15 }
0x125c   :  { %4464 = vmatpush1.bf16.msra.mxu0 %v6130_v60 }
0x125d   :  { %4466 = vmatprep.subr.bf16.mxu0 %v6133_v2 }
0x1260   :  { %4468 = vmatpush1.bf16.msra.mxu0 %v6136_v20 }
0x1261   :  { %4470 = vmatprep.subr.bf16.mxu0 %v6139_v49 }
0x1264   :  { %4472 = vmatpush1.bf16.msra.mxu0 %v6142_v28 }
0x1265   :  { %4474 = vmatprep.subr.bf16.mxu0 %v6145_v41 }
0x1268   :  { %4476 = vmatpush1.bf16.msra.mxu0 %v6148_v57 }
0x1269   :  { %4478 = vmatprep.subr.bf16.mxu0 %v6151_v59 }
0x126c   :  { %4480 = vmatpush1.bf16.msra.mxu0 %v6154_v19 }
0x126d   :  { %4482 = vmatprep.subr.bf16.mxu0 %v6157_v40 }
0x1270   :  { %4484 = vmatpush1.bf16.msra.mxu0 %v6160_v4 }
0x1271   :  { %4486 = vmatprep.subr.bf16.mxu0 %v6163_v8 }
0x1274   :  { %4488 = vmatpush1.bf16.msra.mxu0 %v6166_v27 }
0x1275   :  { %4490 = vmatprep.subr.bf16.mxu0 %v6169_v3 }
0x1278   :  { %4492 = vmatpush1.bf16.msra.mxu0 %v6172_v16 }
0x1279   :  { %4494 = vmatprep.subr.bf16.mxu0 %v6178_v42 }
0x127c   :  { %4496 = vmatpush1.bf16.msra.mxu0 %v6180_v23 }
0x127d   :  { %4498 = vmatprep.subr.bf16.mxu0 %v6184_v46 }
0x1280   :  { %4500 = vmatpush1.bf16.msra.mxu0 %v6186_v17 }
0x1281   :  { %4502 = vmatprep.subr.bf16.mxu0 %v6189_v62 }
0x1284   :  { %4504 = vmatpush1.bf16.msra.mxu0 %v6192_v58 }
0x1285   :  { %4506 = vmatprep.subr.bf16.mxu0 %v6195_v11 }
0x1288   :  { %4508 = vmatpush1.bf16.msra.mxu0 %v6198_v36 }
0x1289   :  { %4510 = vmatprep.subr.bf16.mxu0 %v6202_v38 }
0x128c   :  { %4512 = vmatpush1.bf16.msra.mxu0 %v6204_v33 }
0x128d   :  { %4514 = vmatprep.subr.bf16.mxu0 %v6110_v63 }
0x1322   :  { %v2560_v54 = vpop.f32.mrb[24].mxu0 }
0x1323   :  { %v4721_v50 = vadd.f32 %v2560_v54, %v6249_v22  ;;  %v2562_v5 = vpop.f32.mrb[25].mxu0  ;;  %v4669_v54 = vpack.c.bf16 %v2831_v26, %v2830_v14 }
0x1324   :  { %v4722_v30 = vadd.f32 %v2562_v5, %v6252_v39  ;;  %v2815_v5 = vld [vmem:[%s6573_s10 + $0x78] sm:$0xff] }
0x1326   :  { %4856 = vtanh.f32 %v4722_v30 }
0x1327   :  { %4858 = vtanh.f32 %v4721_v50  ;;  %v2814_v50 = vld [vmem:[%s6573_s10 + $0x70] sm:$0xff] }
0x1328   :  { %v4671_v30 = vpack.c.bf16 %v2815_v5, %v2814_v50 }
0x1330   :  { %v4857_v37 = vpop.eup %4856 }
0x1331   :  { %v4859_v0 = vpop.eup %4858  ;;  %2635 = vmatprep.mubr.f32.mxu0 %v4857_v37 }
0x1332   :  { %2636 = vmatmul.mubr.f32.vlgmr.msra.gmra.mrb[26].mxu0 %v4859_v0 }
0x1333   :  { %4516 = vmatpush1.bf16.msra.mxu0 %v6112_v55 }
0x1334   :  { %4518 = vmatprep.subr.bf16.mxu0 %v6114_v56 }
0x1337   :  { %4520 = vmatpush1.bf16.msra.mxu0 %v6118_v12 }
0x1338   :  { %4522 = vmatprep.subr.bf16.mxu0 %v6121_v18 }
0x133b   :  { %4524 = vmatpush1.bf16.msra.mxu0 %v6124_v9 }
0x133c   :  { %4526 = vmatprep.subr.bf16.mxu0 %v6127_v15 }
0x133f   :  { %4528 = vmatpush1.bf16.msra.mxu0 %v6130_v60 }
0x1340   :  { %4530 = vmatprep.subr.bf16.mxu0 %v6133_v2 }
0x1343   :  { %4532 = vmatpush1.bf16.msra.mxu0 %v6136_v20 }
0x1344   :  { %4534 = vmatprep.subr.bf16.mxu0 %v6139_v49 }
0x1347   :  { %4536 = vmatpush1.bf16.msra.mxu0 %v6142_v28 }
0x1348   :  { %4538 = vmatprep.subr.bf16.mxu0 %v6145_v41 }
0x134b   :  { %4540 = vmatpush1.bf16.msra.mxu0 %v6148_v57 }
0x134c   :  { %4542 = vmatprep.subr.bf16.mxu0 %v6151_v59 }
0x134f   :  { %4544 = vmatpush1.bf16.msra.mxu0 %v6154_v19 }
0x1350   :  { %4546 = vmatprep.subr.bf16.mxu0 %v6157_v40 }
0x1353   :  { %4548 = vmatpush1.bf16.msra.mxu0 %v6160_v4 }
0x1354   :  { %4550 = vmatprep.subr.bf16.mxu0 %v6163_v8 }
0x1357   :  { %4552 = vmatpush1.bf16.msra.mxu0 %v6166_v27 }
0x1358   :  { %4554 = vmatprep.subr.bf16.mxu0 %v6169_v3 }
0x135b   :  { %4556 = vmatpush1.bf16.msra.mxu0 %v6172_v16 }
0x135c   :  { %4558 = vmatprep.subr.bf16.mxu0 %v6178_v42 }
0x135f   :  { %4560 = vmatpush1.bf16.msra.mxu0 %v6180_v23 }
0x1360   :  { %4562 = vmatprep.subr.bf16.mxu0 %v6184_v46 }
0x1363   :  { %4564 = vmatpush1.bf16.msra.mxu0 %v6186_v17 }
0x1364   :  { %4566 = vmatprep.subr.bf16.mxu0 %v6189_v62 }
0x1367   :  { %4568 = vmatpush1.bf16.msra.mxu0 %v6192_v58 }
0x1368   :  { %4570 = vmatprep.subr.bf16.mxu0 %v6195_v11 }
0x136b   :  { %4572 = vmatpush1.bf16.msra.mxu0 %v6198_v36 }
0x136c   :  { %4574 = vmatprep.subr.bf16.mxu0 %v6202_v38 }
0x136f   :  { %4576 = vmatpush1.bf16.msra.mxu0 %v6204_v33 }
0x1370   :  { %4578 = vmatprep.subr.bf16.mxu0 %v6110_v63  ;;  %v2816_v63 = vld [vmem:[%s6573_s10 + $0x80] sm:$0xff] }
0x1405   :  { %v2637_v45 = vpop.f32.mrb[26].mxu0 }
0x1406   :  { %v4723_v51 = vadd.f32 %v2637_v45, %v6249_v22  ;;  %v2639_v34 = vpop.f32.mrb[27].mxu0 }
0x1407   :  { %v4724_v61 = vadd.f32 %v2639_v34, %v6252_v39 }
0x1409   :  { %4860 = vtanh.f32 %v4724_v61 }
0x140a   :  { %4862 = vtanh.f32 %v4723_v51 }
0x1413   :  { %v4861_v10 = vpop.eup %4860 }
0x1414   :  { %v4863_v25 = vpop.eup %4862  ;;  %2712 = vmatprep.mubr.f32.mxu0 %v4861_v10 }
0x1415   :  { %2713 = vmatmul.mubr.f32.vlgmr.msra.gmra.mrb[28].mxu0 %v4863_v25  ;;  %v2925_v25 = vld [vmem:[%s6574_s11] ss:$0 sm:$0xff] }
0x1416   :  { %4580 = vmatpush1.bf16.msra.mxu0 %v6112_v55  ;;  %v2817_v55 = vld [vmem:[%s6573_s10 + $0x88] sm:$0xff] }
0x1417   :  { %4582 = vmatprep.subr.bf16.mxu0 %v6114_v56  ;;  %v2800_v56 = vld [vmem:[%s6573_s10] sm:$0xff] }
0x141a   :  { %4584 = vmatpush1.bf16.msra.mxu0 %v6118_v12  ;;  %v4641_v12 = vpack.c.bf16 %v2817_v55, %v2816_v63 }
0x141b   :  { %4586 = vmatprep.subr.bf16.mxu0 %v6121_v18  ;;  %v2801_v18 = vld [vmem:[%s6573_s10 + $0x8] sm:$0xff] }
0x141c   :  { %4642 = vmatprep.subr.bf16.mxu1 %v4641_v12 }
0x141e   :  { %4588 = vmatpush1.bf16.msra.mxu0 %v6124_v9  ;;  %v2818_v9 = vld [vmem:[%s6573_s10 + $0x90] sm:$0xff] }
0x141f   :  { %4590 = vmatprep.subr.bf16.mxu0 %v6127_v15  ;;  %v2819_v15 = vld [vmem:[%s6573_s10 + $0x98] sm:$0xff] }
0x1422   :  { %4592 = vmatpush1.bf16.msra.mxu0 %v6130_v60  ;;  %v4643_v60 = vpack.c.bf16 %v2801_v18, %v2800_v56 }
0x1423   :  { %4594 = vmatprep.subr.bf16.mxu0 %v6133_v2  ;;  %v4645_v2 = vpack.c.bf16 %v2819_v15, %v2818_v9 }
0x1424   :  { %4644 = vmatpush3.bf16.msra.mxu1 %v4643_v60 }
0x1425   :  { %4646 = vmatprep.subr.bf16.mxu1 %v4645_v2 }
0x1426   :  { %4596 = vmatpush1.bf16.msra.mxu0 %v6136_v20  ;;  %v2802_v20 = vld [vmem:[%s6573_s10 + $0x10] sm:$0xff] }
0x1427   :  { %4598 = vmatprep.subr.bf16.mxu0 %v6139_v49  ;;  %v2803_v49 = vld [vmem:[%s6573_s10 + $0x18] sm:$0xff] }
0x142a   :  { %4600 = vmatpush1.bf16.msra.mxu0 %v6142_v28  ;;  %v2820_v28 = vld [vmem:[%s6573_s10 + $0xa0] sm:$0xff] }
0x142b   :  { %4602 = vmatprep.subr.bf16.mxu0 %v6145_v41  ;;  %v2821_v41 = vld [vmem:[%s6573_s10 + $0xa8] sm:$0xff] }
0x142e   :  { %4604 = vmatpush1.bf16.msra.mxu0 %v6148_v57  ;;  %v4647_v57 = vpack.c.bf16 %v2803_v49, %v2802_v20 }
0x142f   :  { %4606 = vmatprep.subr.bf16.mxu0 %v6151_v59  ;;  %v4649_v59 = vpack.c.bf16 %v2821_v41, %v2820_v28 }
0x1430   :  { %4648 = vmatpush3.bf16.msra.mxu1 %v4647_v57 }
0x1431   :  { %4650 = vmatprep.subr.bf16.mxu1 %v4649_v59 }
0x1432   :  { %4608 = vmatpush1.bf16.msra.mxu0 %v6154_v19  ;;  %v2804_v19 = vld [vmem:[%s6573_s10 + $0x20] sm:$0xff] }
0x1433   :  { %4610 = vmatprep.subr.bf16.mxu0 %v6157_v40  ;;  %v2805_v40 = vld [vmem:[%s6573_s10 + $0x28] sm:$0xff] }
0x1436   :  { %4612 = vmatpush1.bf16.msra.mxu0 %v6160_v4  ;;  %v2822_v4 = vld [vmem:[%s6573_s10 + $0xb0] sm:$0xff] }
0x1437   :  { %4614 = vmatprep.subr.bf16.mxu0 %v6163_v8  ;;  %v2823_v8 = vld [vmem:[%s6573_s10 + $0xb8] sm:$0xff] }
0x143a   :  { %4616 = vmatpush1.bf16.msra.mxu0 %v6166_v27  ;;  %v4651_v27 = vpack.c.bf16 %v2805_v40, %v2804_v19 }
0x143b   :  { %4618 = vmatprep.subr.bf16.mxu0 %v6169_v3  ;;  %v4653_v3 = vpack.c.bf16 %v2823_v8, %v2822_v4 }
0x143c   :  { %4652 = vmatpush3.bf16.msra.mxu1 %v4651_v27 }
0x143d   :  { %4654 = vmatprep.subr.bf16.mxu1 %v4653_v3 }
0x143e   :  { %4620 = vmatpush1.bf16.msra.mxu0 %v6172_v16  ;;  %v2806_v16 = vld [vmem:[%s6573_s10 + $0x30] sm:$0xff] }
0x143f   :  { %4622 = vmatprep.subr.bf16.mxu0 %v6178_v42  ;;  %v2807_v42 = vld [vmem:[%s6573_s10 + $0x38] sm:$0xff] }
0x1442   :  { %4624 = vmatpush1.bf16.msra.mxu0 %v6180_v23  ;;  %v4655_v23 = vpack.c.bf16 %v2807_v42, %v2806_v16 }
0x1443   :  { %4626 = vmatprep.subr.bf16.mxu0 %v6184_v46 }
0x1444   :  { %4656 = vmatpush3.bf16.msra.mxu1 %v4655_v23 }
0x1446   :  { %4628 = vmatpush1.bf16.msra.mxu0 %v6186_v17 }
0x1447   :  { %4630 = vmatprep.subr.bf16.mxu0 %v6189_v62 }
0x144a   :  { %4632 = vmatpush1.bf16.msra.mxu0 %v6192_v58 }
0x144b   :  { %4634 = vmatprep.subr.bf16.mxu0 %v6195_v11 }
0x144e   :  { %4636 = vmatpush1.bf16.msra.mxu0 %v6198_v36 }
0x144f   :  { %4638 = vmatprep.subr.bf16.mxu0 %v6202_v38  ;;  %v2824_v38 = vld [vmem:[%s6573_s10 + $0xc0] sm:$0xff] }
0x1452   :  { %4640 = vmatpush1.bf16.msra.mxu0 %v6204_v33  ;;  %v2825_v33 = vld [vmem:[%s6573_s10 + $0xc8] sm:$0xff] }
0x1453   :  { %v4657_v29 = vpack.c.bf16 %v2825_v33, %v2824_v38 }
0x1455   :  { %4658 = vmatprep.subr.bf16.mxu1 %v4657_v29 }
0x1456   :  { %4660 = vmatpush3.bf16.msra.mxu1 %v4659_v53 }
0x1457   :  { %4662 = vmatprep.subr.bf16.mxu1 %v4661_v47 }
0x145a   :  { %4664 = vmatpush3.bf16.msra.mxu1 %v4663_v1 }
0x145b   :  { %4666 = vmatprep.subr.bf16.mxu1 %v4665_v52 }
0x145e   :  { %4668 = vmatpush3.bf16.msra.mxu1 %v4667_v35 }
0x145f   :  { %4670 = vmatprep.subr.bf16.mxu1 %v4669_v54 }
0x1462   :  { %4672 = vmatpush3.bf16.msra.mxu1 %v4671_v30 }
0x14e8   :  { %v2714_v46 = vpop.f32.mrb[28].mxu0 }
0x14e9   :  { %v4725_v17 = vadd.f32 %v2714_v46, %v6249_v22  ;;  %v2716_v62 = vpop.f32.mrb[29].mxu0 }
0x14ea   :  { %v4726_v58 = vadd.f32 %v2716_v62, %v6252_v39 }
0x14ec   :  { %4864 = vtanh.f32 %v4726_v58 }
0x14ed   :  { %4866 = vtanh.f32 %v4725_v17 }
0x14f6   :  { %v4865_v11 = vpop.eup %4864 }
0x14f7   :  { %v4867_v36 = vpop.eup %4866  ;;  %2789 = vmatprep.mubr.f32.mxu0 %v4865_v11 }
0x14f8   :  { %2790 = vmatmul.mubr.f32.vlgmr.msra.gmra.mrb[30].mxu0 %v4867_v36 }
0x15cb   :  { %v2791_v37 = vpop.f32.mrb[30].mxu0 }
0x15cc   :  { %v4727_v0 = vadd.f32 %v2791_v37, %v6249_v22  ;;  %v2793_v45 = vpop.f32.mrb[31].mxu0 }
0x15cd   :  { %v4728_v51 = vadd.f32 %v2793_v45, %v6252_v39 }
0x15cf   :  { %4868 = vtanh.f32 %v4728_v51 }
0x15d0   :  { %4870 = vtanh.f32 %v4727_v0 }
0x15d9   :  { %v4869_v34 = vpop.eup %4868 }
0x15da   :  { %v4871_v61 = vpop.eup %4870  ;;  %2903 = vmatprep.mubr.f32.mxu1 %v4869_v34 }
0x15db   :  { %2904 = vmatmul.mubr.f32.vlgmr.msra.gmra.mrb[24].mxu1 %v4871_v61 }
0x16ae   :  { %v2958_v10 = vpop.f32.mrb[24].mxu1 }
0x16af   :  { %v2959_v63 = vpop.f32.mrb[25].mxu1 }
0x16b0   :  { %v2960_v55 = vadd.f32 %v2959_v63, %v2958_v10 }
0x16b2   :  { %v2906_v56 = vadd.f32 %v2960_v55, %v2925_v25 }
0x16b4   :  { %2909 = vst [vmem:[%s6575_s12] sm:$0xff] %v2906_v56 }
0x16b5   :  { %2914 = vsyncpa [#allocation5], 1 }
0x16b6   :  { %2915 = vsyncpa [#allocation7], 1 }
0x16b7   :  { %2916 = vsyncpa [#allocation10], 1 }

</bundles_post_ra>
